<compile_context>
chip_gen: v7x
topology: tpu7x:2x2x1
jax: 0.10.0
libtpu: 0.0.40
codegen_flags: <defaults>
</compile_context>

<pallas_src>
import functools

import jax
import jax.numpy as jnp
from jax.experimental import pallas as pl
from jax.experimental.pallas import tpu as pltpu

EPS = 1e-5


# ----------------------------------------------------------------------------
# wrapper-side parameter preparation (one-time)
# ----------------------------------------------------------------------------
def calculate_groups_for_channels(c):
    # TODO(synk): source of calculate_groups_for_channels not provided; using
    # the largest divisor of `c` that is <= 8.
    for g in (8, 4, 2, 1):
        if c % g == 0:
            return g
    return 1


def _banded_conv_weights(w_hwio, W):
    """(3, 3, Cin, Cout) HWIO -> (3*W*Cin, W*Cout) banded lane-space matrix.

    Row index = dy*(W*Cin) + wi*Cin + ci, col index = wo*Cout + co, with value
    w[dy, wi-wo+1, ci, co] when wi-wo+1 in {0,1,2} else 0 (implicit zero pad).
    """
    Cin, Cout = w_hwio.shape[2], w_hwio.shape[3]
    wi = jnp.arange(W)[:, None]
    wo = jnp.arange(W)[None, :]
    dx = wi - wo + 1
    valid = ((dx >= 0) & (dx <= 2)).astype(w_hwio.dtype)
    dxc = jnp.clip(dx, 0, 2)
    b = w_hwio[:, dxc, :, :]                          # (3, W, W, Cin, Cout)
    b = b * valid[None, :, :, None, None]
    b = jnp.transpose(b, (0, 1, 3, 2, 4))             # (3, W, Cin, W, Cout)
    return b.reshape(3 * W * Cin, W * Cout)


def _reduction_mats(N, H, W, C, groups):
    """Lane-space reduction/broadcast matrices (lane l = w*C + c)."""
    WC = W * C
    chan = jnp.arange(WC) % C
    same_chan = (chan[:, None] == chan[None, :]).astype(jnp.float32)
    bnmat = same_chan / float(N * H * W)              # per-channel batch mean
    cpg = C // groups
    grp = chan // cpg
    same_grp = (grp[:, None] == grp[None, :]).astype(jnp.float32)
    gnmat = same_grp / float(cpg * H * W)             # per-sample group mean
    cid = jnp.arange(C)
    pool = (chan[:, None] == cid[None, :]).astype(jnp.float32) / float(H * W)
    bcast = (cid[:, None] == chan[None, :]).astype(jnp.float32)
    return bnmat, gnmat, pool, bcast


def prepare_kernel_params(p, N, H, W, C):
    groups = calculate_groups_for_channels(C)
    bnmat, gnmat, pool, bcast = _reduction_mats(N, H, W, C, groups)

    def aff(*vs):  # stack per-channel (C,) params as lane-tiled (k, W*C) rows
        return jnp.stack([jnp.tile(v, W) for v in vs], axis=0)

    cnn, nhs = p["cnn"], p["nhs"]
    return dict(
        cnn_w1=_banded_conv_weights(cnn["conv1_w"], W),
        cnn_w2=_banded_conv_weights(cnn["conv2_w"], W),
        nhs_w1=_banded_conv_weights(nhs["conv1_w"], W),
        cnn_aff=aff(cnn["bn1_g"], cnn["bn1_b"], cnn["bn2_g"], cnn["bn2_b"],
                    cnn["gn_w"], cnn["gn_b"]),
        nhs_aff=aff(nhs["bn1_g"], nhs["bn1_b"], nhs["gn_w"], nhs["gn_b"]),
        cnn_se1=cnn["se_w1"], cnn_se2=cnn["se_w2"],
        nhs_se1=nhs["se_w1"], nhs_se2=nhs["se_w2"],
        bnmat=bnmat, gnmat=gnmat, pool=pool, bcast=bcast,
    )


# ----------------------------------------------------------------------------
# in-kernel building blocks (operate on (N*H, W*C) f32 row slabs)
# ----------------------------------------------------------------------------
def _shift_rows(x, d, H):
    """shifted[n*H+h] = x[n*H+h+d] within each sample, zero at sample edges.

    Full-slab form: one slice+concat plus one masked select (no per-sample
    Python loop), valid-row mask built from a 2-D iota.
    """
    NH, WC = x.shape
    zero = jnp.zeros((1, WC), jnp.float32)
    row = jax.lax.broadcasted_iota(jnp.int32, (NH, 1), 0)
    h = row % H
    if d > 0:
        shifted = jnp.concatenate([x[d:, :], zero], axis=0)
        keep = h < (H - d)          # rows whose source stays inside the sample
    else:
        shifted = jnp.concatenate([zero, x[:NH + d, :]], axis=0)
        keep = h >= (-d)
    return jnp.where(keep, shifted, 0.0)


def _conv3x3(x, w_ref, H):
    """3x3, stride 1, pad 1, bias-free conv as one banded lane-space matmul."""
    xs = jnp.concatenate(
        [_shift_rows(x, -1, H), x, _shift_rows(x, 1, H)], axis=1)
    return jnp.dot(xs, w_ref[...], preferred_element_type=jnp.float32)


def _batchnorm(y, gamma_l, beta_l, bnmat_ref):
    """Training-mode BN over the whole (resident) batch, two-pass stats."""
    rs = jnp.sum(y, axis=0, keepdims=True)                      # (1, WC)
    mean = jnp.dot(rs, bnmat_ref[...], preferred_element_type=jnp.float32)
    d = y - mean
    vs = jnp.sum(d * d, axis=0, keepdims=True)
    var = jnp.dot(vs, bnmat_ref[...], preferred_element_type=jnp.float32)
    return d * jax.lax.rsqrt(var + EPS) * gamma_l + beta_l


def _groupnorm(y, gamma_l, beta_l, gnmat_ref, N, H):
    """Per-sample GroupNorm via the group-membership matmul, two-pass stats."""
    gnmat = gnmat_ref[...]
    parts = []
    for n in range(N):
        s = y[n * H:(n + 1) * H, :]
        rs = jnp.sum(s, axis=0, keepdims=True)
        mean = jnp.dot(rs, gnmat, preferred_element_type=jnp.float32)
        d = s - mean
        vs = jnp.sum(d * d, axis=0, keepdims=True)
        var = jnp.dot(vs, gnmat, preferred_element_type=jnp.float32)
        parts.append(d * jax.lax.rsqrt(var + EPS))
    return jnp.concatenate(parts, axis=0) * gamma_l + beta_l


def _se(y, w1_ref, w2_ref, pool_ref, bcast_ref, N, H):
    """SE: global-avg-pool -> FC -> ReLU -> FC -> sigmoid -> channel scale.
    TODO(synk): SEBlock source not provided; canonical bias-free SE assumed."""
    w1 = w1_ref[...]
    w2 = w2_ref[...]
    pool = pool_ref[...]
    bcast = bcast_ref[...]
    parts = []
    for n in range(N):
        s = y[n * H:(n + 1) * H, :]
        rs = jnp.sum(s, axis=0, keepdims=True)                  # (1, WC)
        p = jnp.dot(rs, pool, preferred_element_type=jnp.float32)    # (1, C)
        z = jnp.maximum(jnp.dot(p, w1, preferred_element_type=jnp.float32), 0.0)
        g = jax.nn.sigmoid(jnp.dot(z, w2, preferred_element_type=jnp.float32))
        g_l = jnp.dot(g, bcast, preferred_element_type=jnp.float32)  # (1, WC)
        parts.append(s * g_l)
    return jnp.concatenate(parts, axis=0)


# ----------------------------------------------------------------------------
# the single fused HybridBlock kernel (one grid point; both paths + combine)
# ----------------------------------------------------------------------------
def hybrid_kernel(pw_ref,                 # SMEM (2,) softmax path weights
                  x_ref,
                  cw1_ref, cw2_ref, nw1_ref,
                  caff_ref, naff_ref,
                  cse1_ref, cse2_ref, nse1_ref, nse2_ref,
                  bnmat_ref, gnmat_ref, pool_ref, bcast_ref,
                  o_ref, *, N, H):
    x = x_ref[...].astype(jnp.float32)

    # ---------------- CNN path ----------------
    a = caff_ref[...]
    y = _conv3x3(x, cw1_ref, H)
    y = _batchnorm(y, a[0:1], a[1:2], bnmat_ref)
    y = _groupnorm(y, a[4:5], a[5:6], gnmat_ref, N, H)
    y = jnp.maximum(y, 0.0)
    y = _conv3x3(y, cw2_ref, H)
    y = _batchnorm(y, a[2:3], a[3:4], bnmat_ref)
    y = _groupnorm(y, a[4:5], a[5:6], gnmat_ref, N, H)
    y = _se(y, cse1_ref, cse2_ref, pool_ref, bcast_ref, N, H)
    y = jnp.maximum(y + x, 0.0)
    # torch.isnan(out).any() -> fall back to identity (whole-batch check)
    nan_mask = jnp.where(jnp.isnan(y), 1.0, 0.0)
    bad = jnp.sum(jnp.sum(nan_mask, axis=0, keepdims=True),
                  axis=1, keepdims=True)                         # (1, 1)
    cnn_out = jnp.where(bad > 0.0, x, y)

    # ---------------- NHS path ----------------
    # TODO(synk): NHSNetBlock source not provided; stand-in path built from the
    # same blocks (conv3x3 -> BN -> GroupNorm -> SE -> residual + ReLU).
    a = naff_ref[...]
    z = _conv3x3(x, nw1_ref, H)
    z = _batchnorm(z, a[0:1], a[1:2], bnmat_ref)
    z = _groupnorm(z, a[2:3], a[3:4], gnmat_ref, N, H)
    z = _se(z, nse1_ref, nse2_ref, pool_ref, bcast_ref, N, H)
    nhs_out = jnp.maximum(z + x, 0.0)

    # ---------------- fused softmax-weighted path combine ----------------
    w0 = pw_ref[0]
    w1 = pw_ref[1]
    o_ref[...] = (w0 * cnn_out + w1 * nhs_out).astype(o_ref.dtype)


def _hybrid_pallas(x_rows, kp, pw, N, H):
    NH, WC = x_rows.shape
    operands = (pw, x_rows,
                kp["cnn_w1"], kp["cnn_w2"], kp["nhs_w1"],
                kp["cnn_aff"], kp["nhs_aff"],
                kp["cnn_se1"], kp["cnn_se2"], kp["nhs_se1"], kp["nhs_se2"],
                kp["bnmat"], kp["gnmat"], kp["pool"], kp["bcast"])
    full2 = lambda i: (0, 0)
    in_specs = ([pl.BlockSpec(memory_space=pltpu.MemorySpace.SMEM)]
                + [pl.BlockSpec(a.shape, full2) for a in operands[1:]])
    kern = functools.partial(hybrid_kernel, N=N, H=H)
    return pl.pallas_call(
        kern,
        out_shape=jax.ShapeDtypeStruct((NH, WC), jnp.float32),
        grid=(1,),
        in_specs=in_specs,
        out_specs=pl.BlockSpec((NH, WC), full2),
        compiler_params=pltpu.CompilerParams(
            dimension_semantics=("arbitrary",)),
    )(*operands)


@jax.jit
def hybrid_block_forward(x_nhwc, kparams, path_weights):
    N, H, W, C = x_nhwc.shape
    x_rows = x_nhwc.reshape(N * H, W * C)                 # lane-dense slab
    pw = jax.nn.softmax(path_weights)                     # tiny (2,) op
    out = _hybrid_pallas(x_rows, kparams, pw, N, H)       # one fused kernel
    return out.reshape(N, H, W, C)


# ----------------------------------------------------------------------------
# deterministic parameter init (PyTorch-equivalent fresh module, HWIO convs)
# ----------------------------------------------------------------------------
def init_params(key, in_c, out_c, se_reduction=8):
    assert in_c == out_c, "stride=1 with in_channels == out_channels supported"
    keys = jax.random.split(key, 7)

    def conv_w(k, ci, co):
        fan_in = 9 * ci
        return jax.random.normal(k, (3, 3, ci, co), jnp.float32) * (2.0 / fan_in) ** 0.5

    hid = max(1, out_c // se_reduction)
    ones = jnp.ones((out_c,), jnp.float32)
    zeros = jnp.zeros((out_c,), jnp.float32)
    cnn = dict(
        conv1_w=conv_w(keys[0], in_c, out_c),
        conv2_w=conv_w(keys[1], out_c, out_c),
        bn1_g=ones, bn1_b=zeros, bn2_g=ones, bn2_b=zeros,
        gn_w=ones, gn_b=zeros,
        se_w1=jax.random.normal(keys[2], (out_c, hid), jnp.float32) / out_c ** 0.5,
        se_w2=jax.random.normal(keys[3], (hid, out_c), jnp.float32) / hid ** 0.5,
    )
    nhs = dict(
        conv1_w=conv_w(keys[4], in_c, out_c),
        bn1_g=ones, bn1_b=zeros,
        gn_w=ones, gn_b=zeros,
        se_w1=jax.random.normal(keys[5], (out_c, hid), jnp.float32) / out_c ** 0.5,
        se_w2=jax.random.normal(keys[6], (hid, out_c), jnp.float32) / hid ** 0.5,
    )
    return dict(cnn=cnn, nhs=nhs, path_weights=jnp.full((2,), 0.5, jnp.float32))


# ----------------------------------------------------------------------------
if __name__ == "__main__":
    key = jax.random.PRNGKey(0)
    kx, kp = jax.random.split(key)

    N, C, H, W = 2, 8, 16, 16                  # in_channels == out_channels, stride=1
    x_nchw = jax.random.normal(kx, (N, C, H, W), jnp.float32)    # PyTorch layout
    x = jnp.transpose(x_nchw, (0, 2, 3, 1))                      # -> NHWC boundary

    params = init_params(kp, C, C)
    kernel_params = prepare_kernel_params(params, N, H, W, C)    # one-time prep

    out = hybrid_block_forward(x, kernel_params, params["path_weights"])
    out = jax.block_until_ready(out)

    assert out.shape == (N, H, W, C), out.shape
    assert not bool(jnp.any(jnp.isnan(out)))
    print("KERNEL_OK")
</pallas_src>

<mosaic_0001>
module attributes {stable_mosaic.version = 11 : i64} {
  func.func @hybrid_kernel(%arg0: i32, %arg1: memref<2xf32, #tpu.memory_space<smem>>, %arg2: memref<32x128xf32, #tpu.memory_space<vmem>>, %arg3: memref<384x128xf32, #tpu.memory_space<vmem>>, %arg4: memref<384x128xf32, #tpu.memory_space<vmem>>, %arg5: memref<384x128xf32, #tpu.memory_space<vmem>>, %arg6: memref<6x128xf32, #tpu.memory_space<vmem>>, %arg7: memref<4x128xf32, #tpu.memory_space<vmem>>, %arg8: memref<8x1xf32, #tpu.memory_space<vmem>>, %arg9: memref<1x8xf32, #tpu.memory_space<vmem>>, %arg10: memref<8x1xf32, #tpu.memory_space<vmem>>, %arg11: memref<1x8xf32, #tpu.memory_space<vmem>>, %arg12: memref<128x128xf32, #tpu.memory_space<vmem>>, %arg13: memref<128x128xf32, #tpu.memory_space<vmem>>, %arg14: memref<128x8xf32, #tpu.memory_space<vmem>>, %arg15: memref<8x128xf32, #tpu.memory_space<vmem>>, %arg16: memref<32x128xf32, #tpu.memory_space<vmem>>) attributes {dimension_semantics = [#tpu.dimension_semantics<arbitrary>], iteration_bounds = array<i64: 1>, scalar_prefetch = 0 : i64, scratch_operands = 0 : i64, tpu.core_type = #tpu.core_type<tc>, window_params = [{transform_indices = @transform_0, window_bounds = array<i64: 2>}, {pipeline_mode = #tpu.pipeline_mode<synchronous>, transform_indices = @transform_1, window_bounds = array<i64: 32, 128>}, {pipeline_mode = #tpu.pipeline_mode<synchronous>, transform_indices = @transform_2, window_bounds = array<i64: 384, 128>}, {pipeline_mode = #tpu.pipeline_mode<synchronous>, transform_indices = @transform_3, window_bounds = array<i64: 384, 128>}, {pipeline_mode = #tpu.pipeline_mode<synchronous>, transform_indices = @transform_4, window_bounds = array<i64: 384, 128>}, {pipeline_mode = #tpu.pipeline_mode<synchronous>, transform_indices = @transform_5, window_bounds = array<i64: 6, 128>}, {pipeline_mode = #tpu.pipeline_mode<synchronous>, transform_indices = @transform_6, window_bounds = array<i64: 4, 128>}, {pipeline_mode = #tpu.pipeline_mode<synchronous>, transform_indices = @transform_7, window_bounds = array<i64: 8, 1>}, {pipeline_mode = #tpu.pipeline_mode<synchronous>, transform_indices = @transform_8, window_bounds = array<i64: 1, 8>}, {pipeline_mode = #tpu.pipeline_mode<synchronous>, transform_indices = @transform_9, window_bounds = array<i64: 8, 1>}, {pipeline_mode = #tpu.pipeline_mode<synchronous>, transform_indices = @transform_10, window_bounds = array<i64: 1, 8>}, {pipeline_mode = #tpu.pipeline_mode<synchronous>, transform_indices = @transform_11, window_bounds = array<i64: 128, 128>}, {pipeline_mode = #tpu.pipeline_mode<synchronous>, transform_indices = @transform_12, window_bounds = array<i64: 128, 128>}, {pipeline_mode = #tpu.pipeline_mode<synchronous>, transform_indices = @transform_13, window_bounds = array<i64: 128, 8>}, {pipeline_mode = #tpu.pipeline_mode<synchronous>, transform_indices = @transform_14, window_bounds = array<i64: 8, 128>}, {pipeline_mode = #tpu.pipeline_mode<synchronous>, transform_indices = @transform_15, window_bounds = array<i64: 32, 128>}]} {
    %c0 = arith.constant 0 : index
    %c0_0 = arith.constant 0 : index
    %0 = vector.load %arg2[%c0, %c0_0] : memref<32x128xf32, #tpu.memory_space<vmem>>, vector<32x128xf32>
    %c0_1 = arith.constant 0 : index
    %c0_2 = arith.constant 0 : index
    %1 = vector.load %arg6[%c0_1, %c0_2] : memref<6x128xf32, #tpu.memory_space<vmem>>, vector<6x128xf32>
    %cst = arith.constant 0.000000e+00 : f32
    %2 = vector.broadcast %cst : f32 to vector<1x128xf32>
    %3 = tpu.iota {dimensions = array<i32: 0>} : vector<32x1xi32>
    %c16_i32 = arith.constant 16 : i32
    %c0_i32 = arith.constant 0 : i32
    %4 = arith.cmpi eq, %c16_i32, %c0_i32 : i32
    %c1_i32 = arith.constant 1 : i32
    %5 = arith.select %4, %c1_i32, %c16_i32 : i32
    %6 = vector.broadcast %5 : i32 to vector<32x1xi32>
    %7 = arith.remsi %3, %6 : vector<32x1xi32>
    %c0_i32_3 = arith.constant 0 : i32
    %8 = vector.broadcast %c0_i32_3 : i32 to vector<32x1xi32>
    %9 = arith.cmpi ne, %7, %8 : vector<32x1xi32>
    %c0_i32_4 = arith.constant 0 : i32
    %10 = vector.broadcast %c0_i32_4 : i32 to vector<32x1xi32>
    %11 = arith.cmpi slt, %7, %10 : vector<32x1xi32>
    %c0_i32_5 = arith.constant 0 : i32
    %12 = arith.cmpi slt, %5, %c0_i32_5 : i32
    %13 = vector.broadcast %12 : i1 to vector<32x1xi1>
    %14 = vector.broadcast %13 : vector<32x1xi1> to vector<32x1xi1>
    %15 = arith.xori %11, %14 : vector<32x1xi1>
    %16 = arith.andi %15, %9 : vector<32x1xi1>
    %17 = vector.broadcast %5 : i32 to vector<32x1xi32>
    %18 = arith.addi %7, %17 : vector<32x1xi32>
    %19 = arith.select %16, %18, %7 : vector<32x1xi1>, vector<32x1xi32>
    %20 = vector.extract_strided_slice %0 {offsets = [0, 0], sizes = [31, 128], strides = [1, 1]} : vector<32x128xf32> to vector<31x128xf32>
    %21 = tpu.concatenate %2, %20 in 0 : vector<1x128xf32>, vector<31x128xf32> -> vector<32x128xf32>
    %c1_i32_6 = arith.constant 1 : i32
    %22 = vector.broadcast %c1_i32_6 : i32 to vector<32x1xi32>
    %23 = arith.cmpi sge, %19, %22 : vector<32x1xi32>
    %cst_7 = arith.constant 0.000000e+00 : f32
    %24 = vector.shape_cast %23 : vector<32x1xi1> to vector<32x1xi1>
    %25 = vector.broadcast %24 : vector<32x1xi1> to vector<32x128xi1>
    %26 = vector.broadcast %cst_7 : f32 to vector<32x128xf32>
    %27 = arith.select %25, %21, %26 : vector<32x128xi1>, vector<32x128xf32>
    %cst_8 = arith.constant 0.000000e+00 : f32
    %28 = vector.broadcast %cst_8 : f32 to vector<1x128xf32>
    %29 = tpu.iota {dimensions = array<i32: 0>} : vector<32x1xi32>
    %c16_i32_9 = arith.constant 16 : i32
    %c0_i32_10 = arith.constant 0 : i32
    %30 = arith.cmpi eq, %c16_i32_9, %c0_i32_10 : i32
    %c1_i32_11 = arith.constant 1 : i32
    %31 = arith.select %30, %c1_i32_11, %c16_i32_9 : i32
    %32 = vector.broadcast %31 : i32 to vector<32x1xi32>
    %33 = arith.remsi %29, %32 : vector<32x1xi32>
    %c0_i32_12 = arith.constant 0 : i32
    %34 = vector.broadcast %c0_i32_12 : i32 to vector<32x1xi32>
    %35 = arith.cmpi ne, %33, %34 : vector<32x1xi32>
    %c0_i32_13 = arith.constant 0 : i32
    %36 = vector.broadcast %c0_i32_13 : i32 to vector<32x1xi32>
    %37 = arith.cmpi slt, %33, %36 : vector<32x1xi32>
    %c0_i32_14 = arith.constant 0 : i32
    %38 = arith.cmpi slt, %31, %c0_i32_14 : i32
    %39 = vector.broadcast %38 : i1 to vector<32x1xi1>
    %40 = vector.broadcast %39 : vector<32x1xi1> to vector<32x1xi1>
    %41 = arith.xori %37, %40 : vector<32x1xi1>
    %42 = arith.andi %41, %35 : vector<32x1xi1>
    %43 = vector.broadcast %31 : i32 to vector<32x1xi32>
    %44 = arith.addi %33, %43 : vector<32x1xi32>
    %45 = arith.select %42, %44, %33 : vector<32x1xi1>, vector<32x1xi32>
    %46 = vector.extract_strided_slice %0 {offsets = [1, 0], sizes = [31, 128], strides = [1, 1]} : vector<32x128xf32> to vector<31x128xf32>
    %47 = tpu.concatenate %46, %28 in 0 : vector<31x128xf32>, vector<1x128xf32> -> vector<32x128xf32>
    %c15_i32 = arith.constant 15 : i32
    %48 = vector.broadcast %c15_i32 : i32 to vector<32x1xi32>
    %49 = arith.cmpi slt, %45, %48 : vector<32x1xi32>
    %cst_15 = arith.constant 0.000000e+00 : f32
    %50 = vector.shape_cast %49 : vector<32x1xi1> to vector<32x1xi1>
    %51 = vector.broadcast %50 : vector<32x1xi1> to vector<32x128xi1>
    %52 = vector.broadcast %cst_15 : f32 to vector<32x128xf32>
    %53 = arith.select %51, %47, %52 : vector<32x128xi1>, vector<32x128xf32>
    %54 = tpu.concatenate %27, %0, %53 in 1 : vector<32x128xf32>, vector<32x128xf32>, vector<32x128xf32> -> vector<32x384xf32>
    %c0_16 = arith.constant 0 : index
    %c0_17 = arith.constant 0 : index
    %55 = vector.load %arg3[%c0_16, %c0_17] : memref<384x128xf32, #tpu.memory_space<vmem>>, vector<384x128xf32>
    %cst_18 = arith.constant dense<0.000000e+00> : vector<32x128xf32>
    %56 = tpu.matmul %54, %55, %cst_18 {dimension_numbers = #tpu.dot_dimension_numbers<[1], [0], [0], [1], [0, 0, 1, 1], [], []>} : vector<32x384xf32>, vector<384x128xf32>, vector<32x128xf32> -> vector<32x128xf32>
    %57 = vector.extract_strided_slice %1 {offsets = [0, 0], sizes = [1, 128], strides = [1, 1]} : vector<6x128xf32> to vector<1x128xf32>
    %58 = vector.extract_strided_slice %1 {offsets = [1, 0], sizes = [1, 128], strides = [1, 1]} : vector<6x128xf32> to vector<1x128xf32>
    %cst_19 = arith.constant dense<0.000000e+00> : vector<128xf32>
    %59 = vector.multi_reduction <add>, %56, %cst_19 [0] : vector<32x128xf32> to vector<128xf32>
    %60 = vector.shape_cast %59 : vector<128xf32> to vector<1x128xf32>
    %c0_20 = arith.constant 0 : index
    %c0_21 = arith.constant 0 : index
    %61 = vector.load %arg12[%c0_20, %c0_21] : memref<128x128xf32, #tpu.memory_space<vmem>>, vector<128x128xf32>
    %cst_22 = arith.constant dense<0.000000e+00> : vector<1x128xf32>
    %62 = tpu.matmul %60, %61, %cst_22 {dimension_numbers = #tpu.dot_dimension_numbers<[1], [0], [0], [1], [0, 0, 1, 1], [], []>} : vector<1x128xf32>, vector<128x128xf32>, vector<1x128xf32> -> vector<1x128xf32>
    %63 = vector.broadcast %62 : vector<1x128xf32> to vector<32x128xf32>
    %64 = arith.subf %56, %63 : vector<32x128xf32>
    %65 = arith.mulf %64, %64 : vector<32x128xf32>
    %cst_23 = arith.constant dense<0.000000e+00> : vector<128xf32>
    %66 = vector.multi_reduction <add>, %65, %cst_23 [0] : vector<32x128xf32> to vector<128xf32>
    %67 = vector.shape_cast %66 : vector<128xf32> to vector<1x128xf32>
    %c0_24 = arith.constant 0 : index
    %c0_25 = arith.constant 0 : index
    %68 = vector.load %arg12[%c0_24, %c0_25] : memref<128x128xf32, #tpu.memory_space<vmem>>, vector<128x128xf32>
    %cst_26 = arith.constant dense<0.000000e+00> : vector<1x128xf32>
    %69 = tpu.matmul %67, %68, %cst_26 {dimension_numbers = #tpu.dot_dimension_numbers<[1], [0], [0], [1], [0, 0, 1, 1], [], []>} : vector<1x128xf32>, vector<128x128xf32>, vector<1x128xf32> -> vector<1x128xf32>
    %cst_27 = arith.constant 9.99999974E-6 : f32
    %70 = vector.broadcast %cst_27 : f32 to vector<1x128xf32>
    %71 = arith.addf %69, %70 : vector<1x128xf32>
    %72 = math.rsqrt %71 : vector<1x128xf32>
    %73 = vector.broadcast %72 : vector<1x128xf32> to vector<32x128xf32>
    %74 = arith.mulf %64, %73 : vector<32x128xf32>
    %75 = vector.broadcast %57 : vector<1x128xf32> to vector<32x128xf32>
    %76 = arith.mulf %74, %75 : vector<32x128xf32>
    %77 = vector.broadcast %58 : vector<1x128xf32> to vector<32x128xf32>
    %78 = arith.addf %76, %77 : vector<32x128xf32>
    %79 = vector.extract_strided_slice %1 {offsets = [4, 0], sizes = [1, 128], strides = [1, 1]} : vector<6x128xf32> to vector<1x128xf32>
    %80 = vector.extract_strided_slice %1 {offsets = [5, 0], sizes = [1, 128], strides = [1, 1]} : vector<6x128xf32> to vector<1x128xf32>
    %c0_28 = arith.constant 0 : index
    %c0_29 = arith.constant 0 : index
    %81 = vector.load %arg13[%c0_28, %c0_29] : memref<128x128xf32, #tpu.memory_space<vmem>>, vector<128x128xf32>
    %82 = vector.extract_strided_slice %78 {offsets = [0, 0], sizes = [16, 128], strides = [1, 1]} : vector<32x128xf32> to vector<16x128xf32>
    %cst_30 = arith.constant dense<0.000000e+00> : vector<128xf32>
    %83 = vector.multi_reduction <add>, %82, %cst_30 [0] : vector<16x128xf32> to vector<128xf32>
    %84 = vector.shape_cast %83 : vector<128xf32> to vector<1x128xf32>
    %cst_31 = arith.constant dense<0.000000e+00> : vector<1x128xf32>
    %85 = tpu.matmul %84, %81, %cst_31 {dimension_numbers = #tpu.dot_dimension_numbers<[1], [0], [0], [1], [0, 0, 1, 1], [], []>} : vector<1x128xf32>, vector<128x128xf32>, vector<1x128xf32> -> vector<1x128xf32>
    %86 = vector.broadcast %85 : vector<1x128xf32> to vector<16x128xf32>
    %87 = arith.subf %82, %86 : vector<16x128xf32>
    %88 = arith.mulf %87, %87 : vector<16x128xf32>
    %cst_32 = arith.constant dense<0.000000e+00> : vector<128xf32>
    %89 = vector.multi_reduction <add>, %88, %cst_32 [0] : vector<16x128xf32> to vector<128xf32>
    %90 = vector.shape_cast %89 : vector<128xf32> to vector<1x128xf32>
    %cst_33 = arith.constant dense<0.000000e+00> : vector<1x128xf32>
    %91 = tpu.matmul %90, %81, %cst_33 {dimension_numbers = #tpu.dot_dimension_numbers<[1], [0], [0], [1], [0, 0, 1, 1], [], []>} : vector<1x128xf32>, vector<128x128xf32>, vector<1x128xf32> -> vector<1x128xf32>
    %cst_34 = arith.constant 9.99999974E-6 : f32
    %92 = vector.broadcast %cst_34 : f32 to vector<1x128xf32>
    %93 = arith.addf %91, %92 : vector<1x128xf32>
    %94 = math.rsqrt %93 : vector<1x128xf32>
    %95 = vector.broadcast %94 : vector<1x128xf32> to vector<16x128xf32>
    %96 = arith.mulf %87, %95 : vector<16x128xf32>
    %97 = vector.extract_strided_slice %78 {offsets = [16, 0], sizes = [16, 128], strides = [1, 1]} : vector<32x128xf32> to vector<16x128xf32>
    %cst_35 = arith.constant dense<0.000000e+00> : vector<128xf32>
    %98 = vector.multi_reduction <add>, %97, %cst_35 [0] : vector<16x128xf32> to vector<128xf32>
    %99 = vector.shape_cast %98 : vector<128xf32> to vector<1x128xf32>
    %cst_36 = arith.constant dense<0.000000e+00> : vector<1x128xf32>
    %100 = tpu.matmul %99, %81, %cst_36 {dimension_numbers = #tpu.dot_dimension_numbers<[1], [0], [0], [1], [0, 0, 1, 1], [], []>} : vector<1x128xf32>, vector<128x128xf32>, vector<1x128xf32> -> vector<1x128xf32>
    %101 = vector.broadcast %100 : vector<1x128xf32> to vector<16x128xf32>
    %102 = arith.subf %97, %101 : vector<16x128xf32>
    %103 = arith.mulf %102, %102 : vector<16x128xf32>
    %cst_37 = arith.constant dense<0.000000e+00> : vector<128xf32>
    %104 = vector.multi_reduction <add>, %103, %cst_37 [0] : vector<16x128xf32> to vector<128xf32>
    %105 = vector.shape_cast %104 : vector<128xf32> to vector<1x128xf32>
    %cst_38 = arith.constant dense<0.000000e+00> : vector<1x128xf32>
    %106 = tpu.matmul %105, %81, %cst_38 {dimension_numbers = #tpu.dot_dimension_numbers<[1], [0], [0], [1], [0, 0, 1, 1], [], []>} : vector<1x128xf32>, vector<128x128xf32>, vector<1x128xf32> -> vector<1x128xf32>
    %cst_39 = arith.constant 9.99999974E-6 : f32
    %107 = vector.broadcast %cst_39 : f32 to vector<1x128xf32>
    %108 = arith.addf %106, %107 : vector<1x128xf32>
    %109 = math.rsqrt %108 : vector<1x128xf32>
    %110 = vector.broadcast %109 : vector<1x128xf32> to vector<16x128xf32>
    %111 = arith.mulf %102, %110 : vector<16x128xf32>
    %112 = tpu.concatenate %96, %111 in 0 : vector<16x128xf32>, vector<16x128xf32> -> vector<32x128xf32>
    %113 = vector.broadcast %79 : vector<1x128xf32> to vector<32x128xf32>
    %114 = arith.mulf %112, %113 : vector<32x128xf32>
    %115 = vector.broadcast %80 : vector<1x128xf32> to vector<32x128xf32>
    %116 = arith.addf %114, %115 : vector<32x128xf32>
    %cst_40 = arith.constant 0.000000e+00 : f32
    %117 = vector.broadcast %cst_40 : f32 to vector<32x128xf32>
    %118 = arith.maximumf %116, %117 : vector<32x128xf32>
    %cst_41 = arith.constant 0.000000e+00 : f32
    %119 = vector.broadcast %cst_41 : f32 to vector<1x128xf32>
    %120 = tpu.iota {dimensions = array<i32: 0>} : vector<32x1xi32>
    %c16_i32_42 = arith.constant 16 : i32
    %c0_i32_43 = arith.constant 0 : i32
    %121 = arith.cmpi eq, %c16_i32_42, %c0_i32_43 : i32
    %c1_i32_44 = arith.constant 1 : i32
    %122 = arith.select %121, %c1_i32_44, %c16_i32_42 : i32
    %123 = vector.broadcast %122 : i32 to vector<32x1xi32>
    %124 = arith.remsi %120, %123 : vector<32x1xi32>
    %c0_i32_45 = arith.constant 0 : i32
    %125 = vector.broadcast %c0_i32_45 : i32 to vector<32x1xi32>
    %126 = arith.cmpi ne, %124, %125 : vector<32x1xi32>
    %c0_i32_46 = arith.constant 0 : i32
    %127 = vector.broadcast %c0_i32_46 : i32 to vector<32x1xi32>
    %128 = arith.cmpi slt, %124, %127 : vector<32x1xi32>
    %c0_i32_47 = arith.constant 0 : i32
    %129 = arith.cmpi slt, %122, %c0_i32_47 : i32
    %130 = vector.broadcast %129 : i1 to vector<32x1xi1>
    %131 = vector.broadcast %130 : vector<32x1xi1> to vector<32x1xi1>
    %132 = arith.xori %128, %131 : vector<32x1xi1>
    %133 = arith.andi %132, %126 : vector<32x1xi1>
    %134 = vector.broadcast %122 : i32 to vector<32x1xi32>
    %135 = arith.addi %124, %134 : vector<32x1xi32>
    %136 = arith.select %133, %135, %124 : vector<32x1xi1>, vector<32x1xi32>
    %137 = vector.extract_strided_slice %118 {offsets = [0, 0], sizes = [31, 128], strides = [1, 1]} : vector<32x128xf32> to vector<31x128xf32>
    %138 = tpu.concatenate %119, %137 in 0 : vector<1x128xf32>, vector<31x128xf32> -> vector<32x128xf32>
    %c1_i32_48 = arith.constant 1 : i32
    %139 = vector.broadcast %c1_i32_48 : i32 to vector<32x1xi32>
    %140 = arith.cmpi sge, %136, %139 : vector<32x1xi32>
    %cst_49 = arith.constant 0.000000e+00 : f32
    %141 = vector.shape_cast %140 : vector<32x1xi1> to vector<32x1xi1>
    %142 = vector.broadcast %141 : vector<32x1xi1> to vector<32x128xi1>
    %143 = vector.broadcast %cst_49 : f32 to vector<32x128xf32>
    %144 = arith.select %142, %138, %143 : vector<32x128xi1>, vector<32x128xf32>
    %cst_50 = arith.constant 0.000000e+00 : f32
    %145 = vector.broadcast %cst_50 : f32 to vector<1x128xf32>
    %146 = tpu.iota {dimensions = array<i32: 0>} : vector<32x1xi32>
    %c16_i32_51 = arith.constant 16 : i32
    %c0_i32_52 = arith.constant 0 : i32
    %147 = arith.cmpi eq, %c16_i32_51, %c0_i32_52 : i32
    %c1_i32_53 = arith.constant 1 : i32
    %148 = arith.select %147, %c1_i32_53, %c16_i32_51 : i32
    %149 = vector.broadcast %148 : i32 to vector<32x1xi32>
    %150 = arith.remsi %146, %149 : vector<32x1xi32>
    %c0_i32_54 = arith.constant 0 : i32
    %151 = vector.broadcast %c0_i32_54 : i32 to vector<32x1xi32>
    %152 = arith.cmpi ne, %150, %151 : vector<32x1xi32>
    %c0_i32_55 = arith.constant 0 : i32
    %153 = vector.broadcast %c0_i32_55 : i32 to vector<32x1xi32>
    %154 = arith.cmpi slt, %150, %153 : vector<32x1xi32>
    %c0_i32_56 = arith.constant 0 : i32
    %155 = arith.cmpi slt, %148, %c0_i32_56 : i32
    %156 = vector.broadcast %155 : i1 to vector<32x1xi1>
    %157 = vector.broadcast %156 : vector<32x1xi1> to vector<32x1xi1>
    %158 = arith.xori %154, %157 : vector<32x1xi1>
    %159 = arith.andi %158, %152 : vector<32x1xi1>
    %160 = vector.broadcast %148 : i32 to vector<32x1xi32>
    %161 = arith.addi %150, %160 : vector<32x1xi32>
    %162 = arith.select %159, %161, %150 : vector<32x1xi1>, vector<32x1xi32>
    %163 = vector.extract_strided_slice %118 {offsets = [1, 0], sizes = [31, 128], strides = [1, 1]} : vector<32x128xf32> to vector<31x128xf32>
    %164 = tpu.concatenate %163, %145 in 0 : vector<31x128xf32>, vector<1x128xf32> -> vector<32x128xf32>
    %c15_i32_57 = arith.constant 15 : i32
    %165 = vector.broadcast %c15_i32_57 : i32 to vector<32x1xi32>
    %166 = arith.cmpi slt, %162, %165 : vector<32x1xi32>
    %cst_58 = arith.constant 0.000000e+00 : f32
    %167 = vector.shape_cast %166 : vector<32x1xi1> to vector<32x1xi1>
    %168 = vector.broadcast %167 : vector<32x1xi1> to vector<32x128xi1>
    %169 = vector.broadcast %cst_58 : f32 to vector<32x128xf32>
    %170 = arith.select %168, %164, %169 : vector<32x128xi1>, vector<32x128xf32>
    %171 = tpu.concatenate %144, %118, %170 in 1 : vector<32x128xf32>, vector<32x128xf32>, vector<32x128xf32> -> vector<32x384xf32>
    %c0_59 = arith.constant 0 : index
    %c0_60 = arith.constant 0 : index
    %172 = vector.load %arg4[%c0_59, %c0_60] : memref<384x128xf32, #tpu.memory_space<vmem>>, vector<384x128xf32>
    %cst_61 = arith.constant dense<0.000000e+00> : vector<32x128xf32>
    %173 = tpu.matmul %171, %172, %cst_61 {dimension_numbers = #tpu.dot_dimension_numbers<[1], [0], [0], [1], [0, 0, 1, 1], [], []>} : vector<32x384xf32>, vector<384x128xf32>, vector<32x128xf32> -> vector<32x128xf32>
    %174 = vector.extract_strided_slice %1 {offsets = [2, 0], sizes = [1, 128], strides = [1, 1]} : vector<6x128xf32> to vector<1x128xf32>
    %175 = vector.extract_strided_slice %1 {offsets = [3, 0], sizes = [1, 128], strides = [1, 1]} : vector<6x128xf32> to vector<1x128xf32>
    %cst_62 = arith.constant dense<0.000000e+00> : vector<128xf32>
    %176 = vector.multi_reduction <add>, %173, %cst_62 [0] : vector<32x128xf32> to vector<128xf32>
    %177 = vector.shape_cast %176 : vector<128xf32> to vector<1x128xf32>
    %c0_63 = arith.constant 0 : index
    %c0_64 = arith.constant 0 : index
    %178 = vector.load %arg12[%c0_63, %c0_64] : memref<128x128xf32, #tpu.memory_space<vmem>>, vector<128x128xf32>
    %cst_65 = arith.constant dense<0.000000e+00> : vector<1x128xf32>
    %179 = tpu.matmul %177, %178, %cst_65 {dimension_numbers = #tpu.dot_dimension_numbers<[1], [0], [0], [1], [0, 0, 1, 1], [], []>} : vector<1x128xf32>, vector<128x128xf32>, vector<1x128xf32> -> vector<1x128xf32>
    %180 = vector.broadcast %179 : vector<1x128xf32> to vector<32x128xf32>
    %181 = arith.subf %173, %180 : vector<32x128xf32>
    %182 = arith.mulf %181, %181 : vector<32x128xf32>
    %cst_66 = arith.constant dense<0.000000e+00> : vector<128xf32>
    %183 = vector.multi_reduction <add>, %182, %cst_66 [0] : vector<32x128xf32> to vector<128xf32>
    %184 = vector.shape_cast %183 : vector<128xf32> to vector<1x128xf32>
    %c0_67 = arith.constant 0 : index
    %c0_68 = arith.constant 0 : index
    %185 = vector.load %arg12[%c0_67, %c0_68] : memref<128x128xf32, #tpu.memory_space<vmem>>, vector<128x128xf32>
    %cst_69 = arith.constant dense<0.000000e+00> : vector<1x128xf32>
    %186 = tpu.matmul %184, %185, %cst_69 {dimension_numbers = #tpu.dot_dimension_numbers<[1], [0], [0], [1], [0, 0, 1, 1], [], []>} : vector<1x128xf32>, vector<128x128xf32>, vector<1x128xf32> -> vector<1x128xf32>
    %cst_70 = arith.constant 9.99999974E-6 : f32
    %187 = vector.broadcast %cst_70 : f32 to vector<1x128xf32>
    %188 = arith.addf %186, %187 : vector<1x128xf32>
    %189 = math.rsqrt %188 : vector<1x128xf32>
    %190 = vector.broadcast %189 : vector<1x128xf32> to vector<32x128xf32>
    %191 = arith.mulf %181, %190 : vector<32x128xf32>
    %192 = vector.broadcast %174 : vector<1x128xf32> to vector<32x128xf32>
    %193 = arith.mulf %191, %192 : vector<32x128xf32>
    %194 = vector.broadcast %175 : vector<1x128xf32> to vector<32x128xf32>
    %195 = arith.addf %193, %194 : vector<32x128xf32>
    %196 = vector.extract_strided_slice %1 {offsets = [4, 0], sizes = [1, 128], strides = [1, 1]} : vector<6x128xf32> to vector<1x128xf32>
    %197 = vector.extract_strided_slice %1 {offsets = [5, 0], sizes = [1, 128], strides = [1, 1]} : vector<6x128xf32> to vector<1x128xf32>
    %c0_71 = arith.constant 0 : index
    %c0_72 = arith.constant 0 : index
    %198 = vector.load %arg13[%c0_71, %c0_72] : memref<128x128xf32, #tpu.memory_space<vmem>>, vector<128x128xf32>
    %199 = vector.extract_strided_slice %195 {offsets = [0, 0], sizes = [16, 128], strides = [1, 1]} : vector<32x128xf32> to vector<16x128xf32>
    %cst_73 = arith.constant dense<0.000000e+00> : vector<128xf32>
    %200 = vector.multi_reduction <add>, %199, %cst_73 [0] : vector<16x128xf32> to vector<128xf32>
    %201 = vector.shape_cast %200 : vector<128xf32> to vector<1x128xf32>
    %cst_74 = arith.constant dense<0.000000e+00> : vector<1x128xf32>
    %202 = tpu.matmul %201, %198, %cst_74 {dimension_numbers = #tpu.dot_dimension_numbers<[1], [0], [0], [1], [0, 0, 1, 1], [], []>} : vector<1x128xf32>, vector<128x128xf32>, vector<1x128xf32> -> vector<1x128xf32>
    %203 = vector.broadcast %202 : vector<1x128xf32> to vector<16x128xf32>
    %204 = arith.subf %199, %203 : vector<16x128xf32>
    %205 = arith.mulf %204, %204 : vector<16x128xf32>
    %cst_75 = arith.constant dense<0.000000e+00> : vector<128xf32>
    %206 = vector.multi_reduction <add>, %205, %cst_75 [0] : vector<16x128xf32> to vector<128xf32>
    %207 = vector.shape_cast %206 : vector<128xf32> to vector<1x128xf32>
    %cst_76 = arith.constant dense<0.000000e+00> : vector<1x128xf32>
    %208 = tpu.matmul %207, %198, %cst_76 {dimension_numbers = #tpu.dot_dimension_numbers<[1], [0], [0], [1], [0, 0, 1, 1], [], []>} : vector<1x128xf32>, vector<128x128xf32>, vector<1x128xf32> -> vector<1x128xf32>
    %cst_77 = arith.constant 9.99999974E-6 : f32
    %209 = vector.broadcast %cst_77 : f32 to vector<1x128xf32>
    %210 = arith.addf %208, %209 : vector<1x128xf32>
    %211 = math.rsqrt %210 : vector<1x128xf32>
    %212 = vector.broadcast %211 : vector<1x128xf32> to vector<16x128xf32>
    %213 = arith.mulf %204, %212 : vector<16x128xf32>
    %214 = vector.extract_strided_slice %195 {offsets = [16, 0], sizes = [16, 128], strides = [1, 1]} : vector<32x128xf32> to vector<16x128xf32>
    %cst_78 = arith.constant dense<0.000000e+00> : vector<128xf32>
    %215 = vector.multi_reduction <add>, %214, %cst_78 [0] : vector<16x128xf32> to vector<128xf32>
    %216 = vector.shape_cast %215 : vector<128xf32> to vector<1x128xf32>
    %cst_79 = arith.constant dense<0.000000e+00> : vector<1x128xf32>
    %217 = tpu.matmul %216, %198, %cst_79 {dimension_numbers = #tpu.dot_dimension_numbers<[1], [0], [0], [1], [0, 0, 1, 1], [], []>} : vector<1x128xf32>, vector<128x128xf32>, vector<1x128xf32> -> vector<1x128xf32>
    %218 = vector.broadcast %217 : vector<1x128xf32> to vector<16x128xf32>
    %219 = arith.subf %214, %218 : vector<16x128xf32>
    %220 = arith.mulf %219, %219 : vector<16x128xf32>
    %cst_80 = arith.constant dense<0.000000e+00> : vector<128xf32>
    %221 = vector.multi_reduction <add>, %220, %cst_80 [0] : vector<16x128xf32> to vector<128xf32>
    %222 = vector.shape_cast %221 : vector<128xf32> to vector<1x128xf32>
    %cst_81 = arith.constant dense<0.000000e+00> : vector<1x128xf32>
    %223 = tpu.matmul %222, %198, %cst_81 {dimension_numbers = #tpu.dot_dimension_numbers<[1], [0], [0], [1], [0, 0, 1, 1], [], []>} : vector<1x128xf32>, vector<128x128xf32>, vector<1x128xf32> -> vector<1x128xf32>
    %cst_82 = arith.constant 9.99999974E-6 : f32
    %224 = vector.broadcast %cst_82 : f32 to vector<1x128xf32>
    %225 = arith.addf %223, %224 : vector<1x128xf32>
    %226 = math.rsqrt %225 : vector<1x128xf32>
    %227 = vector.broadcast %226 : vector<1x128xf32> to vector<16x128xf32>
    %228 = arith.mulf %219, %227 : vector<16x128xf32>
    %229 = tpu.concatenate %213, %228 in 0 : vector<16x128xf32>, vector<16x128xf32> -> vector<32x128xf32>
    %230 = vector.broadcast %196 : vector<1x128xf32> to vector<32x128xf32>
    %231 = arith.mulf %229, %230 : vector<32x128xf32>
    %232 = vector.broadcast %197 : vector<1x128xf32> to vector<32x128xf32>
    %233 = arith.addf %231, %232 : vector<32x128xf32>
    %c0_83 = arith.constant 0 : index
    %c0_84 = arith.constant 0 : index
    %234 = vector.load %arg8[%c0_83, %c0_84] : memref<8x1xf32, #tpu.memory_space<vmem>>, vector<8x1xf32>
    %c0_85 = arith.constant 0 : index
    %c0_86 = arith.constant 0 : index
    %235 = vector.load %arg9[%c0_85, %c0_86] : memref<1x8xf32, #tpu.memory_space<vmem>>, vector<1x8xf32>
    %c0_87 = arith.constant 0 : index
    %c0_88 = arith.constant 0 : index
    %236 = vector.load %arg14[%c0_87, %c0_88] : memref<128x8xf32, #tpu.memory_space<vmem>>, vector<128x8xf32>
    %c0_89 = arith.constant 0 : index
    %c0_90 = arith.constant 0 : index
    %237 = vector.load %arg15[%c0_89, %c0_90] : memref<8x128xf32, #tpu.memory_space<vmem>>, vector<8x128xf32>
    %238 = vector.extract_strided_slice %233 {offsets = [0, 0], sizes = [16, 128], strides = [1, 1]} : vector<32x128xf32> to vector<16x128xf32>
    %cst_91 = arith.constant dense<0.000000e+00> : vector<128xf32>
    %239 = vector.multi_reduction <add>, %238, %cst_91 [0] : vector<16x128xf32> to vector<128xf32>
    %240 = vector.shape_cast %239 : vector<128xf32> to vector<1x128xf32>
    %cst_92 = arith.constant dense<0.000000e+00> : vector<1x8xf32>
    %241 = tpu.matmul %240, %236, %cst_92 {dimension_numbers = #tpu.dot_dimension_numbers<[1], [0], [0], [1], [0, 0, 1, 1], [], []>} : vector<1x128xf32>, vector<128x8xf32>, vector<1x8xf32> -> vector<1x8xf32>
    %cst_93 = arith.constant dense<0.000000e+00> : vector<1x1xf32>
    %242 = tpu.matmul %241, %234, %cst_93 {dimension_numbers = #tpu.dot_dimension_numbers<[1], [0], [0], [1], [0, 0, 1, 1], [], []>} : vector<1x8xf32>, vector<8x1xf32>, vector<1x1xf32> -> vector<1x1xf32>
    %cst_94 = arith.constant 0.000000e+00 : f32
    %243 = vector.broadcast %cst_94 : f32 to vector<1x1xf32>
    %244 = arith.maximumf %242, %243 : vector<1x1xf32>
    %cst_95 = arith.constant dense<0.000000e+00> : vector<1x8xf32>
    %245 = tpu.matmul %244, %235, %cst_95 {dimension_numbers = #tpu.dot_dimension_numbers<[1], [0], [0], [1], [0, 0, 1, 1], [], []>} : vector<1x1xf32>, vector<1x8xf32>, vector<1x8xf32> -> vector<1x8xf32>
    %246 = arith.negf %245 : vector<1x8xf32>
    %247 = math.exp %246 : vector<1x8xf32>
    %cst_96 = arith.constant 1.000000e+00 : f32
    %248 = vector.broadcast %cst_96 : f32 to vector<1x8xf32>
    %249 = arith.addf %248, %247 : vector<1x8xf32>
    %250 = arith.divf %248, %249 : vector<1x8xf32>
    %cst_97 = arith.constant dense<0.000000e+00> : vector<1x128xf32>
    %251 = tpu.matmul %250, %237, %cst_97 {dimension_numbers = #tpu.dot_dimension_numbers<[1], [0], [0], [1], [0, 0, 1, 1], [], []>} : vector<1x8xf32>, vector<8x128xf32>, vector<1x128xf32> -> vector<1x128xf32>
    %252 = vector.broadcast %251 : vector<1x128xf32> to vector<16x128xf32>
    %253 = arith.mulf %238, %252 : vector<16x128xf32>
    %254 = vector.extract_strided_slice %233 {offsets = [16, 0], sizes = [16, 128], strides = [1, 1]} : vector<32x128xf32> to vector<16x128xf32>
    %cst_98 = arith.constant dense<0.000000e+00> : vector<128xf32>
    %255 = vector.multi_reduction <add>, %254, %cst_98 [0] : vector<16x128xf32> to vector<128xf32>
    %256 = vector.shape_cast %255 : vector<128xf32> to vector<1x128xf32>
    %cst_99 = arith.constant dense<0.000000e+00> : vector<1x8xf32>
    %257 = tpu.matmul %256, %236, %cst_99 {dimension_numbers = #tpu.dot_dimension_numbers<[1], [0], [0], [1], [0, 0, 1, 1], [], []>} : vector<1x128xf32>, vector<128x8xf32>, vector<1x8xf32> -> vector<1x8xf32>
    %cst_100 = arith.constant dense<0.000000e+00> : vector<1x1xf32>
    %258 = tpu.matmul %257, %234, %cst_100 {dimension_numbers = #tpu.dot_dimension_numbers<[1], [0], [0], [1], [0, 0, 1, 1], [], []>} : vector<1x8xf32>, vector<8x1xf32>, vector<1x1xf32> -> vector<1x1xf32>
    %cst_101 = arith.constant 0.000000e+00 : f32
    %259 = vector.broadcast %cst_101 : f32 to vector<1x1xf32>
    %260 = arith.maximumf %258, %259 : vector<1x1xf32>
    %cst_102 = arith.constant dense<0.000000e+00> : vector<1x8xf32>
    %261 = tpu.matmul %260, %235, %cst_102 {dimension_numbers = #tpu.dot_dimension_numbers<[1], [0], [0], [1], [0, 0, 1, 1], [], []>} : vector<1x1xf32>, vector<1x8xf32>, vector<1x8xf32> -> vector<1x8xf32>
    %262 = arith.negf %261 : vector<1x8xf32>
    %263 = math.exp %262 : vector<1x8xf32>
    %cst_103 = arith.constant 1.000000e+00 : f32
    %264 = vector.broadcast %cst_103 : f32 to vector<1x8xf32>
    %265 = arith.addf %264, %263 : vector<1x8xf32>
    %266 = arith.divf %264, %265 : vector<1x8xf32>
    %cst_104 = arith.constant dense<0.000000e+00> : vector<1x128xf32>
    %267 = tpu.matmul %266, %237, %cst_104 {dimension_numbers = #tpu.dot_dimension_numbers<[1], [0], [0], [1], [0, 0, 1, 1], [], []>} : vector<1x8xf32>, vector<8x128xf32>, vector<1x128xf32> -> vector<1x128xf32>
    %268 = vector.broadcast %267 : vector<1x128xf32> to vector<16x128xf32>
    %269 = arith.mulf %254, %268 : vector<16x128xf32>
    %270 = tpu.concatenate %253, %269 in 0 : vector<16x128xf32>, vector<16x128xf32> -> vector<32x128xf32>
    %271 = arith.addf %270, %0 : vector<32x128xf32>
    %cst_105 = arith.constant 0.000000e+00 : f32
    %272 = vector.broadcast %cst_105 : f32 to vector<32x128xf32>
    %273 = arith.maximumf %271, %272 : vector<32x128xf32>
    %274 = arith.cmpf one, %273, %273 : vector<32x128xf32>
    %cst_106 = arith.constant 1.000000e+00 : f32
    %cst_107 = arith.constant 0.000000e+00 : f32
    %275 = vector.broadcast %cst_106 : f32 to vector<32x128xf32>
    %276 = vector.broadcast %cst_107 : f32 to vector<32x128xf32>
    %277 = arith.select %274, %275, %276 : vector<32x128xi1>, vector<32x128xf32>
    %cst_108 = arith.constant dense<0.000000e+00> : vector<128xf32>
    %278 = vector.multi_reduction <add>, %277, %cst_108 [0] : vector<32x128xf32> to vector<128xf32>
    %279 = vector.shape_cast %278 : vector<128xf32> to vector<1x128xf32>
    %cst_109 = arith.constant dense<0.000000e+00> : vector<1xf32>
    %280 = vector.multi_reduction <add>, %279, %cst_109 [1] : vector<1x128xf32> to vector<1xf32>
    %281 = vector.shape_cast %280 : vector<1xf32> to vector<1x1xf32>
    %cst_110 = arith.constant 0.000000e+00 : f32
    %282 = vector.broadcast %cst_110 : f32 to vector<1x1xf32>
    %283 = arith.cmpf ogt, %281, %282 : vector<1x1xf32>
    %284 = vector.shape_cast %283 : vector<1x1xi1> to vector<1x1xi1>
    %285 = vector.broadcast %284 : vector<1x1xi1> to vector<32x128xi1>
    %286 = arith.select %285, %0, %273 : vector<32x128xi1>, vector<32x128xf32>
    %c0_111 = arith.constant 0 : index
    %c0_112 = arith.constant 0 : index
    %287 = vector.load %arg7[%c0_111, %c0_112] : memref<4x128xf32, #tpu.memory_space<vmem>>, vector<4x128xf32>
    %cst_113 = arith.constant 0.000000e+00 : f32
    %288 = vector.broadcast %cst_113 : f32 to vector<1x128xf32>
    %289 = tpu.iota {dimensions = array<i32: 0>} : vector<32x1xi32>
    %c16_i32_114 = arith.constant 16 : i32
    %c0_i32_115 = arith.constant 0 : i32
    %290 = arith.cmpi eq, %c16_i32_114, %c0_i32_115 : i32
    %c1_i32_116 = arith.constant 1 : i32
    %291 = arith.select %290, %c1_i32_116, %c16_i32_114 : i32
    %292 = vector.broadcast %291 : i32 to vector<32x1xi32>
    %293 = arith.remsi %289, %292 : vector<32x1xi32>
    %c0_i32_117 = arith.constant 0 : i32
    %294 = vector.broadcast %c0_i32_117 : i32 to vector<32x1xi32>
    %295 = arith.cmpi ne, %293, %294 : vector<32x1xi32>
    %c0_i32_118 = arith.constant 0 : i32
    %296 = vector.broadcast %c0_i32_118 : i32 to vector<32x1xi32>
    %297 = arith.cmpi slt, %293, %296 : vector<32x1xi32>
    %c0_i32_119 = arith.constant 0 : i32
    %298 = arith.cmpi slt, %291, %c0_i32_119 : i32
    %299 = vector.broadcast %298 : i1 to vector<32x1xi1>
    %300 = vector.broadcast %299 : vector<32x1xi1> to vector<32x1xi1>
    %301 = arith.xori %297, %300 : vector<32x1xi1>
    %302 = arith.andi %301, %295 : vector<32x1xi1>
    %303 = vector.broadcast %291 : i32 to vector<32x1xi32>
    %304 = arith.addi %293, %303 : vector<32x1xi32>
    %305 = arith.select %302, %304, %293 : vector<32x1xi1>, vector<32x1xi32>
    %306 = vector.extract_strided_slice %0 {offsets = [0, 0], sizes = [31, 128], strides = [1, 1]} : vector<32x128xf32> to vector<31x128xf32>
    %307 = tpu.concatenate %288, %306 in 0 : vector<1x128xf32>, vector<31x128xf32> -> vector<32x128xf32>
    %c1_i32_120 = arith.constant 1 : i32
    %308 = vector.broadcast %c1_i32_120 : i32 to vector<32x1xi32>
    %309 = arith.cmpi sge, %305, %308 : vector<32x1xi32>
    %cst_121 = arith.constant 0.000000e+00 : f32
    %310 = vector.shape_cast %309 : vector<32x1xi1> to vector<32x1xi1>
    %311 = vector.broadcast %310 : vector<32x1xi1> to vector<32x128xi1>
    %312 = vector.broadcast %cst_121 : f32 to vector<32x128xf32>
    %313 = arith.select %311, %307, %312 : vector<32x128xi1>, vector<32x128xf32>
    %cst_122 = arith.constant 0.000000e+00 : f32
    %314 = vector.broadcast %cst_122 : f32 to vector<1x128xf32>
    %315 = tpu.iota {dimensions = array<i32: 0>} : vector<32x1xi32>
    %c16_i32_123 = arith.constant 16 : i32
    %c0_i32_124 = arith.constant 0 : i32
    %316 = arith.cmpi eq, %c16_i32_123, %c0_i32_124 : i32
    %c1_i32_125 = arith.constant 1 : i32
    %317 = arith.select %316, %c1_i32_125, %c16_i32_123 : i32
    %318 = vector.broadcast %317 : i32 to vector<32x1xi32>
    %319 = arith.remsi %315, %318 : vector<32x1xi32>
    %c0_i32_126 = arith.constant 0 : i32
    %320 = vector.broadcast %c0_i32_126 : i32 to vector<32x1xi32>
    %321 = arith.cmpi ne, %319, %320 : vector<32x1xi32>
    %c0_i32_127 = arith.constant 0 : i32
    %322 = vector.broadcast %c0_i32_127 : i32 to vector<32x1xi32>
    %323 = arith.cmpi slt, %319, %322 : vector<32x1xi32>
    %c0_i32_128 = arith.constant 0 : i32
    %324 = arith.cmpi slt, %317, %c0_i32_128 : i32
    %325 = vector.broadcast %324 : i1 to vector<32x1xi1>
    %326 = vector.broadcast %325 : vector<32x1xi1> to vector<32x1xi1>
    %327 = arith.xori %323, %326 : vector<32x1xi1>
    %328 = arith.andi %327, %321 : vector<32x1xi1>
    %329 = vector.broadcast %317 : i32 to vector<32x1xi32>
    %330 = arith.addi %319, %329 : vector<32x1xi32>
    %331 = arith.select %328, %330, %319 : vector<32x1xi1>, vector<32x1xi32>
    %332 = vector.extract_strided_slice %0 {offsets = [1, 0], sizes = [31, 128], strides = [1, 1]} : vector<32x128xf32> to vector<31x128xf32>
    %333 = tpu.concatenate %332, %314 in 0 : vector<31x128xf32>, vector<1x128xf32> -> vector<32x128xf32>
    %c15_i32_129 = arith.constant 15 : i32
    %334 = vector.broadcast %c15_i32_129 : i32 to vector<32x1xi32>
    %335 = arith.cmpi slt, %331, %334 : vector<32x1xi32>
    %cst_130 = arith.constant 0.000000e+00 : f32
    %336 = vector.shape_cast %335 : vector<32x1xi1> to vector<32x1xi1>
    %337 = vector.broadcast %336 : vector<32x1xi1> to vector<32x128xi1>
    %338 = vector.broadcast %cst_130 : f32 to vector<32x128xf32>
    %339 = arith.select %337, %333, %338 : vector<32x128xi1>, vector<32x128xf32>
    %340 = tpu.concatenate %313, %0, %339 in 1 : vector<32x128xf32>, vector<32x128xf32>, vector<32x128xf32> -> vector<32x384xf32>
    %c0_131 = arith.constant 0 : index
    %c0_132 = arith.constant 0 : index
    %341 = vector.load %arg5[%c0_131, %c0_132] : memref<384x128xf32, #tpu.memory_space<vmem>>, vector<384x128xf32>
    %cst_133 = arith.constant dense<0.000000e+00> : vector<32x128xf32>
    %342 = tpu.matmul %340, %341, %cst_133 {dimension_numbers = #tpu.dot_dimension_numbers<[1], [0], [0], [1], [0, 0, 1, 1], [], []>} : vector<32x384xf32>, vector<384x128xf32>, vector<32x128xf32> -> vector<32x128xf32>
    %343 = vector.extract_strided_slice %287 {offsets = [0, 0], sizes = [1, 128], strides = [1, 1]} : vector<4x128xf32> to vector<1x128xf32>
    %344 = vector.extract_strided_slice %287 {offsets = [1, 0], sizes = [1, 128], strides = [1, 1]} : vector<4x128xf32> to vector<1x128xf32>
    %cst_134 = arith.constant dense<0.000000e+00> : vector<128xf32>
    %345 = vector.multi_reduction <add>, %342, %cst_134 [0] : vector<32x128xf32> to vector<128xf32>
    %346 = vector.shape_cast %345 : vector<128xf32> to vector<1x128xf32>
    %c0_135 = arith.constant 0 : index
    %c0_136 = arith.constant 0 : index
    %347 = vector.load %arg12[%c0_135, %c0_136] : memref<128x128xf32, #tpu.memory_space<vmem>>, vector<128x128xf32>
    %cst_137 = arith.constant dense<0.000000e+00> : vector<1x128xf32>
    %348 = tpu.matmul %346, %347, %cst_137 {dimension_numbers = #tpu.dot_dimension_numbers<[1], [0], [0], [1], [0, 0, 1, 1], [], []>} : vector<1x128xf32>, vector<128x128xf32>, vector<1x128xf32> -> vector<1x128xf32>
    %349 = vector.broadcast %348 : vector<1x128xf32> to vector<32x128xf32>
    %350 = arith.subf %342, %349 : vector<32x128xf32>
    %351 = arith.mulf %350, %350 : vector<32x128xf32>
    %cst_138 = arith.constant dense<0.000000e+00> : vector<128xf32>
    %352 = vector.multi_reduction <add>, %351, %cst_138 [0] : vector<32x128xf32> to vector<128xf32>
    %353 = vector.shape_cast %352 : vector<128xf32> to vector<1x128xf32>
    %c0_139 = arith.constant 0 : index
    %c0_140 = arith.constant 0 : index
    %354 = vector.load %arg12[%c0_139, %c0_140] : memref<128x128xf32, #tpu.memory_space<vmem>>, vector<128x128xf32>
    %cst_141 = arith.constant dense<0.000000e+00> : vector<1x128xf32>
    %355 = tpu.matmul %353, %354, %cst_141 {dimension_numbers = #tpu.dot_dimension_numbers<[1], [0], [0], [1], [0, 0, 1, 1], [], []>} : vector<1x128xf32>, vector<128x128xf32>, vector<1x128xf32> -> vector<1x128xf32>
    %cst_142 = arith.constant 9.99999974E-6 : f32
    %356 = vector.broadcast %cst_142 : f32 to vector<1x128xf32>
    %357 = arith.addf %355, %356 : vector<1x128xf32>
    %358 = math.rsqrt %357 : vector<1x128xf32>
    %359 = vector.broadcast %358 : vector<1x128xf32> to vector<32x128xf32>
    %360 = arith.mulf %350, %359 : vector<32x128xf32>
    %361 = vector.broadcast %343 : vector<1x128xf32> to vector<32x128xf32>
    %362 = arith.mulf %360, %361 : vector<32x128xf32>
    %363 = vector.broadcast %344 : vector<1x128xf32> to vector<32x128xf32>
    %364 = arith.addf %362, %363 : vector<32x128xf32>
    %365 = vector.extract_strided_slice %287 {offsets = [2, 0], sizes = [1, 128], strides = [1, 1]} : vector<4x128xf32> to vector<1x128xf32>
    %366 = vector.extract_strided_slice %287 {offsets = [3, 0], sizes = [1, 128], strides = [1, 1]} : vector<4x128xf32> to vector<1x128xf32>
    %c0_143 = arith.constant 0 : index
    %c0_144 = arith.constant 0 : index
    %367 = vector.load %arg13[%c0_143, %c0_144] : memref<128x128xf32, #tpu.memory_space<vmem>>, vector<128x128xf32>
    %368 = vector.extract_strided_slice %364 {offsets = [0, 0], sizes = [16, 128], strides = [1, 1]} : vector<32x128xf32> to vector<16x128xf32>
    %cst_145 = arith.constant dense<0.000000e+00> : vector<128xf32>
    %369 = vector.multi_reduction <add>, %368, %cst_145 [0] : vector<16x128xf32> to vector<128xf32>
    %370 = vector.shape_cast %369 : vector<128xf32> to vector<1x128xf32>
    %cst_146 = arith.constant dense<0.000000e+00> : vector<1x128xf32>
    %371 = tpu.matmul %370, %367, %cst_146 {dimension_numbers = #tpu.dot_dimension_numbers<[1], [0], [0], [1], [0, 0, 1, 1], [], []>} : vector<1x128xf32>, vector<128x128xf32>, vector<1x128xf32> -> vector<1x128xf32>
    %372 = vector.broadcast %371 : vector<1x128xf32> to vector<16x128xf32>
    %373 = arith.subf %368, %372 : vector<16x128xf32>
    %374 = arith.mulf %373, %373 : vector<16x128xf32>
    %cst_147 = arith.constant dense<0.000000e+00> : vector<128xf32>
    %375 = vector.multi_reduction <add>, %374, %cst_147 [0] : vector<16x128xf32> to vector<128xf32>
    %376 = vector.shape_cast %375 : vector<128xf32> to vector<1x128xf32>
    %cst_148 = arith.constant dense<0.000000e+00> : vector<1x128xf32>
    %377 = tpu.matmul %376, %367, %cst_148 {dimension_numbers = #tpu.dot_dimension_numbers<[1], [0], [0], [1], [0, 0, 1, 1], [], []>} : vector<1x128xf32>, vector<128x128xf32>, vector<1x128xf32> -> vector<1x128xf32>
    %cst_149 = arith.constant 9.99999974E-6 : f32
    %378 = vector.broadcast %cst_149 : f32 to vector<1x128xf32>
    %379 = arith.addf %377, %378 : vector<1x128xf32>
    %380 = math.rsqrt %379 : vector<1x128xf32>
    %381 = vector.broadcast %380 : vector<1x128xf32> to vector<16x128xf32>
    %382 = arith.mulf %373, %381 : vector<16x128xf32>
    %383 = vector.extract_strided_slice %364 {offsets = [16, 0], sizes = [16, 128], strides = [1, 1]} : vector<32x128xf32> to vector<16x128xf32>
    %cst_150 = arith.constant dense<0.000000e+00> : vector<128xf32>
    %384 = vector.multi_reduction <add>, %383, %cst_150 [0] : vector<16x128xf32> to vector<128xf32>
    %385 = vector.shape_cast %384 : vector<128xf32> to vector<1x128xf32>
    %cst_151 = arith.constant dense<0.000000e+00> : vector<1x128xf32>
    %386 = tpu.matmul %385, %367, %cst_151 {dimension_numbers = #tpu.dot_dimension_numbers<[1], [0], [0], [1], [0, 0, 1, 1], [], []>} : vector<1x128xf32>, vector<128x128xf32>, vector<1x128xf32> -> vector<1x128xf32>
    %387 = vector.broadcast %386 : vector<1x128xf32> to vector<16x128xf32>
    %388 = arith.subf %383, %387 : vector<16x128xf32>
    %389 = arith.mulf %388, %388 : vector<16x128xf32>
    %cst_152 = arith.constant dense<0.000000e+00> : vector<128xf32>
    %390 = vector.multi_reduction <add>, %389, %cst_152 [0] : vector<16x128xf32> to vector<128xf32>
    %391 = vector.shape_cast %390 : vector<128xf32> to vector<1x128xf32>
    %cst_153 = arith.constant dense<0.000000e+00> : vector<1x128xf32>
    %392 = tpu.matmul %391, %367, %cst_153 {dimension_numbers = #tpu.dot_dimension_numbers<[1], [0], [0], [1], [0, 0, 1, 1], [], []>} : vector<1x128xf32>, vector<128x128xf32>, vector<1x128xf32> -> vector<1x128xf32>
    %cst_154 = arith.constant 9.99999974E-6 : f32
    %393 = vector.broadcast %cst_154 : f32 to vector<1x128xf32>
    %394 = arith.addf %392, %393 : vector<1x128xf32>
    %395 = math.rsqrt %394 : vector<1x128xf32>
    %396 = vector.broadcast %395 : vector<1x128xf32> to vector<16x128xf32>
    %397 = arith.mulf %388, %396 : vector<16x128xf32>
    %398 = tpu.concatenate %382, %397 in 0 : vector<16x128xf32>, vector<16x128xf32> -> vector<32x128xf32>
    %399 = vector.broadcast %365 : vector<1x128xf32> to vector<32x128xf32>
    %400 = arith.mulf %398, %399 : vector<32x128xf32>
    %401 = vector.broadcast %366 : vector<1x128xf32> to vector<32x128xf32>
    %402 = arith.addf %400, %401 : vector<32x128xf32>
    %c0_155 = arith.constant 0 : index
    %c0_156 = arith.constant 0 : index
    %403 = vector.load %arg10[%c0_155, %c0_156] : memref<8x1xf32, #tpu.memory_space<vmem>>, vector<8x1xf32>
    %c0_157 = arith.constant 0 : index
    %c0_158 = arith.constant 0 : index
    %404 = vector.load %arg11[%c0_157, %c0_158] : memref<1x8xf32, #tpu.memory_space<vmem>>, vector<1x8xf32>
    %c0_159 = arith.constant 0 : index
    %c0_160 = arith.constant 0 : index
    %405 = vector.load %arg14[%c0_159, %c0_160] : memref<128x8xf32, #tpu.memory_space<vmem>>, vector<128x8xf32>
    %c0_161 = arith.constant 0 : index
    %c0_162 = arith.constant 0 : index
    %406 = vector.load %arg15[%c0_161, %c0_162] : memref<8x128xf32, #tpu.memory_space<vmem>>, vector<8x128xf32>
    %407 = vector.extract_strided_slice %402 {offsets = [0, 0], sizes = [16, 128], strides = [1, 1]} : vector<32x128xf32> to vector<16x128xf32>
    %cst_163 = arith.constant dense<0.000000e+00> : vector<128xf32>
    %408 = vector.multi_reduction <add>, %407, %cst_163 [0] : vector<16x128xf32> to vector<128xf32>
    %409 = vector.shape_cast %408 : vector<128xf32> to vector<1x128xf32>
    %cst_164 = arith.constant dense<0.000000e+00> : vector<1x8xf32>
    %410 = tpu.matmul %409, %405, %cst_164 {dimension_numbers = #tpu.dot_dimension_numbers<[1], [0], [0], [1], [0, 0, 1, 1], [], []>} : vector<1x128xf32>, vector<128x8xf32>, vector<1x8xf32> -> vector<1x8xf32>
    %cst_165 = arith.constant dense<0.000000e+00> : vector<1x1xf32>
    %411 = tpu.matmul %410, %403, %cst_165 {dimension_numbers = #tpu.dot_dimension_numbers<[1], [0], [0], [1], [0, 0, 1, 1], [], []>} : vector<1x8xf32>, vector<8x1xf32>, vector<1x1xf32> -> vector<1x1xf32>
    %cst_166 = arith.constant 0.000000e+00 : f32
    %412 = vector.broadcast %cst_166 : f32 to vector<1x1xf32>
    %413 = arith.maximumf %411, %412 : vector<1x1xf32>
    %cst_167 = arith.constant dense<0.000000e+00> : vector<1x8xf32>
    %414 = tpu.matmul %413, %404, %cst_167 {dimension_numbers = #tpu.dot_dimension_numbers<[1], [0], [0], [1], [0, 0, 1, 1], [], []>} : vector<1x1xf32>, vector<1x8xf32>, vector<1x8xf32> -> vector<1x8xf32>
    %415 = arith.negf %414 : vector<1x8xf32>
    %416 = math.exp %415 : vector<1x8xf32>
    %cst_168 = arith.constant 1.000000e+00 : f32
    %417 = vector.broadcast %cst_168 : f32 to vector<1x8xf32>
    %418 = arith.addf %417, %416 : vector<1x8xf32>
    %419 = arith.divf %417, %418 : vector<1x8xf32>
    %cst_169 = arith.constant dense<0.000000e+00> : vector<1x128xf32>
    %420 = tpu.matmul %419, %406, %cst_169 {dimension_numbers = #tpu.dot_dimension_numbers<[1], [0], [0], [1], [0, 0, 1, 1], [], []>} : vector<1x8xf32>, vector<8x128xf32>, vector<1x128xf32> -> vector<1x128xf32>
    %421 = vector.broadcast %420 : vector<1x128xf32> to vector<16x128xf32>
    %422 = arith.mulf %407, %421 : vector<16x128xf32>
    %423 = vector.extract_strided_slice %402 {offsets = [16, 0], sizes = [16, 128], strides = [1, 1]} : vector<32x128xf32> to vector<16x128xf32>
    %cst_170 = arith.constant dense<0.000000e+00> : vector<128xf32>
    %424 = vector.multi_reduction <add>, %423, %cst_170 [0] : vector<16x128xf32> to vector<128xf32>
    %425 = vector.shape_cast %424 : vector<128xf32> to vector<1x128xf32>
    %cst_171 = arith.constant dense<0.000000e+00> : vector<1x8xf32>
    %426 = tpu.matmul %425, %405, %cst_171 {dimension_numbers = #tpu.dot_dimension_numbers<[1], [0], [0], [1], [0, 0, 1, 1], [], []>} : vector<1x128xf32>, vector<128x8xf32>, vector<1x8xf32> -> vector<1x8xf32>
    %cst_172 = arith.constant dense<0.000000e+00> : vector<1x1xf32>
    %427 = tpu.matmul %426, %403, %cst_172 {dimension_numbers = #tpu.dot_dimension_numbers<[1], [0], [0], [1], [0, 0, 1, 1], [], []>} : vector<1x8xf32>, vector<8x1xf32>, vector<1x1xf32> -> vector<1x1xf32>
    %cst_173 = arith.constant 0.000000e+00 : f32
    %428 = vector.broadcast %cst_173 : f32 to vector<1x1xf32>
    %429 = arith.maximumf %427, %428 : vector<1x1xf32>
    %cst_174 = arith.constant dense<0.000000e+00> : vector<1x8xf32>
    %430 = tpu.matmul %429, %404, %cst_174 {dimension_numbers = #tpu.dot_dimension_numbers<[1], [0], [0], [1], [0, 0, 1, 1], [], []>} : vector<1x1xf32>, vector<1x8xf32>, vector<1x8xf32> -> vector<1x8xf32>
    %431 = arith.negf %430 : vector<1x8xf32>
    %432 = math.exp %431 : vector<1x8xf32>
    %cst_175 = arith.constant 1.000000e+00 : f32
    %433 = vector.broadcast %cst_175 : f32 to vector<1x8xf32>
    %434 = arith.addf %433, %432 : vector<1x8xf32>
    %435 = arith.divf %433, %434 : vector<1x8xf32>
    %cst_176 = arith.constant dense<0.000000e+00> : vector<1x128xf32>
    %436 = tpu.matmul %435, %406, %cst_176 {dimension_numbers = #tpu.dot_dimension_numbers<[1], [0], [0], [1], [0, 0, 1, 1], [], []>} : vector<1x8xf32>, vector<8x128xf32>, vector<1x128xf32> -> vector<1x128xf32>
    %437 = vector.broadcast %436 : vector<1x128xf32> to vector<16x128xf32>
    %438 = arith.mulf %423, %437 : vector<16x128xf32>
    %439 = tpu.concatenate %422, %438 in 0 : vector<16x128xf32>, vector<16x128xf32> -> vector<32x128xf32>
    %440 = arith.addf %439, %0 : vector<32x128xf32>
    %cst_177 = arith.constant 0.000000e+00 : f32
    %441 = vector.broadcast %cst_177 : f32 to vector<32x128xf32>
    %442 = arith.maximumf %440, %441 : vector<32x128xf32>
    %c0_178 = arith.constant 0 : index
    %443 = memref.load %arg1[%c0_178] : memref<2xf32, #tpu.memory_space<smem>>
    %c1 = arith.constant 1 : index
    %444 = memref.load %arg1[%c1] : memref<2xf32, #tpu.memory_space<smem>>
    %445 = vector.broadcast %443 : f32 to vector<32x128xf32>
    %446 = arith.mulf %445, %286 : vector<32x128xf32>
    %447 = vector.broadcast %444 : f32 to vector<32x128xf32>
    %448 = arith.mulf %447, %442 : vector<32x128xf32>
    %449 = arith.addf %446, %448 : vector<32x128xf32>
    %c0_179 = arith.constant 0 : index
    %c0_180 = arith.constant 0 : index
    %450 = vector.load %arg16[%c0_179, %c0_180] : memref<32x128xf32, #tpu.memory_space<vmem>>, vector<32x128xf32>
    tpu.vector_store %arg16[%c0_179, %c0_180], %449 {strides = array<i32>} : memref<32x128xf32, #tpu.memory_space<vmem>>, vector<32x128xf32>,
    return
  }
  func.func @transform_0(%arg0: i32) -> i32 {
    %c0_i32 = arith.constant 0 : i32
    %c0_i32_0 = arith.constant 0 : i32
    return %c0_i32 : i32
  }
  func.func @transform_1(%arg0: i32) -> (i32, i32) {
    %c0_i32 = arith.constant 0 : i32
    %c0_i32_0 = arith.constant 0 : i32
    %c0_i32_1 = arith.constant 0 : i32
    return %c0_i32, %c0_i32_0 : i32, i32
  }
  func.func @transform_2(%arg0: i32) -> (i32, i32) {
    %c0_i32 = arith.constant 0 : i32
    %c0_i32_0 = arith.constant 0 : i32
    %c0_i32_1 = arith.constant 0 : i32
    return %c0_i32, %c0_i32_0 : i32, i32
  }
  func.func @transform_3(%arg0: i32) -> (i32, i32) {
    %c0_i32 = arith.constant 0 : i32
    %c0_i32_0 = arith.constant 0 : i32
    %c0_i32_1 = arith.constant 0 : i32
    return %c0_i32, %c0_i32_0 : i32, i32
  }
  func.func @transform_4(%arg0: i32) -> (i32, i32) {
    %c0_i32 = arith.constant 0 : i32
    %c0_i32_0 = arith.constant 0 : i32
    %c0_i32_1 = arith.constant 0 : i32
    return %c0_i32, %c0_i32_0 : i32, i32
  }
  func.func @transform_5(%arg0: i32) -> (i32, i32) {
    %c0_i32 = arith.constant 0 : i32
    %c0_i32_0 = arith.constant 0 : i32
    %c0_i32_1 = arith.constant 0 : i32
    return %c0_i32, %c0_i32_0 : i32, i32
  }
  func.func @transform_6(%arg0: i32) -> (i32, i32) {
    %c0_i32 = arith.constant 0 : i32
    %c0_i32_0 = arith.constant 0 : i32
    %c0_i32_1 = arith.constant 0 : i32
    return %c0_i32, %c0_i32_0 : i32, i32
  }
  func.func @transform_7(%arg0: i32) -> (i32, i32) {
    %c0_i32 = arith.constant 0 : i32
    %c0_i32_0 = arith.constant 0 : i32
    %c0_i32_1 = arith.constant 0 : i32
    return %c0_i32, %c0_i32_0 : i32, i32
  }
  func.func @transform_8(%arg0: i32) -> (i32, i32) {
    %c0_i32 = arith.constant 0 : i32
    %c0_i32_0 = arith.constant 0 : i32
    %c0_i32_1 = arith.constant 0 : i32
    return %c0_i32, %c0_i32_0 : i32, i32
  }
  func.func @transform_9(%arg0: i32) -> (i32, i32) {
    %c0_i32 = arith.constant 0 : i32
    %c0_i32_0 = arith.constant 0 : i32
    %c0_i32_1 = arith.constant 0 : i32
    return %c0_i32, %c0_i32_0 : i32, i32
  }
  func.func @transform_10(%arg0: i32) -> (i32, i32) {
    %c0_i32 = arith.constant 0 : i32
    %c0_i32_0 = arith.constant 0 : i32
    %c0_i32_1 = arith.constant 0 : i32
    return %c0_i32, %c0_i32_0 : i32, i32
  }
  func.func @transform_11(%arg0: i32) -> (i32, i32) {
    %c0_i32 = arith.constant 0 : i32
    %c0_i32_0 = arith.constant 0 : i32
    %c0_i32_1 = arith.constant 0 : i32
    return %c0_i32, %c0_i32_0 : i32, i32
  }
  func.func @transform_12(%arg0: i32) -> (i32, i32) {
    %c0_i32 = arith.constant 0 : i32
    %c0_i32_0 = arith.constant 0 : i32
    %c0_i32_1 = arith.constant 0 : i32
    return %c0_i32, %c0_i32_0 : i32, i32
  }
  func.func @transform_13(%arg0: i32) -> (i32, i32) {
    %c0_i32 = arith.constant 0 : i32
    %c0_i32_0 = arith.constant 0 : i32
    %c0_i32_1 = arith.constant 0 : i32
    return %c0_i32, %c0_i32_0 : i32, i32
  }
  func.func @transform_14(%arg0: i32) -> (i32, i32) {
    %c0_i32 = arith.constant 0 : i32
    %c0_i32_0 = arith.constant 0 : i32
    %c0_i32_1 = arith.constant 0 : i32
    return %c0_i32, %c0_i32_0 : i32, i32
  }
  func.func @transform_15(%arg0: i32) -> (i32, i32) {
    %c0_i32 = arith.constant 0 : i32
    %c0_i32_0 = arith.constant 0 : i32
    %c0_i32_1 = arith.constant 0 : i32
    return %c0_i32, %c0_i32_0 : i32, i32
  }
}

</mosaic_0001>

<bundles_post_ra>
// kernel: hybrid_block_forward.1
= control target key start
LH: loop header
LB: loop body
LE: loop exit
PB: predicated region body
PF: predicated region fallthrough
CT: control target
= control target key end

     0   :  { %20 = vsyncpa [#allocation4], 0  ;;  %s7826_s0 = inlined_call_operand.vmem [shape: f32[2], index: 0, kind: input, shape index: {}]   ;;  %s7827_s1 = inlined_call_operand.vmem [shape: f32[32,128], index: 1, kind: input, shape index: {}]   ;;  %s7828_s2 = inlined_call_operand.vmem [shape: f32[384,128], index: 2, kind: input, shape index: {}]   ;;  %s7829_s3 = inlined_call_operand.vmem [shape: f32[384,128], index: 3, kind: input, shape index: {}]   ;;  %s7830_s4 = inlined_call_operand.vmem [shape: f32[384,128], index: 4, kind: input, shape index: {}]   ;;  %s7831_s5 = inlined_call_operand.vmem [shape: f32[6,128], index: 5, kind: input, shape index: {}]   ;;  %s7832_s6 = inlined_call_operand.vmem [shape: f32[4,128], index: 6, kind: input, shape index: {}]   ;;  %s7833_s7 = inlined_call_operand.vmem [shape: f32[8,1], index: 7, kind: input, shape index: {}]   ;;  %s7834_s8 = inlined_call_operand.vmem [shape: f32[1,8], index: 8, kind: input, shape index: {}]   ;;  %s7835_s9 = inlined_call_operand.vmem [shape: f32[8,1], index: 9, kind: input, shape index: {}]   ;;  %s7836_s10 = inlined_call_operand.vmem [shape: f32[1,8], index: 10, kind: input, shape index: {}]   ;;  %s7837_s11 = inlined_call_operand.hbm [shape: f32[128,128], index: 11, kind: input, shape index: {}]   ;;  %s7838_s12 = inlined_call_operand.hbm [shape: f32[128,128], index: 12, kind: input, shape index: {}]   ;;  %s7839_s13 = inlined_call_operand.vmem [shape: f32[128,8], index: 13, kind: input, shape index: {}]   ;;  %s7840_s14 = inlined_call_operand.vmem [shape: f32[8,128], index: 14, kind: input, shape index: {}]   ;;  %s7841_s15 = inlined_call_operand.vmem [shape: f32[32,128], index: 15, kind: output, shape index: {}]  }
   0x1   :  { %21 = vsyncpa [#allocation3], 0  ;;  %s29_s20 = sshll.u32 %s7826_s0, 4  ;;  %s30_s20 = int_to_ptr.vmem [resolvable:$true] %s29_s20 }
   0x2   :  { %22 = vsyncpa [#allocation7], 0  ;;  %s6245_s21 = scalar_lea.vmem %s30_s20, 16  ;;  %p6250_p1 = scmp.lt.s32.totalorder %s30_s20, %s30_s20 }
   0x3   :  { %p6246_p0 = scmp.ne.s32.totalorder %s30_s20, %s6245_s21  ;;  %p6251_p2 = scmp.lt.s32.totalorder %s6245_s21, %s6245_s21 }
   0x5   :  { %p6252_p3 = por %p6251_p2, %p6250_p1 }
   0x7   :  { %p6253_p4 = pnand %p6252_p3, %p6246_p0 }
   0x9   :  { %6256 = shalt.err (!%p6253_p4)
}
   0xa   :  { %s6307_s22 = smov [#allocation2]   ;;  %s6308_s23 = smov [#allocation5]  }
   0xb   :  { %32 = dma.vmem_to_smem %s30_s20, 16, %s6307_s22, [#allocation4]  }
   0xc   :  { %s58_s24 = sshll.u32 %s6308_s23, 4  ;;  %s6257_s27 = scalar_lea.hbm %s7837_s11, 2048  ;;  %s59_s24 = int_to_ptr.vmem [resolvable:$true] %s58_s24 }
   0xd   :  { %p6258_p5 = scmp.ne.s32.totalorder %s7837_s11, %s6257_s27  ;;  %p6261_p6 = scmp.lt.u32.totalorder %s6257_s27, %s7837_s11 }
   0xf   :  { %p6263_p7 = pnand %p6261_p6, %p6258_p5 }
  0x11   :  { %6266 = shalt.err (!%p6263_p7)
}
  0x12   :  { %s6267_s16 = scalar_lea.vmem %s59_s24, 2048  ;;  %p6272_p9 = scmp.lt.s32.totalorder %s59_s24, %s59_s24 }
  0x13   :  { %p6268_p8 = scmp.ne.s32.totalorder %s59_s24, %s6267_s16  ;;  %p6273_p10 = scmp.lt.s32.totalorder %s6267_s16, %s6267_s16 }
  0x15   :  { %p6274_p11 = por %p6273_p10, %p6272_p9 }
  0x17   :  { %p6275_p12 = pnand %p6274_p11, %p6268_p8 }
  0x19   :  { %6278 = shalt.err (!%p6275_p12)
}
  0x1a   :  { %s6309_s17 = smov 128   ;;  %s6310_s18 = smov 8  }
  0x1b   :  { %64 = dma.hbm_to_vmem [thread:$0]  %s7837_s11, 2048, %s59_s24, [#allocation3], %s6309_s17, %s6309_s17, %s6310_s18  }
  0x1c   :  { %s6311_s21 = smov [#allocation6]   ;;  %s6279_s26 = scalar_lea.hbm %s7838_s12, 2048 }
  0x1d   :  { %s70_s22 = sshll.u32 %s6311_s21, 4  ;;  %p6280_p13 = scmp.ne.s32.totalorder %s7838_s12, %s6279_s26  ;;  %s71_s22 = int_to_ptr.vmem [resolvable:$true] %s70_s22 }
  0x1e   :  { %p6283_p0 = scmp.lt.u32.totalorder %s6279_s26, %s7838_s12 }
  0x20   :  { %p6285_p1 = pnand %p6283_p0, %p6280_p13 }
  0x22   :  { %6288 = shalt.err (!%p6285_p1)
}
  0x23   :  { %s6289_s30 = scalar_lea.vmem %s71_s22, 2048  ;;  %p6294_p3 = scmp.lt.s32.totalorder %s71_s22, %s71_s22 }
  0x24   :  { %p6290_p2 = scmp.ne.s32.totalorder %s71_s22, %s6289_s30  ;;  %p6295_p4 = scmp.lt.s32.totalorder %s6289_s30, %s6289_s30 }
  0x26   :  { %p6296_p5 = por %p6295_p4, %p6294_p3 }
  0x28   :  { %p6297_p6 = pnand %p6296_p5, %p6290_p2 }
  0x2a   :  { %6300 = shalt.err (!%p6297_p6)
}
  0x2b   :  { %76 = dma.hbm_to_vmem [thread:$0]  %s7838_s12, 2048, %s71_s22, [#allocation7], %s6309_s17, %s6309_s17, %s6310_s18  }
  0x2c   :  { %6301 = dma.done.wait [#allocation4], 16  }
  0x2d   :  { %6302 = vsyncadd [#allocation4], 4294967280 }
  0x2e   :  { %6303 = dma.done.wait [#allocation3], 2048  }
  0x2f   :  { %6304 = vsyncadd [#allocation3], 4294965248 }
  0x30   :  { %6305 = dma.done.wait [#allocation7], 2048  }
  0x31   :  { %6306 = vsyncadd [#allocation7], 4294965248 }
  0x32   :  { %90 = sfence }
  0x33   :  { %v227_v0 = vld [vmem:[%s7828_s2 + $0x80] sm:$0xff]  ;;  %v228_v1 = vld [vmem:[%s7828_s2 + $0x88] sm:$0xff]  ;;  %v229_v9 = vld [vmem:[%s7828_s2 + $0x90] sm:$0xff]  ;;  %vm182_vm0 = vcmask 1046528   ;;  %v96_v54 = vlaneseq  ;;  %vm153_vm1 = vcmask 1040384   ;;  %vm6313_vm6 = vmmov 0  }
  0x34   :  { %v211_v2 = vld [vmem:[%s7828_s2] sm:$0xff]  ;;  %v5478_v3 = vpack.c.bf16 %v228_v1, %v227_v0  ;;  %v212_v4 = vld [vmem:[%s7828_s2 + $0x8] sm:$0xff]  ;;  %v230_v10 = vld [vmem:[%s7828_s2 + $0x98] sm:$0xff]  ;;  %vm1905_vm7 = vcmask 64512   ;;  %vm1980_vm8 = vcmask 7168  }
  0x35   :  { %v243_v5 = vld [vmem:[%s7828_s2 + $0x100] sm:$0xff]  ;;  %v244_v6 = vld [vmem:[%s7828_s2 + $0x108] sm:$0xff]  ;;  %v5480_v7 = vpack.c.bf16 %v212_v4, %v211_v2  ;;  %v213_v11 = vld [vmem:[%s7828_s2 + $0x10] sm:$0xff]  ;;  %v5482_v12 = vpack.c.bf16 %v230_v10, %v229_v9 }
  0x36   :  { %v5510_v8 = vpack.c.bf16 %v244_v6, %v243_v5  ;;  %5479 = vmatprep.subr.bf16.mxu0 %v5478_v3  ;;  %v214_v13 = vld [vmem:[%s7828_s2 + $0x18] sm:$0xff]  ;;  %v245_v14 = vld [vmem:[%s7828_s2 + $0x110] sm:$0xff]  ;;  %v231_v18 = vld [vmem:[%s7828_s2 + $0xa0] sm:$0xff]  ;;  %v6565_v3 = vshrl.u32 %v96_v54, 7 }
  0x37   :  { %v246_v15 = vld [vmem:[%s7828_s2 + $0x118] sm:$0xff]  ;;  %5481 = vmatpush3.bf16.msra.mxu0 %v5480_v7  ;;  %v5484_v16 = vpack.c.bf16 %v214_v13, %v213_v11  ;;  %v232_v19 = vld [vmem:[%s7828_s2 + $0xa8] sm:$0xff]  ;;  %v215_v20 = vld [vmem:[%s7828_s2 + $0x20] sm:$0xff] }
  0x38   :  { %5511 = vmatprep.subr.bf16.mxu1 %v5510_v8  ;;  %v5514_v17 = vpack.c.bf16 %v246_v15, %v245_v14  ;;  %5483 = vmatprep.subr.bf16.mxu0 %v5482_v12  ;;  %v5486_v21 = vpack.c.bf16 %v232_v19, %v231_v18  ;;  %v216_v22 = vld [vmem:[%s7828_s2 + $0x28] sm:$0xff]  ;;  %v247_v23 = vld [vmem:[%s7828_s2 + $0x120] sm:$0xff]  ;;  %v233_v26 = vld [vmem:[%s7828_s2 + $0xb0] sm:$0xff]  ;;  %v98_v13 = vadd.s32 8, %v6565_v3  ;;  %v105_v18 = vand.u32 15, %v6565_v3 }
  0x39   :  { %5513 = vmatpush3.bf16.msra.mxu1 %v5510_v8  ;;  %v248_v24 = vld [vmem:[%s7828_s2 + $0x128] sm:$0xff]  ;;  %v234_v27 = vld [vmem:[%s7828_s2 + $0xb8] sm:$0xff]  ;;  %v249_v28 = vld [vmem:[%s7828_s2 + $0x130] sm:$0xff]  ;;  %v5488_v30 = vpack.c.bf16 %v216_v22, %v215_v20  ;;  %v100_v22 = vadd.s32 24, %v6565_v3 }
  0x3a   :  { %5515 = vmatprep.subr.bf16.mxu1 %v5514_v17  ;;  %v5518_v25 = vpack.c.bf16 %v248_v24, %v247_v23  ;;  %v250_v29 = vld [vmem:[%s7828_s2 + $0x138] sm:$0xff]  ;;  %v5490_v31 = vpack.c.bf16 %v234_v27, %v233_v26  ;;  %v217_v32 = vld [vmem:[%s7828_s2 + $0x30] sm:$0xff]  ;;  %v235_v35 = vld [vmem:[%s7828_s2 + $0xc0] sm:$0xff]  ;;  %v112_v20 = vand.u32 15, %v98_v13  ;;  %vm6598_vm2 = vcmp.ge.s32.totalorder %v105_v18, 1 }
  0x3b   :  { %5485 = vmatpush3.bf16.msra.mxu0 %v5484_v16  ;;  %v218_v33 = vld [vmem:[%s7828_s2 + $0x38] sm:$0xff]  ;;  %v5522_v34 = vpack.c.bf16 %v250_v29, %v249_v28  ;;  %v236_v36 = vld [vmem:[%s7828_s2 + $0xc8] sm:$0xff]  ;;  %v251_v37 = vld [vmem:[%s7828_s2 + $0x140] sm:$0xff]  ;;  %v99_v27 = vadd.s32 16, %v6565_v3 }
  0x3c   :  { %5487 = vmatprep.subr.bf16.mxu0 %v5486_v21  ;;  %v252_v38 = vld [vmem:[%s7828_s2 + $0x148] sm:$0xff]  ;;  %v5492_v39 = vpack.c.bf16 %v218_v33, %v217_v32  ;;  %v5494_v40 = vpack.c.bf16 %v236_v36, %v235_v35  ;;  %v219_v41 = vld [vmem:[%s7828_s2 + $0x40] sm:$0xff]  ;;  %v237_v44 = vld [vmem:[%s7828_s2 + $0xd0] sm:$0xff]  ;;  %vm6607_vm3 = vcmp.lt.s32.totalorder %v112_v20, 15 }
  0x3d   :  { %5517 = vmatpush3.bf16.msra.mxu1 %v5514_v17  ;;  %v220_v42 = vld [vmem:[%s7828_s2 + $0x48] sm:$0xff]  ;;  %v5526_v43 = vpack.c.bf16 %v252_v38, %v251_v37  ;;  %v238_v45 = vld [vmem:[%s7828_s2 + $0xd8] sm:$0xff]  ;;  %v253_v46 = vld [vmem:[%s7828_s2 + $0x150] sm:$0xff]  ;;  %v119_v33 = vand.u32 15, %v99_v27 }
  0x3e   :  { %5519 = vmatprep.subr.bf16.mxu1 %v5518_v25  ;;  %v254_v47 = vld [vmem:[%s7828_s2 + $0x158] sm:$0xff]  ;;  %v5496_v48 = vpack.c.bf16 %v220_v42, %v219_v41  ;;  %v6527_v49 = vld [vmem:[%s7827_s1] sm:$0xff]  ;;  %v6532_v50 = vld [vmem:[%s7827_s1 + $0x8] sm:$0xff]  ;;  %v5498_v51 = vpack.c.bf16 %v238_v45, %v237_v44  ;;  %v6312_v44 = vmov 0.0|0.0  }
  0x3f   :  { %5489 = vmatpush3.bf16.msra.mxu0 %v5488_v30  ;;  %v221_v52 = vld [vmem:[%s7828_s2 + $0x50] sm:$0xff]  ;;  %v222_v53 = vld [vmem:[%s7828_s2 + $0x58] sm:$0xff]  ;;  %v183_v55 = vrot.slane %v6527_v49, 1  ;;  %v184_v56 = vrot.slane %v6532_v50, 1  ;;  %v5530_v57 = vpack.c.bf16 %v254_v47, %v253_v46  ;;  %v239_v58 = vld [vmem:[%s7828_s2 + $0xe0] sm:$0xff]  ;;  %323 = vmatprep.mubr.f32.mxu0 %v6527_v49  ;;  %v154_v19 = vrot.slane %v6527_v49, 7 }
  0x40   :  { %5491 = vmatprep.subr.bf16.mxu0 %v5490_v31  ;;  %v240_v59 = vld [vmem:[%s7828_s2 + $0xe8] sm:$0xff]  ;;  %v255_v60 = vld [vmem:[%s7828_s2 + $0x160] sm:$0xff]  ;;  %v5500_v63 = vpack.c.bf16 %v222_v53, %v221_v52  ;;  %v241_v5 = vld [vmem:[%s7828_s2 + $0xf0] sm:$0xff]  ;;  %v155_v26 = vrot.slane %v6532_v50, 7  ;;  %v126_v30 = vand.u32 15, %v100_v22  ;;  %vm6636_vm5 = vcmp.ge.s32.totalorder %v119_v33, 1 }
  0x41   :  { %5521 = vmatpush3.bf16.msra.mxu1 %v5518_v25  ;;  %v256_v61 = vld [vmem:[%s7828_s2 + $0x168] sm:$0xff]  ;;  %v6556_v62 = vsel %vm182_vm0, %v183_v55, %v184_v56  ;;  %v5502_v0 = vpack.c.bf16 %v240_v59, %v239_v58  ;;  %v223_v1 = vld [vmem:[%s7828_s2 + $0x60] sm:$0xff]  ;;  %v242_v6 = vld [vmem:[%s7828_s2 + $0xf8] sm:$0xff]  ;;  %v6596_v24 = vsel %vm153_vm1, 0.0, %v154_v19 }
  0x42   :  { %5523 = vmatprep.subr.bf16.mxu1 %v5522_v34  ;;  %4566 = vmatprep.mubr.f32.mxu1 %v6556_v62  ;;  %v224_v2 = vld [vmem:[%s7828_s2 + $0x68] sm:$0xff]  ;;  %v5534_v4 = vpack.c.bf16 %v256_v61, %v255_v60  ;;  %v257_v7 = vld [vmem:[%s7828_s2 + $0x170] sm:$0xff]  ;;  %v258_v8 = vld [vmem:[%s7828_s2 + $0x178] sm:$0xff]  ;;  %v5506_v10 = vpack.c.bf16 %v242_v6, %v241_v5  ;;  %v6622_v32 = vsel %vm153_vm1, %v154_v19, %v155_v26  ;;  %vm6628_vm4 = vcmp.lt.s32.totalorder %v126_v30, 15 }
  0x43   :  { %5493 = vmatpush3.bf16.msra.mxu0 %v5492_v39  ;;  %v5504_v9 = vpack.c.bf16 %v224_v2, %v223_v1  ;;  %v225_v11 = vld [vmem:[%s7828_s2 + $0x70] sm:$0xff]  ;;  %v226_v12 = vld [vmem:[%s7828_s2 + $0x78] sm:$0xff]  ;;  %v5538_v14 = vpack.c.bf16 %v258_v8, %v257_v7  ;;  %v438_v41 = vld [vmem:[#allocation5] sm:$0xff] }
  0x44   :  { %5495 = vmatprep.subr.bf16.mxu0 %v5494_v40  ;;  %v93_v15 = vld [vmem:[%s7827_s1 + $0x10] sm:$0xff]  ;;  %v94_v16 = vld [vmem:[%s7827_s1 + $0x18] sm:$0xff]  ;;  %v5508_v17 = vpack.c.bf16 %v226_v12, %v225_v11  ;;  %v439_v42 = vld [vmem:[#allocation5 + $0x8] sm:$0xff] }
  0x45   :  { %5525 = vmatpush3.bf16.msra.mxu1 %v5522_v34  ;;  %v186_v21 = vrot.slane %v93_v15, 1  ;;  %v188_v23 = vrot.slane %v94_v16, 1  ;;  %v157_v34 = vrot.slane %v93_v15, 7  ;;  %v159_v39 = vrot.slane %v94_v16, 7  ;;  %v440_v45 = vld [vmem:[#allocation5 + $0x10] sm:$0xff]  ;;  %v441_v46 = vld [vmem:[#allocation5 + $0x18] sm:$0xff] }
  0x46   :  { %5527 = vmatprep.subr.bf16.mxu1 %v5526_v43  ;;  %v6658_v47 = vpack.c.bf16 %v441_v46, %v440_v45  ;;  %v443_v49 = vld [vmem:[#allocation5 + $0x28] sm:$0xff]  ;;  %v445_v52 = vld [vmem:[#allocation5 + $0x38] sm:$0xff]  ;;  %v446_v54 = vld [vmem:[#allocation5 + $0x40] sm:$0xff] }
  0x47   :  { %5497 = vmatpush3.bf16.msra.mxu0 %v5496_v48  ;;  %v6605_v28 = vsel %vm182_vm0, %v184_v56, %v186_v21  ;;  %v6612_v31 = vsel %vm182_vm0, %v186_v21, %v188_v23  ;;  %v6626_v35 = vsel %vm182_vm0, %v188_v23, 0.0  ;;  %v6634_v37 = vsel %vm153_vm1, %v155_v26, %v157_v34  ;;  %v442_v48 = vld [vmem:[#allocation5 + $0x20] sm:$0xff]  ;;  %v447_v55 = vld [vmem:[#allocation5 + $0x48] sm:$0xff]  ;;  %v449_v58 = vld [vmem:[#allocation5 + $0x58] sm:$0xff] }
  0x48   :  { %5499 = vmatprep.subr.bf16.mxu0 %v5498_v51  ;;  %v6647_v40 = vsel %vm153_vm1, %v157_v34, %v159_v39  ;;  %v444_v51 = vld [vmem:[#allocation5 + $0x30] sm:$0xff]  ;;  %v6676_v56 = vpack.c.bf16 %v447_v55, %v446_v54  ;;  %v450_v60 = vld [vmem:[#allocation5 + $0x60] sm:$0xff]  ;;  %v451_v61 = vld [vmem:[#allocation5 + $0x68] sm:$0xff] }
  0x49   :  { %5529 = vmatpush3.bf16.msra.mxu1 %v5526_v43  ;;  %v6650_v43 = vpack.c.bf16 %v439_v42, %v438_v41  ;;  %v6670_v53 = vpack.c.bf16 %v445_v52, %v444_v51  ;;  %v453_v1 = vld [vmem:[#allocation5 + $0x78] sm:$0xff] }
  0x4a   :  { %5531 = vmatprep.subr.bf16.mxu1 %v5530_v57 }
  0x4b   :  { %5501 = vmatpush3.bf16.msra.mxu0 %v5500_v63  ;;  %v6688_v63 = vpack.c.bf16 %v451_v61, %v450_v60 }
  0x4c   :  { %5503 = vmatprep.subr.bf16.mxu0 %v5502_v0  ;;  %v452_v0 = vld [vmem:[#allocation5 + $0x70] sm:$0xff] }
  0x4d   :  { %5533 = vmatpush3.bf16.msra.mxu1 %v5530_v57  ;;  %v448_v57 = vld [vmem:[#allocation5 + $0x50] sm:$0xff]  ;;  %v6694_v2 = vpack.c.bf16 %v453_v1, %v452_v0 }
  0x4e   :  { %5535 = vmatprep.subr.bf16.mxu1 %v5534_v4  ;;  %v6682_v59 = vpack.c.bf16 %v449_v58, %v448_v57 }
  0x4f   :  { %5505 = vmatpush3.bf16.msra.mxu0 %v5504_v9 }
  0x50   :  { %5507 = vmatprep.subr.bf16.mxu0 %v5506_v10 }
  0x51   :  { %5537 = vmatpush3.bf16.msra.mxu1 %v5534_v4  ;;  %v6314_v4 = vmov 0.0  }
  0x52   :  { %5539 = vmatprep.subr.bf16.mxu1 %v5538_v14 }
  0x53   :  { %5509 = vmatpush3.bf16.msra.mxu0 %v5508_v17 }
  0x54   :  { %5542 = vmatprep.subr.bf16.mxu0 %v6312_v44 }
  0x55   :  { %5541 = vmatpush3.bf16.msra.mxu1 %v5538_v14 }
  0x56   :  { %3911 = vmatmul.mubr.msk.f32.vlgmr.msra.gmra.mrb[0].mxu0 %vm6598_vm2, %v6596_v24  ;;  %5566 = vmatprep.subr.bf16.mxu1 %v6312_v44 }
  0x57   :  { %328 = vmatprep.mubr.f32.mxu0 %v6532_v50  ;;  %5544 = vmatpush3.bf16.msra.mxu0 %v6650_v43  ;;  %v6664_v50 = vpack.c.bf16 %v443_v49, %v442_v48  ;;  %v6707_v48 = vsub.s32 0, %v6565_v3 }
  0x58   :  { %4567 = vmatmul.mubr.msk.f32.vlgmr.msra.gmra.mrb[0].mxu1 %vm6607_vm3, %v6605_v28  ;;  %5545 = vmatprep.subr.bf16.mxu0 %v6312_v44 }
  0x59   :  { %4569 = vmatprep.mubr.f32.mxu1 %v6612_v31  ;;  %5568 = vmatpush3.bf16.msra.mxu1 %v6650_v43 }
  0x5a   :  { %329 = vmatmul.mubr.f32.gmra.mrb[2].mxu0 %v6622_v32  ;;  %5569 = vmatprep.subr.bf16.mxu1 %v6312_v44 }
  0x5b   :  { %333 = vmatprep.mubr.f32.mxu0 %v93_v15  ;;  %5547 = vmatpush3.bf16.msra.mxu0 %v6658_v47 }
  0x5c   :  { %4570 = vmatmul.mubr.msk.f32.gmra.mrb[2].mxu1 %vm6628_vm4, %v6626_v35  ;;  %5548 = vmatprep.subr.bf16.mxu0 %v6312_v44 }
  0x5d   :  { %5571 = vmatpush3.bf16.msra.mxu1 %v6658_v47  ;;  %4639 = vmatprep.mubr.msk.f32.mxu1 %vm6313_vm6, %v6314_v4 }
  0x5e   :  { %3912 = vmatmul.mubr.msk.f32.gmra.mrb[4].mxu0 %vm6636_vm5, %v6634_v37  ;;  %5572 = vmatprep.subr.bf16.mxu1 %v6312_v44 }
  0x5f   :  { %338 = vmatprep.mubr.f32.mxu0 %v94_v16  ;;  %5550 = vmatpush3.bf16.msra.mxu0 %v6664_v50 }
  0x60   :  { %5551 = vmatprep.subr.bf16.mxu0 %v6312_v44 }
  0x61   :  { %5574 = vmatpush3.bf16.msra.mxu1 %v6664_v50 }
  0x62   :  { %339 = vmatmul.mubr.f32.gmra.mrb[6].mxu0 %v6647_v40  ;;  %5575 = vmatprep.subr.bf16.mxu1 %v6312_v44 }
  0x63   :  { %5553 = vmatpush3.bf16.msra.mxu0 %v6670_v53  ;;  %4604 = vmatprep.mubr.msk.f32.mxu0 %vm6313_vm6, %v6314_v4 }
  0x64   :  { %5554 = vmatprep.subr.bf16.mxu0 %v6312_v44 }
  0x65   :  { %5577 = vmatpush3.bf16.msra.mxu1 %v6670_v53 }
  0x66   :  { %5578 = vmatprep.subr.bf16.mxu1 %v6312_v44 }
  0x67   :  { %5556 = vmatpush3.bf16.msra.mxu0 %v6676_v56 }
  0x68   :  { %5557 = vmatprep.subr.bf16.mxu0 %v6312_v44 }
  0x69   :  { %5580 = vmatpush3.bf16.msra.mxu1 %v6676_v56 }
  0x6a   :  { %5581 = vmatprep.subr.bf16.mxu1 %v6312_v44 }
  0x6b   :  { %5559 = vmatpush3.bf16.msra.mxu0 %v6682_v59 }
  0x6c   :  { %5560 = vmatprep.subr.bf16.mxu0 %v6312_v44 }
  0x6d   :  { %5583 = vmatpush3.bf16.msra.mxu1 %v6682_v59 }
  0x6e   :  { %5584 = vmatprep.subr.bf16.mxu1 %v6312_v44 }
  0x6f   :  { %5562 = vmatpush3.bf16.msra.mxu0 %v6688_v63 }
  0x70   :  { %5563 = vmatprep.subr.bf16.mxu0 %v6312_v44 }
  0x71   :  { %5586 = vmatpush3.bf16.msra.mxu1 %v6688_v63 }
  0x72   :  { %5587 = vmatprep.subr.bf16.mxu1 %v6312_v44 }
  0x73   :  { %5565 = vmatpush3.bf16.msra.mxu0 %v6694_v2 }
  0x74   :  { %5590 = vmatprep.subr.bf16.mxu0 %v6312_v44 }
  0x75   :  { %5589 = vmatpush3.bf16.msra.mxu1 %v6694_v2 }
  0x76   :  { %5614 = vmatprep.subr.bf16.mxu1 %v6312_v44 }
 0x129   :  { %v3976_v5 = vpop.f32.mrb[0].mxu0 }
 0x12a   :  { %v3977_v6 = vpop.f32.mrb[1].mxu0 }
 0x12b   :  { %v4568_v7 = vpop.f32.mrb[0].mxu1  ;;  %v3978_v8 = vadd.f32 %v3977_v6, %v3976_v5 }
 0x12c   :  { %v410_v9 = vpop.f32.mrb[1].mxu1 }
 0x12d   :  { %v411_v10 = vadd.f32 %v3978_v8, %v410_v9  ;;  %v3979_v11 = vpop.f32.mrb[2].mxu0 }
 0x12e   :  { %v3980_v12 = vpop.f32.mrb[3].mxu0 }
 0x12f   :  { %v4571_v13 = vpop.f32.mrb[2].mxu1  ;;  %v3981_v14 = vadd.f32 %v3980_v12, %v3979_v11 }
 0x130   :  { %v420_v15 = vpop.f32.mrb[3].mxu1 }
 0x131   :  { %v416_v16 = vadd.f32 %v4568_v7, %v3981_v14  ;;  %v3982_v17 = vpop.f32.mrb[4].mxu0  ;;  %v640_v14 = vld [vmem:[#allocation6] sm:$0xff] }
 0x132   :  { %v3983_v18 = vpop.f32.mrb[5].mxu0 }
 0x133   :  { %v3984_v19 = vadd.f32 %v3983_v18, %v3982_v17  ;;  %v429_v23 = vadd.f32 %v416_v16, %v411_v10  ;;  %v642_v17 = vld [vmem:[#allocation6 + $0x10] sm:$0xff]  ;;  %v643_v18 = vld [vmem:[#allocation6 + $0x18] sm:$0xff] }
 0x135   :  { %v421_v20 = vadd.f32 %v3984_v19, %v420_v15  ;;  %v3985_v21 = vpop.f32.mrb[6].mxu0  ;;  %v641_v15 = vld [vmem:[#allocation6 + $0x8] sm:$0xff]  ;;  %v6734_v19 = vpack.c.bf16 %v643_v18, %v642_v17 }
 0x136   :  { %v3986_v22 = vpop.f32.mrb[7].mxu0 }
 0x137   :  { %v3987_v26 = vadd.f32 %v3986_v22, %v3985_v21  ;;  %v430_v27 = vadd.f32 %v429_v23, %v421_v20  ;;  %v645_v21 = vld [vmem:[#allocation6 + $0x28] sm:$0xff]  ;;  %v646_v23 = vld [vmem:[#allocation6 + $0x30] sm:$0xff] }
 0x139   :  { %v426_v30 = vadd.f32 %v4571_v13, %v3987_v26  ;;  %v647_v26 = vld [vmem:[#allocation6 + $0x38] sm:$0xff] }
 0x13b   :  { %v431_v33 = vadd.f32 %v430_v27, %v426_v30  ;;  %v6746_v27 = vpack.c.bf16 %v647_v26, %v646_v23 }
 0x13d   :  { %v432_v34 = vrot.slane %v431_v33, 4 }
 0x13f   :  { %v433_v39 = vadd.f32 %v432_v34, %v431_v33  ;;  %v649_v33 = vld [vmem:[#allocation6 + $0x48] sm:$0xff] }
 0x141   :  { %v434_v41 = vrot.slane %v433_v39, 2 }
 0x143   :  { %v435_v42 = vadd.f32 %v434_v41, %v433_v39  ;;  %v650_v39 = vld [vmem:[#allocation6 + $0x50] sm:$0xff]  ;;  %v651_v41 = vld [vmem:[#allocation6 + $0x58] sm:$0xff] }
 0x145   :  { %v436_v45 = vrot.slane %v435_v42, 1 }
 0x147   :  { %v437_v46 = vadd.f32 %v436_v45, %v435_v42  ;;  %v6755_v42 = vpack.c.bf16 %v651_v41, %v650_v39  ;;  %v652_v45 = vld [vmem:[#allocation6 + $0x60] sm:$0xff] }
 0x149   :  { %4605 = vmatmul.mubr.f32.vlgmr.msra.gmra.mrb[8].mxu0 %v437_v46  ;;  %v653_v46 = vld [vmem:[#allocation6 + $0x68] sm:$0xff] }
 0x14a   :  { %4674 = vmatprep.mubr.msk.f32.mxu0 %vm6313_vm6, %v6314_v4 }
 0x21c   :  { %v520_v49 = vpop.f32.mrb[8].mxu0 }
 0x21d   :  { %v527_v51 = vrot.slane %v520_v49, %v6707_v48  ;;  %v4606_v52 = vpop.f32.mrb[9].mxu0  ;;  %v6761_v49 = vpack.c.bf16 %v653_v46, %v652_v45 }
 0x21e   :  { %v655_v52 = vld [vmem:[#allocation6 + $0x78] sm:$0xff] }
 0x21f   :  { %v6710_v54 = vsub.f32 %v411_v10, %v527_v51  ;;  %v6712_v55 = vsub.f32 %v416_v16, %v527_v51  ;;  %v6714_v57 = vsub.f32 %v421_v20, %v527_v51  ;;  %v6716_v58 = vsub.f32 %v426_v30, %v527_v51  ;;  %v644_v20 = vld [vmem:[#allocation6 + $0x20] sm:$0xff]  ;;  %v654_v51 = vld [vmem:[#allocation6 + $0x70] sm:$0xff] }
 0x220   :  { %v6728_v16 = vpack.c.bf16 %v641_v15, %v640_v14  ;;  %v6740_v22 = vpack.c.bf16 %v645_v21, %v644_v20  ;;  %v648_v30 = vld [vmem:[#allocation6 + $0x40] sm:$0xff] }
 0x221   :  { %v532_v60 = vmul.f32 %v6710_v54, %v6710_v54  ;;  %v533_v61 = vmul.f32 %v6712_v55, %v6712_v55  ;;  %v534_v0 = vmul.f32 %v6714_v57, %v6714_v57  ;;  %v535_v5 = vmul.f32 %v6716_v58, %v6716_v58 }
 0x222   :  { %5592 = vmatpush3.bf16.msra.mxu0 %v6728_v16  ;;  %v6749_v34 = vpack.c.bf16 %v649_v33, %v648_v30 }
 0x223   :  { %v536_v1 = vadd.f32 %v533_v61, %v532_v60  ;;  %5593 = vmatprep.subr.bf16.mxu0 %v6312_v44  ;;  %v6767_v60 = vpack.c.bf16 %v655_v52, %v654_v51 }
 0x225   :  { %v537_v6 = vadd.f32 %v536_v1, %v534_v0 }
 0x226   :  { %5595 = vmatpush3.bf16.msra.mxu0 %v6734_v19 }
 0x227   :  { %v538_v7 = vadd.f32 %v537_v6, %v535_v5  ;;  %5596 = vmatprep.subr.bf16.mxu0 %v6312_v44  ;;  %v6779_v5 = vld [vmem:[%s7831_s5] sm:$0x3f]  ;;  %v634_v6 = vsub.s32 1, %v6565_v3 }
 0x229   :  { %v539_v8 = vrot.slane %v538_v7, 4 }
 0x22a   :  { %5598 = vmatpush3.bf16.msra.mxu0 %v6740_v22 }
 0x22b   :  { %v540_v9 = vadd.f32 %v539_v8, %v538_v7  ;;  %5599 = vmatprep.subr.bf16.mxu0 %v6312_v44 }
 0x22d   :  { %v541_v10 = vrot.slane %v540_v9, 2 }
 0x22e   :  { %5601 = vmatpush3.bf16.msra.mxu0 %v6746_v27 }
 0x22f   :  { %v542_v11 = vadd.f32 %v541_v10, %v540_v9  ;;  %5602 = vmatprep.subr.bf16.mxu0 %v6312_v44  ;;  %v627_v9 = vrot.slane %v6779_v5, %v6707_v48 }
 0x231   :  { %v543_v12 = vrot.slane %v542_v11, 1 }
 0x232   :  { %5604 = vmatpush3.bf16.msra.mxu0 %v6749_v34 }
 0x233   :  { %v544_v13 = vadd.f32 %v543_v12, %v542_v11  ;;  %5605 = vmatprep.subr.bf16.mxu0 %v6312_v44  ;;  %v635_v12 = vrot.slane %v6779_v5, %v634_v6 }
 0x235   :  { %4640 = vmatmul.mubr.f32.vlgmr.msra.gmra.mrb[4].mxu1 %v544_v13 }
 0x236   :  { %4709 = vmatprep.mubr.msk.f32.mxu1 %vm6313_vm6, %v6314_v4  ;;  %5616 = vmatpush3.bf16.msra.mxu1 %v6728_v16 }
 0x237   :  { %5617 = vmatprep.subr.bf16.mxu1 %v6312_v44  ;;  %5607 = vmatpush3.bf16.msra.mxu0 %v6755_v42 }
 0x238   :  { %5608 = vmatprep.subr.bf16.mxu0 %v6312_v44 }
 0x23a   :  { %5619 = vmatpush3.bf16.msra.mxu1 %v6734_v19 }
 0x23b   :  { %5620 = vmatprep.subr.bf16.mxu1 %v6312_v44  ;;  %5610 = vmatpush3.bf16.msra.mxu0 %v6761_v49 }
 0x23c   :  { %5611 = vmatprep.subr.bf16.mxu0 %v6312_v44 }
 0x23e   :  { %5622 = vmatpush3.bf16.msra.mxu1 %v6740_v22 }
 0x23f   :  { %5623 = vmatprep.subr.bf16.mxu1 %v6312_v44  ;;  %5613 = vmatpush3.bf16.msra.mxu0 %v6767_v60 }
 0x240   :  { %5638 = vmatprep.subr.bf16.mxu0 %v6312_v44 }
 0x242   :  { %5625 = vmatpush3.bf16.msra.mxu1 %v6746_v27 }
 0x243   :  { %5626 = vmatprep.subr.bf16.mxu1 %v6312_v44 }
 0x246   :  { %5628 = vmatpush3.bf16.msra.mxu1 %v6749_v34 }
 0x247   :  { %5629 = vmatprep.subr.bf16.mxu1 %v6312_v44 }
 0x24a   :  { %5631 = vmatpush3.bf16.msra.mxu1 %v6755_v42 }
 0x24b   :  { %5632 = vmatprep.subr.bf16.mxu1 %v6312_v44 }
 0x24e   :  { %5634 = vmatpush3.bf16.msra.mxu1 %v6761_v49 }
 0x24f   :  { %5635 = vmatprep.subr.bf16.mxu1 %v6312_v44 }
 0x252   :  { %5637 = vmatpush3.bf16.msra.mxu1 %v6767_v60 }
 0x253   :  { %5662 = vmatprep.subr.bf16.mxu1 %v6312_v44 }
 0x308   :  { %v611_v61 = vpop.f32.mrb[4].mxu1 }
 0x309   :  { %v612_v0 = vadd.f32 1e-05, %v611_v61  ;;  %v4641_v1 = vpop.f32.mrb[5].mxu1 }
 0x30b   :  { %6206 = vrsqrt.f32 %v612_v0 }
 0x315   :  { %v6207_v7 = vpop.eup %6206 }
 0x316   :  { %v619_v8 = vrot.slane %v6207_v7, %v6707_v48  ;;  %v1066_v7 = vld [vmem:[%s7829_s3 + $0x80] sm:$0xff] }
 0x318   :  { %v620_v10 = vmul.f32 %v619_v8, %v6710_v54  ;;  %v621_v11 = vmul.f32 %v619_v8, %v6712_v55  ;;  %v622_v30 = vmul.f32 %v619_v8, %v6714_v57  ;;  %v623_v33 = vmul.f32 %v619_v8, %v6716_v58  ;;  %v1067_v8 = vld [vmem:[%s7829_s3 + $0x88] sm:$0xff] }
 0x31a   :  { %v628_v13 = vmul.f32 %v627_v9, %v620_v10  ;;  %v629_v14 = vmul.f32 %v627_v9, %v621_v11  ;;  %v630_v55 = vmul.f32 %v627_v9, %v622_v30  ;;  %v631_v41 = vmul.f32 %v627_v9, %v623_v33  ;;  %v1050_v9 = vld [vmem:[%s7829_s3] sm:$0xff]  ;;  %v1051_v11 = vld [vmem:[%s7829_s3 + $0x8] sm:$0xff] }
 0x31b   :  { %v5686_v10 = vpack.c.bf16 %v1067_v8, %v1066_v7 }
 0x31c   :  { %v636_v15 = vadd.f32 %v635_v12, %v628_v13  ;;  %v637_v17 = vadd.f32 %v635_v12, %v629_v14  ;;  %v638_v45 = vadd.f32 %v635_v12, %v630_v55  ;;  %v639_v46 = vadd.f32 %v635_v12, %v631_v41  ;;  %v1068_v12 = vld [vmem:[%s7829_s3 + $0x90] sm:$0xff]  ;;  %v1069_v13 = vld [vmem:[%s7829_s3 + $0x98] sm:$0xff] }
 0x31d   :  { %v5688_v14 = vpack.c.bf16 %v1051_v11, %v1050_v9 }
 0x31e   :  { %v656_v18 = vadd.f32 %v637_v17, %v636_v15  ;;  %v825_v57 = vadd.f32 %v639_v46, %v638_v45 }
 0x320   :  { %v657_v20 = vrot.slane %v656_v18, 4  ;;  %v826_v58 = vrot.slane %v825_v57, 4 }
 0x322   :  { %v658_v21 = vadd.f32 %v657_v20, %v656_v18  ;;  %v827_v51 = vadd.f32 %v826_v58, %v825_v57  ;;  %v5690_v18 = vpack.c.bf16 %v1069_v13, %v1068_v12 }
 0x324   :  { %v659_v23 = vrot.slane %v658_v21, 2  ;;  %v828_v52 = vrot.slane %v827_v51, 2 }
 0x326   :  { %v660_v26 = vadd.f32 %v659_v23, %v658_v21  ;;  %v829_v61 = vadd.f32 %v828_v52, %v827_v51 }
 0x328   :  { %v661_v54 = vrot.slane %v660_v26, 1  ;;  %v830_v0 = vrot.slane %v829_v61, 1 }
 0x32a   :  { %v662_v39 = vadd.f32 %v661_v54, %v660_v26  ;;  %v831_v1 = vadd.f32 %v830_v0, %v829_v61 }
 0x32c   :  { %4675 = vmatmul.mubr.f32.vlgmr.msra.gmra.mrb[10].mxu0 %v662_v39 }
 0x32d   :  { %5640 = vmatpush3.bf16.msra.mxu0 %v6728_v16  ;;  %4744 = vmatprep.mubr.msk.f32.mxu0 %vm6313_vm6, %v6314_v4 }
 0x32e   :  { %5641 = vmatprep.subr.bf16.mxu0 %v6312_v44 }
 0x331   :  { %5643 = vmatpush3.bf16.msra.mxu0 %v6734_v19 }
 0x332   :  { %5644 = vmatprep.subr.bf16.mxu0 %v6312_v44 }
 0x335   :  { %5646 = vmatpush3.bf16.msra.mxu0 %v6740_v22 }
 0x336   :  { %5647 = vmatprep.subr.bf16.mxu0 %v6312_v44 }
 0x339   :  { %5649 = vmatpush3.bf16.msra.mxu0 %v6746_v27 }
 0x33a   :  { %5650 = vmatprep.subr.bf16.mxu0 %v6312_v44 }
 0x33d   :  { %5652 = vmatpush3.bf16.msra.mxu0 %v6749_v34 }
 0x33e   :  { %5653 = vmatprep.subr.bf16.mxu0 %v6312_v44 }
 0x341   :  { %5655 = vmatpush3.bf16.msra.mxu0 %v6755_v42 }
 0x342   :  { %5656 = vmatprep.subr.bf16.mxu0 %v6312_v44 }
 0x345   :  { %5658 = vmatpush3.bf16.msra.mxu0 %v6761_v49 }
 0x346   :  { %5659 = vmatprep.subr.bf16.mxu0 %v6312_v44 }
 0x349   :  { %5661 = vmatpush3.bf16.msra.mxu0 %v6767_v60 }
 0x34a   :  { %5687 = vmatprep.subr.bf16.mxu0 %v5686_v10 }
 0x34c   :  { %4745 = vmatmul.mubr.f32.vlgmr.msra.gmra.mrb[12].mxu0 %v831_v1 }
 0x34d   :  { %5689 = vmatpush3.bf16.msra.mxu0 %v5688_v14  ;;  %v1052_v14 = vld [vmem:[%s7829_s3 + $0x10] sm:$0xff] }
 0x34e   :  { %5691 = vmatprep.subr.bf16.mxu0 %v5690_v18  ;;  %v1053_v18 = vld [vmem:[%s7829_s3 + $0x18] sm:$0xff] }
 0x3ff   :  { %v729_v20 = vpop.f32.mrb[10].mxu0 }
 0x400   :  { %v736_v21 = vrot.slane %v729_v20, %v6707_v48  ;;  %v4676_v23 = vpop.f32.mrb[11].mxu0  ;;  %v5692_v20 = vpack.c.bf16 %v1053_v18, %v1052_v14  ;;  %v1078_v14 = vld [vmem:[%s7829_s3 + $0xe0] sm:$0xff]  ;;  %v1079_v18 = vld [vmem:[%s7829_s3 + $0xe8] sm:$0xff] }
 0x401   :  { %v1071_v23 = vld [vmem:[%s7829_s3 + $0xa8] sm:$0xff] }
 0x402   :  { %v6828_v26 = vsub.f32 %v636_v15, %v736_v21  ;;  %v6830_v30 = vsub.f32 %v637_v17, %v736_v21  ;;  %5693 = vmatpush3.bf16.msra.mxu0 %v5692_v20  ;;  %v1070_v21 = vld [vmem:[%s7829_s3 + $0xa0] sm:$0xff] }
 0x404   :  { %v739_v33 = vmul.f32 %v6828_v26, %v6828_v26  ;;  %v740_v54 = vmul.f32 %v6830_v30, %v6830_v30 }
 0x406   :  { %v741_v39 = vadd.f32 %v740_v54, %v739_v33  ;;  %v5694_v33 = vpack.c.bf16 %v1071_v23, %v1070_v21  ;;  %v1054_v54 = vld [vmem:[%s7829_s3 + $0x20] sm:$0xff]  ;;  %v5710_v21 = vpack.c.bf16 %v1079_v18, %v1078_v14  ;;  %v1091_v14 = vld [vmem:[%s7829_s3 + $0x148] sm:$0xff] }
 0x407   :  { %v1062_v23 = vld [vmem:[%s7829_s3 + $0x60] sm:$0xff] }
 0x408   :  { %v742_v55 = vrot.slane %v741_v39, 4  ;;  %5695 = vmatprep.subr.bf16.mxu0 %v5694_v33  ;;  %v1063_v33 = vld [vmem:[%s7829_s3 + $0x68] sm:$0xff] }
 0x40a   :  { %v743_v41 = vadd.f32 %v742_v55, %v741_v39  ;;  %v1055_v39 = vld [vmem:[%s7829_s3 + $0x28] sm:$0xff] }
 0x40b   :  { %v5696_v55 = vpack.c.bf16 %v1055_v39, %v1054_v54  ;;  %v1080_v54 = vld [vmem:[%s7829_s3 + $0xf0] sm:$0xff]  ;;  %v1081_v39 = vld [vmem:[%s7829_s3 + $0xf8] sm:$0xff] }
 0x40c   :  { %v744_v57 = vrot.slane %v743_v41, 2 }
 0x40d   :  { %5697 = vmatpush3.bf16.msra.mxu0 %v5696_v55  ;;  %v5712_v55 = vpack.c.bf16 %v1063_v33, %v1062_v23  ;;  %v1094_v33 = vld [vmem:[%s7829_s3 + $0x160] sm:$0xff] }
 0x40e   :  { %v745_v58 = vadd.f32 %v744_v57, %v743_v41  ;;  %v1072_v41 = vld [vmem:[%s7829_s3 + $0xb0] sm:$0xff]  ;;  %v1073_v57 = vld [vmem:[%s7829_s3 + $0xb8] sm:$0xff] }
 0x410   :  { %v746_v51 = vrot.slane %v745_v58, 1 }
 0x412   :  { %v747_v52 = vadd.f32 %v746_v51, %v745_v58  ;;  %v1056_v58 = vld [vmem:[%s7829_s3 + $0x30] sm:$0xff]  ;;  %v5698_v51 = vpack.c.bf16 %v1073_v57, %v1072_v41  ;;  %v5714_v41 = vpack.c.bf16 %v1081_v39, %v1080_v54  ;;  %v1095_v54 = vld [vmem:[%s7829_s3 + $0x168] sm:$0xff] }
 0x413   :  { %v1064_v57 = vld [vmem:[%s7829_s3 + $0x70] sm:$0xff]  ;;  %v5742_v39 = vpack.c.bf16 %v1095_v54, %v1094_v33 }
 0x414   :  { %4710 = vmatmul.mubr.f32.vlgmr.msra.gmra.mrb[6].mxu1 %v747_v52  ;;  %v1057_v52 = vld [vmem:[%s7829_s3 + $0x38] sm:$0xff]  ;;  %5699 = vmatprep.subr.bf16.mxu0 %v5698_v51 }
 0x415   :  { %5664 = vmatpush3.bf16.msra.mxu1 %v6728_v16  ;;  %4779 = vmatprep.mubr.msk.f32.mxu1 %vm6313_vm6, %v6314_v4 }
 0x416   :  { %5665 = vmatprep.subr.bf16.mxu1 %v6312_v44 }
 0x419   :  { %5667 = vmatpush3.bf16.msra.mxu1 %v6734_v19 }
 0x41a   :  { %5668 = vmatprep.subr.bf16.mxu1 %v6312_v44 }
 0x41d   :  { %5670 = vmatpush3.bf16.msra.mxu1 %v6740_v22 }
 0x41e   :  { %5671 = vmatprep.subr.bf16.mxu1 %v6312_v44 }
 0x41f   :  { %v898_v15 = vpop.f32.mrb[12].mxu0 }
 0x420   :  { %v905_v17 = vrot.slane %v898_v15, %v6707_v48  ;;  %v4746_v61 = vpop.f32.mrb[13].mxu0  ;;  %v1074_v15 = vld [vmem:[%s7829_s3 + $0xc0] sm:$0xff] }
 0x421   :  { %5673 = vmatpush3.bf16.msra.mxu1 %v6746_v27  ;;  %v5700_v61 = vpack.c.bf16 %v1057_v52, %v1056_v58  ;;  %v1065_v58 = vld [vmem:[%s7829_s3 + $0x78] sm:$0xff]  ;;  %v1082_v52 = vld [vmem:[%s7829_s3 + $0x100] sm:$0xff] }
 0x422   :  { %v6846_v0 = vsub.f32 %v638_v45, %v905_v17  ;;  %v6848_v1 = vsub.f32 %v639_v46, %v905_v17  ;;  %5674 = vmatprep.subr.bf16.mxu1 %v6312_v44  ;;  %v1075_v17 = vld [vmem:[%s7829_s3 + $0xc8] sm:$0xff]  ;;  %v5716_v51 = vpack.c.bf16 %v1065_v58, %v1064_v57 }
 0x423   :  { %5701 = vmatpush3.bf16.msra.mxu0 %v5700_v61  ;;  %v1084_v61 = vld [vmem:[%s7829_s3 + $0x110] sm:$0xff] }
 0x424   :  { %v908_v7 = vmul.f32 %v6846_v0, %v6846_v0  ;;  %v909_v8 = vmul.f32 %v6848_v1, %v6848_v1 }
 0x425   :  { %5676 = vmatpush3.bf16.msra.mxu1 %v6749_v34 }
 0x426   :  { %v910_v9 = vadd.f32 %v909_v8, %v908_v7  ;;  %5677 = vmatprep.subr.bf16.mxu1 %v6312_v44  ;;  %v5702_v7 = vpack.c.bf16 %v1075_v17, %v1074_v15  ;;  %v1058_v8 = vld [vmem:[%s7829_s3 + $0x40] sm:$0xff]  ;;  %v1083_v15 = vld [vmem:[%s7829_s3 + $0x108] sm:$0xff] }
 0x427   :  { %v5718_v17 = vpack.c.bf16 %v1083_v15, %v1082_v52  ;;  %v996_v15 = vsub.s32 4, %v6565_v3 }
 0x428   :  { %v911_v10 = vrot.slane %v910_v9, 4  ;;  %5703 = vmatprep.subr.bf16.mxu0 %v5702_v7  ;;  %v1085_v7 = vld [vmem:[%s7829_s3 + $0x118] sm:$0xff] }
 0x429   :  { %5679 = vmatpush3.bf16.msra.mxu1 %v6755_v42 }
 0x42a   :  { %v912_v45 = vadd.f32 %v911_v10, %v910_v9  ;;  %5680 = vmatprep.subr.bf16.mxu1 %v6312_v44  ;;  %v1059_v9 = vld [vmem:[%s7829_s3 + $0x48] sm:$0xff]  ;;  %v1076_v10 = vld [vmem:[%s7829_s3 + $0xd0] sm:$0xff] }
 0x42c   :  { %v913_v46 = vrot.slane %v912_v45, 2 }
 0x42d   :  { %5682 = vmatpush3.bf16.msra.mxu1 %v6761_v49 }
 0x42e   :  { %5683 = vmatprep.subr.bf16.mxu1 %v6312_v44  ;;  %v914_v11 = vadd.f32 %v913_v46, %v912_v45  ;;  %v1077_v45 = vld [vmem:[%s7829_s3 + $0xd8] sm:$0xff]  ;;  %v5704_v46 = vpack.c.bf16 %v1059_v9, %v1058_v8  ;;  %v5722_v8 = vpack.c.bf16 %v1085_v7, %v1084_v61  ;;  %v1086_v9 = vld [vmem:[%s7829_s3 + $0x120] sm:$0xff] }
 0x430   :  { %v915_v12 = vrot.slane %v914_v11, 1  ;;  %5705 = vmatpush3.bf16.msra.mxu0 %v5704_v46  ;;  %v1088_v46 = vld [vmem:[%s7829_s3 + $0x130] sm:$0xff] }
 0x431   :  { %5685 = vmatpush3.bf16.msra.mxu1 %v6767_v60 }
 0x432   :  { %v916_v13 = vadd.f32 %v915_v12, %v914_v11  ;;  %v5706_v11 = vpack.c.bf16 %v1077_v45, %v1076_v10  ;;  %v1060_v12 = vld [vmem:[%s7829_s3 + $0x50] sm:$0xff]  ;;  %5719 = vmatprep.subr.bf16.mxu1 %v5718_v17  ;;  %v1087_v10 = vld [vmem:[%s7829_s3 + $0x128] sm:$0xff] }
 0x433   :  { %v5726_v45 = vpack.c.bf16 %v1087_v10, %v1086_v9 }
 0x434   :  { %4780 = vmatmul.mubr.f32.vlgmr.msra.gmra.mrb[8].mxu1 %v916_v13  ;;  %v1061_v13 = vld [vmem:[%s7829_s3 + $0x58] sm:$0xff]  ;;  %5707 = vmatprep.subr.bf16.mxu0 %v5706_v11 }
 0x435   :  { %v5708_v20 = vpack.c.bf16 %v1061_v13, %v1060_v12  ;;  %5721 = vmatpush3.bf16.msra.mxu1 %v5718_v17  ;;  %v1089_v11 = vld [vmem:[%s7829_s3 + $0x138] sm:$0xff]  ;;  %v1090_v12 = vld [vmem:[%s7829_s3 + $0x140] sm:$0xff]  ;;  %v1004_v17 = vsub.s32 5, %v6565_v3 }
 0x436   :  { %5723 = vmatprep.subr.bf16.mxu1 %v5722_v8  ;;  %v5730_v13 = vpack.c.bf16 %v1089_v11, %v1088_v46  ;;  %v5734_v18 = vpack.c.bf16 %v1091_v14, %v1090_v12 }
 0x437   :  { %5709 = vmatpush3.bf16.msra.mxu0 %v5708_v20  ;;  %v1092_v20 = vld [vmem:[%s7829_s3 + $0x150] sm:$0xff] }
 0x438   :  { %5711 = vmatprep.subr.bf16.mxu0 %v5710_v21  ;;  %v1093_v21 = vld [vmem:[%s7829_s3 + $0x158] sm:$0xff] }
 0x439   :  { %5725 = vmatpush3.bf16.msra.mxu1 %v5722_v8  ;;  %v5738_v23 = vpack.c.bf16 %v1093_v21, %v1092_v20  ;;  %v6994_v8 = vrot.slane %v6779_v5, %v996_v15 }
 0x43a   :  { %5727 = vmatprep.subr.bf16.mxu1 %v5726_v45 }
 0x43b   :  { %5713 = vmatpush3.bf16.msra.mxu0 %v5712_v55  ;;  %v1096_v55 = vld [vmem:[%s7829_s3 + $0x170] sm:$0xff] }
 0x43c   :  { %5715 = vmatprep.subr.bf16.mxu0 %v5714_v41  ;;  %v1097_v41 = vld [vmem:[%s7829_s3 + $0x178] sm:$0xff] }
 0x43d   :  { %5729 = vmatpush3.bf16.msra.mxu1 %v5726_v45  ;;  %v5746_v57 = vpack.c.bf16 %v1097_v41, %v1096_v55  ;;  %v6999_v45 = vrot.slane %v6779_v5, %v1004_v17 }
 0x43e   :  { %5731 = vmatprep.subr.bf16.mxu1 %v5730_v13 }
 0x43f   :  { %5717 = vmatpush3.bf16.msra.mxu0 %v5716_v51 }
 0x440   :  { %5750 = vmatprep.subr.bf16.mxu0 %v6312_v44 }
 0x441   :  { %5733 = vmatpush3.bf16.msra.mxu1 %v5730_v13 }
 0x442   :  { %5735 = vmatprep.subr.bf16.mxu1 %v5734_v18 }
 0x445   :  { %5737 = vmatpush3.bf16.msra.mxu1 %v5734_v18 }
 0x446   :  { %5739 = vmatprep.subr.bf16.mxu1 %v5738_v23 }
 0x449   :  { %5741 = vmatpush3.bf16.msra.mxu1 %v5738_v23 }
 0x44a   :  { %5743 = vmatprep.subr.bf16.mxu1 %v5742_v39 }
 0x44d   :  { %5745 = vmatpush3.bf16.msra.mxu1 %v5742_v39 }
 0x44e   :  { %5747 = vmatprep.subr.bf16.mxu1 %v5746_v57 }
 0x451   :  { %5749 = vmatpush3.bf16.msra.mxu1 %v5746_v57 }
 0x452   :  { %5774 = vmatprep.subr.bf16.mxu1 %v6312_v44 }
 0x4e7   :  { %v814_v58 = vpop.f32.mrb[6].mxu1 }
 0x4e8   :  { %v815_v51 = vadd.f32 1e-05, %v814_v58  ;;  %v4711_v52 = vpop.f32.mrb[7].mxu1 }
 0x4ea   :  { %6208 = vrsqrt.f32 %v815_v51 }
 0x4f4   :  { %v6209_v61 = vpop.eup %6208 }
 0x4f5   :  { %v822_v7 = vrot.slane %v6209_v61, %v6707_v48 }
 0x4f7   :  { %v823_v9 = vmul.f32 %v822_v7, %v6828_v26  ;;  %v824_v10 = vmul.f32 %v822_v7, %v6830_v30 }
 0x4f9   :  { %v998_v46 = vmul.f32 %v6994_v8, %v823_v9  ;;  %v999_v11 = vmul.f32 %v6994_v8, %v824_v10 }
 0x4fb   :  { %v1006_v12 = vadd.f32 %v6999_v45, %v998_v46  ;;  %v1007_v13 = vadd.f32 %v6999_v45, %v999_v11 }
 0x4fd   :  { %v1010_v14 = vmax.f32 %v1006_v12, 0.0  ;;  %v1011_v18 = vmax.f32 %v1007_v13, 0.0 }
 0x4ff   :  { %1162 = vmatprep.mubr.f32.mxu0 %v1010_v14  ;;  %v1018_v20 = vrot.slane %v1010_v14, 7  ;;  %v1034_v21 = vrot.slane %v1010_v14, 1  ;;  %v1035_v23 = vrot.slane %v1011_v18, 1  ;;  %v1019_v33 = vrot.slane %v1011_v18, 7 }
 0x501   :  { %v1029_v26 = vsel %vm153_vm1, 0.0, %v1018_v20  ;;  %v1036_v30 = vsel %vm182_vm0, %v1034_v21, %v1035_v23  ;;  %v1020_v54 = vsel %vm153_vm1, %v1018_v20, %v1019_v33 }
 0x502   :  { %3915 = vmatmul.mubr.msk.f32.vlgmr.msra.gmra.mrb[14].mxu0 %vm6598_vm2, %v1029_v26  ;;  %4814 = vmatprep.mubr.f32.mxu1 %v1036_v30 }
 0x503   :  { %1167 = vmatprep.mubr.f32.mxu0 %v1011_v18  ;;  %5752 = vmatpush3.bf16.msra.mxu0 %v6650_v43 }
 0x504   :  { %5753 = vmatprep.subr.bf16.mxu0 %v6312_v44 }
 0x506   :  { %1168 = vmatmul.mubr.f32.gmra.mrb[16].mxu0 %v1020_v54 }
 0x507   :  { %v983_v39 = vpop.f32.mrb[8].mxu1  ;;  %5755 = vmatpush3.bf16.msra.mxu0 %v6658_v47 }
 0x508   :  { %v984_v55 = vadd.f32 1e-05, %v983_v39  ;;  %v4781_v41 = vpop.f32.mrb[9].mxu1  ;;  %5756 = vmatprep.subr.bf16.mxu0 %v6312_v44 }
 0x50a   :  { %6210 = vrsqrt.f32 %v984_v55 }
 0x50b   :  { %5758 = vmatpush3.bf16.msra.mxu0 %v6664_v50 }
 0x50c   :  { %5759 = vmatprep.subr.bf16.mxu0 %v6312_v44 }
 0x50f   :  { %5761 = vmatpush3.bf16.msra.mxu0 %v6670_v53 }
 0x510   :  { %5762 = vmatprep.subr.bf16.mxu0 %v6312_v44 }
 0x513   :  { %5764 = vmatpush3.bf16.msra.mxu0 %v6676_v56 }
 0x514   :  { %v6211_v57 = vpop.eup %6210  ;;  %5765 = vmatprep.subr.bf16.mxu0 %v6312_v44 }
 0x515   :  { %v991_v58 = vrot.slane %v6211_v57, %v6707_v48 }
 0x517   :  { %v992_v51 = vmul.f32 %v991_v58, %v6846_v0  ;;  %v993_v52 = vmul.f32 %v991_v58, %v6848_v1  ;;  %5767 = vmatpush3.bf16.msra.mxu0 %v6682_v59 }
 0x518   :  { %5768 = vmatprep.subr.bf16.mxu0 %v6312_v44 }
 0x519   :  { %v1000_v15 = vmul.f32 %v6994_v8, %v992_v51  ;;  %v1001_v17 = vmul.f32 %v6994_v8, %v993_v52 }
 0x51b   :  { %v1008_v61 = vadd.f32 %v6999_v45, %v1000_v15  ;;  %v1009_v7 = vadd.f32 %v6999_v45, %v1001_v17  ;;  %5770 = vmatpush3.bf16.msra.mxu0 %v6688_v63 }
 0x51c   :  { %5771 = vmatprep.subr.bf16.mxu0 %v6312_v44 }
 0x51d   :  { %v1012_v9 = vmax.f32 %v1008_v61, 0.0  ;;  %v1013_v0 = vmax.f32 %v1009_v7, 0.0 }
 0x51f   :  { %v1037_v10 = vrot.slane %v1012_v9, 1  ;;  %1172 = vmatprep.mubr.f32.mxu0 %v1012_v9  ;;  %v1021_v1 = vrot.slane %v1012_v9, 7  ;;  %v1039_v46 = vrot.slane %v1013_v0, 1  ;;  %5773 = vmatpush3.bf16.msra.mxu0 %v6694_v2  ;;  %v1023_v14 = vrot.slane %v1013_v0, 7 }
 0x520   :  { %5798 = vmatprep.subr.bf16.mxu0 %v6312_v44 }
 0x521   :  { %v1022_v11 = vsel %vm153_vm1, %v1019_v33, %v1021_v1  ;;  %v1038_v12 = vsel %vm182_vm0, %v1035_v23, %v1037_v10  ;;  %v1040_v13 = vsel %vm182_vm0, %v1037_v10, %v1039_v46  ;;  %v1024_v18 = vsel %vm153_vm1, %v1021_v1, %v1023_v14 }
 0x522   :  { %3916 = vmatmul.mubr.msk.f32.gmra.mrb[18].mxu0 %vm6636_vm5, %v1022_v11  ;;  %4815 = vmatmul.mubr.msk.f32.vlgmr.msra.gmra.mrb[10].mxu1 %vm6607_vm3, %v1038_v12  ;;  %v1045_v20 = vsel %vm182_vm0, %v1039_v46, 0.0 }
 0x523   :  { %1177 = vmatprep.mubr.f32.mxu0 %v1013_v0  ;;  %4817 = vmatprep.mubr.f32.mxu1 %v1040_v13 }
 0x524   :  { %5776 = vmatpush3.bf16.msra.mxu1 %v6650_v43 }
 0x525   :  { %5777 = vmatprep.subr.bf16.mxu1 %v6312_v44 }
 0x526   :  { %1178 = vmatmul.mubr.f32.gmra.mrb[20].mxu0 %v1024_v18  ;;  %4818 = vmatmul.mubr.msk.f32.gmra.mrb[12].mxu1 %vm6628_vm4, %v1045_v20 }
 0x527   :  { %4852 = vmatprep.mubr.msk.f32.mxu0 %vm6313_vm6, %v6314_v4  ;;  %4887 = vmatprep.mubr.msk.f32.mxu1 %vm6313_vm6, %v6314_v4 }
 0x528   :  { %5779 = vmatpush3.bf16.msra.mxu1 %v6658_v47 }
 0x529   :  { %5780 = vmatprep.subr.bf16.mxu1 %v6312_v44 }
 0x52c   :  { %5782 = vmatpush3.bf16.msra.mxu1 %v6664_v50 }
 0x52d   :  { %5783 = vmatprep.subr.bf16.mxu1 %v6312_v44 }
 0x530   :  { %5785 = vmatpush3.bf16.msra.mxu1 %v6670_v53 }
 0x531   :  { %5786 = vmatprep.subr.bf16.mxu1 %v6312_v44 }
 0x534   :  { %5788 = vmatpush3.bf16.msra.mxu1 %v6676_v56 }
 0x535   :  { %5789 = vmatprep.subr.bf16.mxu1 %v6312_v44 }
 0x538   :  { %5791 = vmatpush3.bf16.msra.mxu1 %v6682_v59 }
 0x539   :  { %5792 = vmatprep.subr.bf16.mxu1 %v6312_v44 }
 0x53c   :  { %5794 = vmatpush3.bf16.msra.mxu1 %v6688_v63 }
 0x53d   :  { %5795 = vmatprep.subr.bf16.mxu1 %v6312_v44 }
 0x540   :  { %5797 = vmatpush3.bf16.msra.mxu1 %v6694_v2 }
 0x541   :  { %5822 = vmatprep.subr.bf16.mxu1 %v6312_v44 }
 0x5d5   :  { %v4142_v21 = vpop.f32.mrb[14].mxu0 }
 0x5d6   :  { %v4143_v23 = vpop.f32.mrb[15].mxu0 }
 0x5d7   :  { %v4144_v26 = vadd.f32 %v4143_v23, %v4142_v21 }
 0x5d9   :  { %v4145_v30 = vpop.f32.mrb[16].mxu0 }
 0x5da   :  { %v4146_v33 = vpop.f32.mrb[17].mxu0 }
 0x5db   :  { %v4147_v54 = vadd.f32 %v4146_v33, %v4145_v30 }
 0x5f5   :  { %v4148_v39 = vpop.f32.mrb[18].mxu0  ;;  %v4816_v55 = vpop.f32.mrb[10].mxu1 }
 0x5f6   :  { %v1255_v41 = vadd.f32 %v4816_v55, %v4147_v54  ;;  %v4149_v57 = vpop.f32.mrb[19].mxu0  ;;  %v1249_v58 = vpop.f32.mrb[11].mxu1 }
 0x5f7   :  { %v4150_v51 = vadd.f32 %v4149_v57, %v4148_v39  ;;  %v1250_v52 = vadd.f32 %v4144_v26, %v1249_v58 }
 0x5f9   :  { %v4151_v15 = vpop.f32.mrb[20].mxu0  ;;  %v4819_v17 = vpop.f32.mrb[12].mxu1  ;;  %v1268_v9 = vadd.f32 %v1255_v41, %v1250_v52 }
 0x5fa   :  { %v4152_v61 = vpop.f32.mrb[21].mxu0  ;;  %v1259_v7 = vpop.f32.mrb[13].mxu1 }
 0x5fb   :  { %v4153_v0 = vadd.f32 %v4152_v61, %v4151_v15  ;;  %v1260_v10 = vadd.f32 %v4150_v51, %v1259_v7 }
 0x5fd   :  { %v1265_v1 = vadd.f32 %v4819_v17, %v4153_v0  ;;  %v1269_v46 = vadd.f32 %v1268_v9, %v1260_v10 }
 0x5ff   :  { %v1270_v11 = vadd.f32 %v1269_v46, %v1265_v1 }
 0x601   :  { %v1271_v12 = vrot.slane %v1270_v11, 4 }
 0x603   :  { %v1272_v13 = vadd.f32 %v1271_v12, %v1270_v11 }
 0x605   :  { %v1273_v14 = vrot.slane %v1272_v13, 2 }
 0x607   :  { %v1274_v18 = vadd.f32 %v1273_v14, %v1272_v13  ;;  %v1457_v14 = vsub.s32 3, %v6565_v3 }
 0x609   :  { %v1275_v20 = vrot.slane %v1274_v18, 1 }
 0x60b   :  { %v1276_v21 = vadd.f32 %v1275_v20, %v1274_v18 }
 0x60d   :  { %4853 = vmatmul.mubr.f32.vlgmr.msra.gmra.mrb[22].mxu0 %v1276_v21 }
 0x60e   :  { %5800 = vmatpush3.bf16.msra.mxu0 %v6728_v16  ;;  %4922 = vmatprep.mubr.msk.f32.mxu0 %vm6313_vm6, %v6314_v4 }
 0x60f   :  { %5801 = vmatprep.subr.bf16.mxu0 %v6312_v44 }
 0x612   :  { %5803 = vmatpush3.bf16.msra.mxu0 %v6734_v19 }
 0x613   :  { %5804 = vmatprep.subr.bf16.mxu0 %v6312_v44 }
 0x616   :  { %5806 = vmatpush3.bf16.msra.mxu0 %v6740_v22 }
 0x617   :  { %5807 = vmatprep.subr.bf16.mxu0 %v6312_v44 }
 0x61a   :  { %5809 = vmatpush3.bf16.msra.mxu0 %v6746_v27 }
 0x61b   :  { %5810 = vmatprep.subr.bf16.mxu0 %v6312_v44 }
 0x61e   :  { %5812 = vmatpush3.bf16.msra.mxu0 %v6749_v34 }
 0x61f   :  { %5813 = vmatprep.subr.bf16.mxu0 %v6312_v44 }
 0x622   :  { %5815 = vmatpush3.bf16.msra.mxu0 %v6755_v42 }
 0x623   :  { %5816 = vmatprep.subr.bf16.mxu0 %v6312_v44 }
 0x626   :  { %5818 = vmatpush3.bf16.msra.mxu0 %v6761_v49 }
 0x627   :  { %5819 = vmatprep.subr.bf16.mxu0 %v6312_v44 }
 0x62a   :  { %5821 = vmatpush3.bf16.msra.mxu0 %v6767_v60 }
 0x62b   :  { %5846 = vmatprep.subr.bf16.mxu0 %v6312_v44 }
 0x6e0   :  { %v1343_v23 = vpop.f32.mrb[22].mxu0 }
 0x6e1   :  { %v1350_v26 = vrot.slane %v1343_v23, %v6707_v48  ;;  %v4854_v30 = vpop.f32.mrb[23].mxu0 }
 0x6e2   :  { %v1458_v30 = vrot.slane %v6779_v5, %v1457_v14 }
 0x6e3   :  { %v1351_v33 = vsub.f32 %v1250_v52, %v1350_v26  ;;  %v1352_v54 = vsub.f32 %v1255_v41, %v1350_v26  ;;  %v1353_v39 = vsub.f32 %v1260_v10, %v1350_v26  ;;  %v1354_v55 = vsub.f32 %v1265_v1, %v1350_v26 }
 0x6e4   :  { %v1449_v1 = vsub.s32 2, %v6565_v3 }
 0x6e5   :  { %v1355_v57 = vmul.f32 %v1351_v33, %v1351_v33  ;;  %v1356_v58 = vmul.f32 %v1352_v54, %v1352_v54  ;;  %v1357_v51 = vmul.f32 %v1353_v39, %v1353_v39  ;;  %v1358_v17 = vmul.f32 %v1354_v55, %v1354_v55 }
 0x6e6   :  { %v1450_v21 = vrot.slane %v6779_v5, %v1449_v1 }
 0x6e7   :  { %v1359_v15 = vadd.f32 %v1356_v58, %v1355_v57 }
 0x6e9   :  { %v1360_v61 = vadd.f32 %v1359_v15, %v1357_v51 }
 0x6eb   :  { %v1361_v7 = vadd.f32 %v1360_v61, %v1358_v17 }
 0x6ed   :  { %v1362_v9 = vrot.slane %v1361_v7, 4 }
 0x6ef   :  { %v1363_v0 = vadd.f32 %v1362_v9, %v1361_v7 }
 0x6f1   :  { %v1364_v46 = vrot.slane %v1363_v0, 2 }
 0x6f3   :  { %v1365_v11 = vadd.f32 %v1364_v46, %v1363_v0 }
 0x6f5   :  { %v1366_v12 = vrot.slane %v1365_v11, 1 }
 0x6f7   :  { %v1367_v13 = vadd.f32 %v1366_v12, %v1365_v11 }
 0x6f9   :  { %4888 = vmatmul.mubr.f32.vlgmr.msra.gmra.mrb[14].mxu1 %v1367_v13 }
 0x6fa   :  { %5824 = vmatpush3.bf16.msra.mxu1 %v6728_v16  ;;  %4957 = vmatprep.mubr.msk.f32.mxu1 %vm6313_vm6, %v6314_v4 }
 0x6fb   :  { %5825 = vmatprep.subr.bf16.mxu1 %v6312_v44 }
 0x6fe   :  { %5827 = vmatpush3.bf16.msra.mxu1 %v6734_v19 }
 0x6ff   :  { %5828 = vmatprep.subr.bf16.mxu1 %v6312_v44 }
 0x702   :  { %5830 = vmatpush3.bf16.msra.mxu1 %v6740_v22 }
 0x703   :  { %5831 = vmatprep.subr.bf16.mxu1 %v6312_v44 }
 0x706   :  { %5833 = vmatpush3.bf16.msra.mxu1 %v6746_v27 }
 0x707   :  { %5834 = vmatprep.subr.bf16.mxu1 %v6312_v44 }
 0x70a   :  { %5836 = vmatpush3.bf16.msra.mxu1 %v6749_v34 }
 0x70b   :  { %5837 = vmatprep.subr.bf16.mxu1 %v6312_v44 }
 0x70e   :  { %5839 = vmatpush3.bf16.msra.mxu1 %v6755_v42 }
 0x70f   :  { %5840 = vmatprep.subr.bf16.mxu1 %v6312_v44 }
 0x712   :  { %5842 = vmatpush3.bf16.msra.mxu1 %v6761_v49 }
 0x713   :  { %5843 = vmatprep.subr.bf16.mxu1 %v6312_v44 }
 0x716   :  { %5845 = vmatpush3.bf16.msra.mxu1 %v6767_v60 }
 0x717   :  { %5870 = vmatprep.subr.bf16.mxu1 %v6312_v44 }
 0x7cc   :  { %v1434_v41 = vpop.f32.mrb[14].mxu1 }
 0x7cd   :  { %v1435_v52 = vadd.f32 1e-05, %v1434_v41  ;;  %v4889_v10 = vpop.f32.mrb[15].mxu1 }
 0x7cf   :  { %6212 = vrsqrt.f32 %v1435_v52 }
 0x7d9   :  { %v6213_v18 = vpop.eup %6212 }
 0x7da   :  { %v1442_v20 = vrot.slane %v6213_v18, %v6707_v48 }
 0x7dc   :  { %v1443_v23 = vmul.f32 %v1442_v20, %v1351_v33  ;;  %v1444_v26 = vmul.f32 %v1442_v20, %v1352_v54  ;;  %v1445_v46 = vmul.f32 %v1442_v20, %v1353_v39  ;;  %v1446_v11 = vmul.f32 %v1442_v20, %v1354_v55 }
 0x7de   :  { %v1451_v57 = vmul.f32 %v1450_v21, %v1443_v23  ;;  %v1452_v58 = vmul.f32 %v1450_v21, %v1444_v26  ;;  %v1453_v41 = vmul.f32 %v1450_v21, %v1445_v46  ;;  %v1454_v33 = vmul.f32 %v1450_v21, %v1446_v11 }
 0x7e0   :  { %v1459_v51 = vadd.f32 %v1458_v30, %v1451_v57  ;;  %v1460_v15 = vadd.f32 %v1458_v30, %v1452_v58  ;;  %v1461_v5 = vadd.f32 %v1458_v30, %v1453_v41  ;;  %v1462_v54 = vadd.f32 %v1458_v30, %v1454_v33 }
 0x7e2   :  { %v1463_v17 = vadd.f32 %v1460_v15, %v1459_v51  ;;  %v1632_v39 = vadd.f32 %v1462_v54, %v1461_v5 }
 0x7e4   :  { %v1464_v61 = vrot.slane %v1463_v17, 4  ;;  %v1633_v55 = vrot.slane %v1632_v39, 4 }
 0x7e6   :  { %v1465_v7 = vadd.f32 %v1464_v61, %v1463_v17  ;;  %v1634_v52 = vadd.f32 %v1633_v55, %v1632_v39 }
 0x7e8   :  { %v1466_v9 = vrot.slane %v1465_v7, 2  ;;  %v1635_v10 = vrot.slane %v1634_v52, 2 }
 0x7ea   :  { %v1467_v0 = vadd.f32 %v1466_v9, %v1465_v7  ;;  %v1636_v18 = vadd.f32 %v1635_v10, %v1634_v52 }
 0x7ec   :  { %v1468_v12 = vrot.slane %v1467_v0, 1  ;;  %v1637_v20 = vrot.slane %v1636_v18, 1 }
 0x7ee   :  { %v1469_v13 = vadd.f32 %v1468_v12, %v1467_v0  ;;  %v1638_v21 = vadd.f32 %v1637_v20, %v1636_v18 }
 0x7f0   :  { %4923 = vmatmul.mubr.f32.vlgmr.msra.gmra.mrb[24].mxu0 %v1469_v13 }
 0x7f1   :  { %5848 = vmatpush3.bf16.msra.mxu0 %v6728_v16  ;;  %4992 = vmatprep.mubr.msk.f32.mxu0 %vm6313_vm6, %v6314_v4 }
 0x7f2   :  { %5849 = vmatprep.subr.bf16.mxu0 %v6312_v44 }
 0x7f5   :  { %5851 = vmatpush3.bf16.msra.mxu0 %v6734_v19 }
 0x7f6   :  { %5852 = vmatprep.subr.bf16.mxu0 %v6312_v44 }
 0x7f9   :  { %5854 = vmatpush3.bf16.msra.mxu0 %v6740_v22 }
 0x7fa   :  { %5855 = vmatprep.subr.bf16.mxu0 %v6312_v44 }
 0x7fd   :  { %5857 = vmatpush3.bf16.msra.mxu0 %v6746_v27 }
 0x7fe   :  { %5858 = vmatprep.subr.bf16.mxu0 %v6312_v44 }
 0x801   :  { %5860 = vmatpush3.bf16.msra.mxu0 %v6749_v34 }
 0x802   :  { %5861 = vmatprep.subr.bf16.mxu0 %v6312_v44 }
 0x805   :  { %5863 = vmatpush3.bf16.msra.mxu0 %v6755_v42 }
 0x806   :  { %5864 = vmatprep.subr.bf16.mxu0 %v6312_v44 }
 0x809   :  { %5866 = vmatpush3.bf16.msra.mxu0 %v6761_v49 }
 0x80a   :  { %5867 = vmatprep.subr.bf16.mxu0 %v6312_v44 }
 0x80d   :  { %5869 = vmatpush3.bf16.msra.mxu0 %v6767_v60 }
 0x80e   :  { %5894 = vmatprep.subr.bf16.mxu0 %v6312_v44 }
 0x810   :  { %4993 = vmatmul.mubr.f32.vlgmr.msra.gmra.mrb[26].mxu0 %v1638_v21 }
 0x811   :  { %5062 = vmatprep.mubr.msk.f32.mxu0 %vm6313_vm6, %v6314_v4 }
 0x8c3   :  { %v1536_v23 = vpop.f32.mrb[24].mxu0 }
 0x8c4   :  { %v1543_v26 = vrot.slane %v1536_v23, %v6707_v48  ;;  %v4924_v30 = vpop.f32.mrb[25].mxu0 }
 0x8c5   :  { %v1812_v30 = vld [vmem:[%s7839_s13 + $0x8] sm:$0xff] }
 0x8c6   :  { %v7131_v57 = vsub.f32 %v1459_v51, %v1543_v26  ;;  %v7133_v58 = vsub.f32 %v1460_v15, %v1543_v26  ;;  %v1811_v26 = vld [vmem:[%s7839_s13] sm:$0xff] }
 0x8c8   :  { %v1546_v17 = vmul.f32 %v7131_v57, %v7131_v57  ;;  %v1547_v61 = vmul.f32 %v7133_v58, %v7133_v58 }
 0x8ca   :  { %v1548_v7 = vadd.f32 %v1547_v61, %v1546_v17  ;;  %v7174_v17 = vpack.c.bf16 %v1812_v30, %v1811_v26  ;;  %v1813_v61 = vld [vmem:[%s7839_s13 + $0x10] sm:$0xff]  ;;  %v1809_v30 = vld [vmem:[%s7833_s7] sm:$0xff] }
 0x8cc   :  { %v1549_v9 = vrot.slane %v1548_v7, 4  ;;  %5896 = vmatpush3.bf16.msra.mxu0 %v7174_v17 }
 0x8cd   :  { %5897 = vmatprep.subr.bf16.mxu0 %v6312_v44 }
 0x8ce   :  { %v1550_v0 = vadd.f32 %v1549_v9, %v1548_v7  ;;  %v1814_v7 = vld [vmem:[%s7839_s13 + $0x18] sm:$0xff] }
 0x8cf   :  { %v7184_v9 = vpack.c.bf16 %v1814_v7, %v1813_v61 }
 0x8d0   :  { %v1551_v46 = vrot.slane %v1550_v0, 2 }
 0x8d1   :  { %5899 = vmatpush3.bf16.msra.mxu0 %v7184_v9 }
 0x8d2   :  { %v1552_v11 = vadd.f32 %v1551_v46, %v1550_v0  ;;  %5900 = vmatprep.subr.bf16.mxu0 %v6312_v44  ;;  %v1815_v0 = vld [vmem:[%s7839_s13 + $0x20] sm:$0xff]  ;;  %v1816_v46 = vld [vmem:[%s7839_s13 + $0x28] sm:$0xff] }
 0x8d4   :  { %v1553_v12 = vrot.slane %v1552_v11, 1 }
 0x8d6   :  { %v1554_v13 = vadd.f32 %v1553_v12, %v1552_v11  ;;  %v7194_v11 = vpack.c.bf16 %v1816_v46, %v1815_v0  ;;  %v1817_v12 = vld [vmem:[%s7839_s13 + $0x30] sm:$0xff] }
 0x8d8   :  { %4958 = vmatmul.mubr.f32.vlgmr.msra.gmra.mrb[16].mxu1 %v1554_v13  ;;  %5902 = vmatpush3.bf16.msra.mxu0 %v7194_v11  ;;  %v1818_v13 = vld [vmem:[%s7839_s13 + $0x38] sm:$0xff] }
 0x8d9   :  { %5872 = vmatpush3.bf16.msra.mxu1 %v6728_v16  ;;  %5027 = vmatprep.mubr.msk.f32.mxu1 %vm6313_vm6, %v6314_v4 }
 0x8da   :  { %5873 = vmatprep.subr.bf16.mxu1 %v6312_v44  ;;  %5903 = vmatprep.subr.bf16.mxu0 %v6312_v44 }
 0x8dd   :  { %5875 = vmatpush3.bf16.msra.mxu1 %v6734_v19 }
 0x8de   :  { %5876 = vmatprep.subr.bf16.mxu1 %v6312_v44 }
 0x8e1   :  { %5878 = vmatpush3.bf16.msra.mxu1 %v6740_v22 }
 0x8e2   :  { %5879 = vmatprep.subr.bf16.mxu1 %v6312_v44 }
 0x8e3   :  { %v1705_v51 = vpop.f32.mrb[26].mxu0 }
 0x8e4   :  { %v1712_v15 = vrot.slane %v1705_v51, %v6707_v48  ;;  %v4994_v41 = vpop.f32.mrb[27].mxu0  ;;  %v7204_v51 = vpack.c.bf16 %v1818_v13, %v1817_v12 }
 0x8e5   :  { %5881 = vmatpush3.bf16.msra.mxu1 %v6746_v27  ;;  %v1820_v41 = vld [vmem:[%s7839_s13 + $0x48] sm:$0xff] }
 0x8e6   :  { %v7149_v33 = vsub.f32 %v1461_v5, %v1712_v15  ;;  %v7151_v39 = vsub.f32 %v1462_v54, %v1712_v15  ;;  %5882 = vmatprep.subr.bf16.mxu1 %v6312_v44  ;;  %5905 = vmatpush3.bf16.msra.mxu0 %v7204_v51  ;;  %v1819_v15 = vld [vmem:[%s7839_s13 + $0x40] sm:$0xff] }
 0x8e7   :  { %5906 = vmatprep.subr.bf16.mxu0 %v6312_v44 }
 0x8e8   :  { %v1715_v55 = vmul.f32 %v7149_v33, %v7149_v33  ;;  %v1716_v52 = vmul.f32 %v7151_v39, %v7151_v39 }
 0x8e9   :  { %5884 = vmatpush3.bf16.msra.mxu1 %v6749_v34 }
 0x8ea   :  { %v1717_v10 = vadd.f32 %v1716_v52, %v1715_v55  ;;  %5885 = vmatprep.subr.bf16.mxu1 %v6312_v44  ;;  %v7214_v55 = vpack.c.bf16 %v1820_v41, %v1819_v15  ;;  %v1821_v52 = vld [vmem:[%s7839_s13 + $0x50] sm:$0xff] }
 0x8ec   :  { %v1718_v18 = vrot.slane %v1717_v10, 4  ;;  %5908 = vmatpush3.bf16.msra.mxu0 %v7214_v55 }
 0x8ed   :  { %5887 = vmatpush3.bf16.msra.mxu1 %v6755_v42  ;;  %5909 = vmatprep.subr.bf16.mxu0 %v6312_v44 }
 0x8ee   :  { %v1719_v5 = vadd.f32 %v1718_v18, %v1717_v10  ;;  %5888 = vmatprep.subr.bf16.mxu1 %v6312_v44  ;;  %v1822_v10 = vld [vmem:[%s7839_s13 + $0x58] sm:$0xff] }
 0x8ef   :  { %v7223_v18 = vpack.c.bf16 %v1822_v10, %v1821_v52 }
 0x8f0   :  { %v1720_v54 = vrot.slane %v1719_v5, 2 }
 0x8f1   :  { %5890 = vmatpush3.bf16.msra.mxu1 %v6761_v49  ;;  %5911 = vmatpush3.bf16.msra.mxu0 %v7223_v18 }
 0x8f2   :  { %5891 = vmatprep.subr.bf16.mxu1 %v6312_v44  ;;  %v1721_v20 = vadd.f32 %v1720_v54, %v1719_v5  ;;  %v1823_v5 = vld [vmem:[%s7839_s13 + $0x60] sm:$0xff]  ;;  %v1824_v54 = vld [vmem:[%s7839_s13 + $0x68] sm:$0xff]  ;;  %5912 = vmatprep.subr.bf16.mxu0 %v6312_v44 }
 0x8f4   :  { %v1722_v21 = vrot.slane %v1721_v20, 1 }
 0x8f5   :  { %5893 = vmatpush3.bf16.msra.mxu1 %v6767_v60 }
 0x8f6   :  { %v1723_v23 = vadd.f32 %v1722_v21, %v1721_v20  ;;  %5065 = vmatprep.subr.mxu1 %v6314_v4  ;;  %v7233_v20 = vpack.c.bf16 %v1824_v54, %v1823_v5  ;;  %v1825_v21 = vld [vmem:[%s7839_s13 + $0x70] sm:$0xff] }
 0x8f8   :  { %5028 = vmatmul.mubr.f32.vlgmr.msra.gmra.mrb[18].mxu1 %v1723_v23  ;;  %5914 = vmatpush3.bf16.msra.mxu0 %v7233_v20  ;;  %v1826_v23 = vld [vmem:[%s7839_s13 + $0x78] sm:$0xff] }
 0x8f9   :  { %5067 = vmatprep.mubr.msk.f32.mxu1 %vm6313_vm6, %v6314_v4  ;;  %5915 = vmatprep.subr.bf16.mxu0 %v6312_v44  ;;  %v7244_v26 = vpack.c.bf16 %v1826_v23, %v1825_v21 }
 0x8fa   :  { %5066 = vmatpush3.msra.mxu1 %v1809_v30 }
 0x8fb   :  { %5070 = vmatprep.subr.mxu1 %v6314_v4 }
 0x8fc   :  { %5917 = vmatpush3.bf16.msra.mxu0 %v7244_v26 }
 0x8fd   :  { %5115 = vmatprep.subr.mxu0 %v6314_v4 }
 0x9ab   :  { %v1621_v61 = vpop.f32.mrb[16].mxu1 }
 0x9ac   :  { %v1622_v7 = vadd.f32 1e-05, %v1621_v61  ;;  %v4959_v0 = vpop.f32.mrb[17].mxu1 }
 0x9ae   :  { %6214 = vrsqrt.f32 %v1622_v7 }
 0x9b8   :  { %v6215_v46 = vpop.eup %6214 }
 0x9b9   :  { %v1629_v12 = vrot.slane %v6215_v46, %v6707_v48 }
 0x9bb   :  { %v1630_v13 = vmul.f32 %v1629_v12, %v7131_v57  ;;  %v1631_v15 = vmul.f32 %v1629_v12, %v7133_v58  ;;  %v7271_v12 = vld [vmem:[%s7834_s8] sm:$0x1] }
 0x9bd   :  { %v1801_v41 = vmul.f32 %v1630_v13, %v6994_v8  ;;  %v1802_v52 = vmul.f32 %v1631_v15, %v6994_v8 }
 0x9bf   :  { %v7258_v10 = vadd.f32 %v1801_v41, %v6999_v45  ;;  %v7261_v5 = vadd.f32 %v1802_v52, %v6999_v45 }
 0x9c1   :  { %v1828_v54 = vadd.f32 %v7261_v5, %v7258_v10 }
 0x9c3   :  { %v1829_v21 = vrot.slane %v1828_v54, 4 }
 0x9c5   :  { %v1830_v23 = vadd.f32 %v1829_v21, %v1828_v54  ;;  %v1827_v54 = vld [vmem:[%s7840_s14] sm:$0xff] }
 0x9c7   :  { %v1831_v61 = vrot.slane %v1830_v23, 2 }
 0x9c9   :  { %v1832_v7 = vadd.f32 %v1831_v61, %v1830_v23 }
 0x9cb   :  { %v1790_v57 = vpop.f32.mrb[18].mxu1  ;;  %v1833_v0 = vrot.slane %v1832_v7, 1 }
 0x9cc   :  { %v5029_v58 = vpop.f32.mrb[19].mxu1  ;;  %v1791_v21 = vadd.f32 1e-05, %v1790_v57 }
 0x9cd   :  { %v1834_v46 = vadd.f32 %v1833_v0, %v1832_v7 }
 0x9cf   :  { %5063 = vmatmul.mubr.f32.vlgmr.msra.gmra.mrb[28].mxu0 %v1834_v46 }
 0x9d0   :  { %5116 = vmatpush3.msra.mxu0 %v1809_v30  ;;  %5117 = vmatprep.mubr.msk.f32.mxu0 %vm6313_vm6, %v6314_v4 }
 0x9d1   :  { %5120 = vmatprep.subr.mxu0 %v6314_v4 }
 0xaa2   :  { %v1901_v13 = vpop.f32.mrb[28].mxu0 }
 0xaa3   :  { %v5064_v15 = vpop.f32.mrb[29].mxu0  ;;  %5068 = vmatmul.mubr.msk.f32.vlgmr.msra.gmra.mrb[20].mxu1 %vm1905_vm7, %v1901_v13 }
 0xaa4   :  { %5071 = vmatpush3.msk.msra.mxu1 %vm153_vm1, %v7271_v12  ;;  %5072 = vmatprep.mubr.msk.f32.mxu1 %vm6313_vm6, %v6314_v4 }
 0xaa5   :  { %5075 = vmatprep.subr.mxu1 %v6314_v4 }
 0xb76   :  { %v1975_v30 = vpop.f32.mrb[20].mxu1 }
 0xb77   :  { %v1979_v41 = vmax.f32 %v1975_v30, 0.0  ;;  %v5069_v52 = vpop.f32.mrb[21].mxu1 }
 0xb79   :  { %5073 = vmatmul.mubr.msk.f32.vlgmr.msra.gmra.mrb[22].mxu1 %vm1980_vm8, %v1979_v41 }
 0xb7a   :  { %5077 = vmatprep.mubr.msk.f32.mxu1 %vm6313_vm6, %v6314_v4  ;;  %5076 = vmatpush3.msra.mxu1 %v1827_v54 }
 0xb7b   :  { %5918 = vmatprep.subr.bf16.mxu1 %v6312_v44 }
 0xc4c   :  { %v2053_v23 = vpop.f32.mrb[22].mxu1 }
 0xc4d   :  { %v3922_v61 = vmul.f32 -1.442695, %v2053_v23  ;;  %v5074_v7 = vpop.f32.mrb[23].mxu1 }
 0xc4f   :  { %6216 = vpow2.f32 %v3922_v61 }
 0xc50   :  { %6218 = vrsqrt.f32 %v1791_v21 }
 0xc59   :  { %v6217_v0 = vpop.eup %6216 }
 0xc5a   :  { %v6219_v58 = vpop.eup %6218  ;;  %v2060_v46 = vadd.f32 1.0, %v6217_v0 }
 0xc5b   :  { %v1798_v13 = vrot.slane %v6219_v58, %v6707_v48 }
 0xc5c   :  { %6220 = vrcp.f32 %v2060_v46 }
 0xc5d   :  { %v1799_v15 = vmul.f32 %v1798_v13, %v7149_v33  ;;  %v1800_v30 = vmul.f32 %v1798_v13, %v7151_v39 }
 0xc5f   :  { %v1803_v41 = vmul.f32 %v1799_v15, %v6994_v8  ;;  %v1804_v52 = vmul.f32 %v1800_v30, %v6994_v8 }
 0xc61   :  { %v7297_v21 = vadd.f32 %v1803_v41, %v6999_v45  ;;  %v7300_v33 = vadd.f32 %v1804_v52, %v6999_v45 }
 0xc63   :  { %v2142_v8 = vadd.f32 %v7300_v33, %v7297_v21 }
 0xc65   :  { %v2143_v39 = vrot.slane %v2142_v8, 4 }
 0xc66   :  { %v6221_v57 = vpop.eup %6220 }
 0xc67   :  { %5078 = vmatmul.mubr.msk.f32.vlgmr.msra.gmra.mrb[24].mxu1 %vm1905_vm7, %v6221_v57  ;;  %v2144_v23 = vadd.f32 %v2143_v39, %v2142_v8  ;;  %v2518_v8 = vld [vmem:[%s7830_s4 + $0x100] sm:$0xff] }
 0xc68   :  { %5920 = vmatpush3.bf16.msra.mxu1 %v7174_v17  ;;  %5112 = vmatprep.mubr.msk.f32.mxu1 %vm6313_vm6, %v6314_v4 }
 0xc69   :  { %5921 = vmatprep.subr.bf16.mxu1 %v6312_v44  ;;  %v2145_v45 = vrot.slane %v2144_v23, 2 }
 0xc6b   :  { %v2146_v61 = vadd.f32 %v2145_v45, %v2144_v23  ;;  %v2520_v23 = vld [vmem:[%s7830_s4 + $0x110] sm:$0xff]  ;;  %v2521_v45 = vld [vmem:[%s7830_s4 + $0x118] sm:$0xff] }
 0xc6c   :  { %5923 = vmatpush3.bf16.msra.mxu1 %v7184_v9 }
 0xc6d   :  { %5924 = vmatprep.subr.bf16.mxu1 %v6312_v44  ;;  %v2147_v7 = vrot.slane %v2146_v61, 1 }
 0xc6f   :  { %v2148_v0 = vadd.f32 %v2147_v7, %v2146_v61  ;;  %v5978_v61 = vpack.c.bf16 %v2521_v45, %v2520_v23  ;;  %v2522_v7 = vld [vmem:[%s7830_s4 + $0x120] sm:$0xff]  ;;  %v2532_v45 = vld [vmem:[%s7830_s4 + $0x170] sm:$0xff] }
 0xc70   :  { %5926 = vmatpush3.bf16.msra.mxu1 %v7194_v11 }
 0xc71   :  { %5927 = vmatprep.subr.bf16.mxu1 %v6312_v44 }
 0xc74   :  { %5929 = vmatpush3.bf16.msra.mxu1 %v7204_v51 }
 0xc75   :  { %5930 = vmatprep.subr.bf16.mxu1 %v6312_v44 }
 0xc78   :  { %5932 = vmatpush3.bf16.msra.mxu1 %v7214_v55 }
 0xc79   :  { %5933 = vmatprep.subr.bf16.mxu1 %v6312_v44 }
 0xc7c   :  { %5935 = vmatpush3.bf16.msra.mxu1 %v7223_v18 }
 0xc7d   :  { %5936 = vmatprep.subr.bf16.mxu1 %v6312_v44 }
 0xc80   :  { %5938 = vmatpush3.bf16.msra.mxu1 %v7233_v20 }
 0xc81   :  { %5939 = vmatprep.subr.bf16.mxu1 %v6312_v44 }
 0xc84   :  { %5941 = vmatpush3.bf16.msra.mxu1 %v7244_v26 }
 0xc87   :  { %5113 = vmatmul.mubr.f32.vlgmr.msra.gmra.mrb[26].mxu1 %v2148_v0  ;;  %v2523_v0 = vld [vmem:[%s7830_s4 + $0x128] sm:$0xff] }
 0xc88   :  { %5162 = vmatprep.mubr.f32.mxu1 %v6556_v62  ;;  %v2502_v62 = vld [vmem:[%s7830_s4 + $0x80] sm:$0xff] }
 0xd3a   :  { %v7318_v58 = vpop.f32.mrb[24].mxu1 }
 0xd3b   :  { %v5079_v46 = vpop.f32.mrb[25].mxu1 }
 0xd3c   :  { %v5982_v46 = vpack.c.bf16 %v2523_v0, %v2522_v7  ;;  %v2486_v0 = vld [vmem:[%s7830_s4] sm:$0xff] }
 0xd5a   :  { %v2215_v13 = vpop.f32.mrb[26].mxu1 }
 0xd5b   :  { %v5114_v15 = vpop.f32.mrb[27].mxu1  ;;  %5118 = vmatmul.mubr.msk.f32.vlgmr.msra.gmra.mrb[30].mxu0 %vm1905_vm7, %v2215_v13  ;;  %v2524_v13 = vld [vmem:[%s7830_s4 + $0x130] sm:$0xff] }
 0xd5c   :  { %5121 = vmatpush3.msk.msra.mxu0 %vm153_vm1, %v7271_v12  ;;  %5122 = vmatprep.mubr.msk.f32.mxu0 %vm6313_vm6, %v6314_v4  ;;  %v2503_v12 = vld [vmem:[%s7830_s4 + $0x88] sm:$0xff]  ;;  %v2525_v15 = vld [vmem:[%s7830_s4 + $0x138] sm:$0xff] }
 0xd5d   :  { %5125 = vmatprep.subr.mxu0 %v6314_v4  ;;  %v5942_v57 = vpack.c.bf16 %v2503_v12, %v2502_v62  ;;  %v2528_v12 = vld [vmem:[%s7830_s4 + $0x150] sm:$0xff] }
 0xe2e   :  { %v2288_v30 = vpop.f32.mrb[30].mxu0 }
 0xe2f   :  { %v2292_v41 = vmax.f32 %v2288_v30, 0.0  ;;  %v5119_v52 = vpop.f32.mrb[31].mxu0  ;;  %v5986_v30 = vpack.c.bf16 %v2525_v15, %v2524_v13  ;;  %v2504_v13 = vld [vmem:[%s7830_s4 + $0x90] sm:$0xff]  ;;  %v2505_v15 = vld [vmem:[%s7830_s4 + $0x98] sm:$0xff] }
 0xe30   :  { %v2527_v52 = vld [vmem:[%s7830_s4 + $0x148] sm:$0xff] }
 0xe31   :  { %5123 = vmatmul.mubr.msk.f32.vlgmr.msra.gmra.mrb[32].mxu0 %vm1980_vm8, %v2292_v41  ;;  %v2526_v41 = vld [vmem:[%s7830_s4 + $0x140] sm:$0xff] }
 0xe32   :  { %5126 = vmatpush3.msra.mxu0 %v1827_v54  ;;  %5127 = vmatprep.mubr.msk.f32.mxu0 %vm6313_vm6, %v6314_v4  ;;  %v2519_v54 = vld [vmem:[%s7830_s4 + $0x108] sm:$0xff]  ;;  %v5990_v62 = vpack.c.bf16 %v2527_v52, %v2526_v41  ;;  %v5946_v41 = vpack.c.bf16 %v2505_v15, %v2504_v13  ;;  %v2488_v52 = vld [vmem:[%s7830_s4 + $0x10] sm:$0xff] }
 0xe33   :  { %5943 = vmatprep.subr.bf16.mxu0 %v5942_v57  ;;  %v5974_v39 = vpack.c.bf16 %v2519_v54, %v2518_v8  ;;  %v2529_v57 = vld [vmem:[%s7830_s4 + $0x158] sm:$0xff]  ;;  %v2530_v54 = vld [vmem:[%s7830_s4 + $0x160] sm:$0xff] }
 0xe34   :  { %v5994_v8 = vpack.c.bf16 %v2529_v57, %v2528_v12  ;;  %v2506_v57 = vld [vmem:[%s7830_s4 + $0xa0] sm:$0xff] }
 0xe35   :  { %5975 = vmatprep.subr.bf16.mxu1 %v5974_v39 }
 0xe36   :  { %5977 = vmatpush3.bf16.msra.mxu1 %v5974_v39  ;;  %v2531_v39 = vld [vmem:[%s7830_s4 + $0x168] sm:$0xff] }
 0xe37   :  { %5979 = vmatprep.subr.bf16.mxu1 %v5978_v61  ;;  %v5998_v23 = vpack.c.bf16 %v2531_v39, %v2530_v54  ;;  %v7437_v39 = vld [vmem:[%s7827_s1] sm:$0xff] }
 0xe3a   :  { %5981 = vmatpush3.bf16.msra.mxu1 %v5978_v61  ;;  %v2533_v61 = vld [vmem:[%s7830_s4 + $0x178] sm:$0xff] }
 0xe3b   :  { %5983 = vmatprep.subr.bf16.mxu1 %v5982_v46  ;;  %v6002_v7 = vpack.c.bf16 %v2533_v61, %v2532_v45  ;;  %v2490_v45 = vld [vmem:[%s7830_s4 + $0x20] sm:$0xff]  ;;  %v2491_v61 = vld [vmem:[%s7830_s4 + $0x28] sm:$0xff] }
 0xe3e   :  { %5985 = vmatpush3.bf16.msra.mxu1 %v5982_v46  ;;  %v2487_v46 = vld [vmem:[%s7830_s4 + $0x8] sm:$0xff] }
 0xe3f   :  { %5987 = vmatprep.subr.bf16.mxu1 %v5986_v30 }
 0xe42   :  { %5989 = vmatpush3.bf16.msra.mxu1 %v5986_v30  ;;  %v5944_v30 = vpack.c.bf16 %v2487_v46, %v2486_v0  ;;  %v2510_v0 = vld [vmem:[%s7830_s4 + $0xc0] sm:$0xff]  ;;  %v2511_v46 = vld [vmem:[%s7830_s4 + $0xc8] sm:$0xff] }
 0xe43   :  { %5991 = vmatprep.subr.bf16.mxu1 %v5990_v62  ;;  %v5958_v15 = vpack.c.bf16 %v2511_v46, %v2510_v0  ;;  %v2500_v46 = vld [vmem:[%s7830_s4 + $0x70] sm:$0xff] }
 0xe46   :  { %5993 = vmatpush3.bf16.msra.mxu1 %v5990_v62  ;;  %v2489_v62 = vld [vmem:[%s7830_s4 + $0x18] sm:$0xff] }
 0xe47   :  { %5995 = vmatprep.subr.bf16.mxu1 %v5994_v8  ;;  %v5948_v54 = vpack.c.bf16 %v2489_v62, %v2488_v52  ;;  %v2512_v52 = vld [vmem:[%s7830_s4 + $0xd0] sm:$0xff]  ;;  %v2513_v62 = vld [vmem:[%s7830_s4 + $0xd8] sm:$0xff] }
 0xe4a   :  { %5997 = vmatpush3.bf16.msra.mxu1 %v5994_v8  ;;  %v2507_v8 = vld [vmem:[%s7830_s4 + $0xa8] sm:$0xff] }
 0xe4b   :  { %5999 = vmatprep.subr.bf16.mxu1 %v5998_v23 }
 0xe4e   :  { %6001 = vmatpush3.bf16.msra.mxu1 %v5998_v23  ;;  %v5950_v23 = vpack.c.bf16 %v2507_v8, %v2506_v57  ;;  %v5962_v57 = vpack.c.bf16 %v2513_v62, %v2512_v52  ;;  %v2496_v8 = vld [vmem:[%s7830_s4 + $0x50] sm:$0xff] }
 0xe4f   :  { %6003 = vmatprep.subr.bf16.mxu1 %v6002_v7 }
 0xe52   :  { %6005 = vmatpush3.bf16.msra.mxu1 %v6002_v7  ;;  %v2508_v7 = vld [vmem:[%s7830_s4 + $0xb0] sm:$0xff] }
 0xe53   :  { %6030 = vmatprep.subr.bf16.mxu1 %v6312_v44 }
 0xe55   :  { %5163 = vmatmul.mubr.msk.f32.vlgmr.msra.gmra.mrb[28].mxu1 %vm6607_vm3, %v6605_v28 }
 0xe56   :  { %5165 = vmatprep.mubr.f32.mxu1 %v6612_v31  ;;  %6032 = vmatpush3.bf16.msra.mxu1 %v6650_v43 }
 0xe57   :  { %6033 = vmatprep.subr.bf16.mxu1 %v6312_v44 }
 0xe59   :  { %5166 = vmatmul.mubr.msk.f32.gmra.mrb[30].mxu1 %vm6628_vm4, %v6626_v35 }
 0xe5a   :  { %6035 = vmatpush3.bf16.msra.mxu1 %v6658_v47  ;;  %5235 = vmatprep.mubr.msk.f32.mxu1 %vm6313_vm6, %v6314_v4 }
 0xe5b   :  { %6036 = vmatprep.subr.bf16.mxu1 %v6312_v44 }
 0xe5e   :  { %6038 = vmatpush3.bf16.msra.mxu1 %v6664_v50 }
 0xe5f   :  { %6039 = vmatprep.subr.bf16.mxu1 %v6312_v44 }
 0xe62   :  { %6041 = vmatpush3.bf16.msra.mxu1 %v6670_v53 }
 0xe63   :  { %6042 = vmatprep.subr.bf16.mxu1 %v6312_v44 }
 0xe66   :  { %6044 = vmatpush3.bf16.msra.mxu1 %v6676_v56 }
 0xe67   :  { %6045 = vmatprep.subr.bf16.mxu1 %v6312_v44 }
 0xe6a   :  { %6047 = vmatpush3.bf16.msra.mxu1 %v6682_v59 }
 0xe6b   :  { %6048 = vmatprep.subr.bf16.mxu1 %v6312_v44 }
 0xe6e   :  { %6050 = vmatpush3.bf16.msra.mxu1 %v6688_v63 }
 0xe6f   :  { %6051 = vmatprep.subr.bf16.mxu1 %v6312_v44 }
 0xe72   :  { %6053 = vmatpush3.bf16.msra.mxu1 %v6694_v2 }
 0xe73   :  { %6078 = vmatprep.subr.bf16.mxu1 %v6312_v44 }
 0xf04   :  { %v2362_v28 = vpop.f32.mrb[32].mxu0 }
 0xf05   :  { %v3927_v29 = vmul.f32 -1.442695, %v2362_v28  ;;  %v5124_v31 = vpop.f32.mrb[33].mxu0  ;;  %v2509_v28 = vld [vmem:[%s7830_s4 + $0xb8] sm:$0xff] }
 0xf06   :  { %v5954_v31 = vpack.c.bf16 %v2509_v28, %v2508_v7  ;;  %v2498_v28 = vld [vmem:[%s7830_s4 + $0x60] sm:$0xff] }
 0xf07   :  { %6222 = vpow2.f32 %v3927_v29  ;;  %v5952_v29 = vpack.c.bf16 %v2491_v61, %v2490_v45  ;;  %v2515_v45 = vld [vmem:[%s7830_s4 + $0xe8] sm:$0xff] }
 0xf11   :  { %v6223_v35 = vpop.eup %6222 }
 0xf12   :  { %v2369_v36 = vadd.f32 1.0, %v6223_v35  ;;  %v2492_v35 = vld [vmem:[%s7830_s4 + $0x30] sm:$0xff] }
 0xf14   :  { %6224 = vrcp.f32 %v2369_v36  ;;  %v2493_v36 = vld [vmem:[%s7830_s4 + $0x38] sm:$0xff] }
 0xf15   :  { %v5956_v13 = vpack.c.bf16 %v2493_v36, %v2492_v35  ;;  %v2517_v35 = vld [vmem:[%s7830_s4 + $0xf8] sm:$0xff] }
 0xf1e   :  { %v6225_v12 = vpop.eup %6224 }
 0xf1f   :  { %5128 = vmatmul.mubr.msk.f32.vlgmr.msra.gmra.mrb[34].mxu0 %vm1905_vm7, %v6225_v12 }
 0xf20   :  { %5945 = vmatpush3.bf16.msra.mxu0 %v5944_v30  ;;  %2598 = vmatprep.mubr.f32.mxu0 %v7437_v39  ;;  %v2494_v30 = vld [vmem:[%s7830_s4 + $0x40] sm:$0xff] }
 0xf21   :  { %5947 = vmatprep.subr.bf16.mxu0 %v5946_v41  ;;  %v2495_v41 = vld [vmem:[%s7830_s4 + $0x48] sm:$0xff] }
 0xf22   :  { %v5960_v12 = vpack.c.bf16 %v2495_v41, %v2494_v30  ;;  %v7513_v30 = vld [vmem:[%s7827_s1 + $0x8] sm:$0xff]  ;;  %v7522_v41 = vld [vmem:[%s7827_s1 + $0x10] sm:$0xff] }
 0xf24   :  { %5949 = vmatpush3.bf16.msra.mxu0 %v5948_v54  ;;  %v2497_v54 = vld [vmem:[%s7830_s4 + $0x58] sm:$0xff] }
 0xf25   :  { %5951 = vmatprep.subr.bf16.mxu0 %v5950_v23  ;;  %v2514_v23 = vld [vmem:[%s7830_s4 + $0xe0] sm:$0xff]  ;;  %v5964_v61 = vpack.c.bf16 %v2497_v54, %v2496_v8 }
 0xf26   :  { %v5966_v7 = vpack.c.bf16 %v2515_v45, %v2514_v23 }
 0xf28   :  { %5953 = vmatpush3.bf16.msra.mxu0 %v5952_v29  ;;  %v2499_v29 = vld [vmem:[%s7830_s4 + $0x68] sm:$0xff]  ;;  %v5164_v25 = vpop.f32.mrb[28].mxu1 }
 0xf29   :  { %5955 = vmatprep.subr.bf16.mxu0 %v5954_v31  ;;  %v2516_v31 = vld [vmem:[%s7830_s4 + $0xf0] sm:$0xff]  ;;  %v5968_v36 = vpack.c.bf16 %v2499_v29, %v2498_v28 }
 0xf2a   :  { %v5970_v0 = vpack.c.bf16 %v2517_v35, %v2516_v31 }
 0xf2c   :  { %5957 = vmatpush3.bf16.msra.mxu0 %v5956_v13  ;;  %v2501_v13 = vld [vmem:[%s7830_s4 + $0x78] sm:$0xff] }
 0xf2d   :  { %5959 = vmatprep.subr.bf16.mxu0 %v5958_v15  ;;  %v5972_v15 = vpack.c.bf16 %v2501_v13, %v2500_v46 }
 0xf30   :  { %5961 = vmatpush3.bf16.msra.mxu0 %v5960_v12 }
 0xf31   :  { %5963 = vmatprep.subr.bf16.mxu0 %v5962_v57 }
 0xf34   :  { %5965 = vmatpush3.bf16.msra.mxu0 %v5964_v61 }
 0xf35   :  { %5967 = vmatprep.subr.bf16.mxu0 %v5966_v7 }
 0xf38   :  { %5969 = vmatpush3.bf16.msra.mxu0 %v5968_v36 }
 0xf39   :  { %5971 = vmatprep.subr.bf16.mxu0 %v5970_v0 }
 0xf3c   :  { %5973 = vmatpush3.bf16.msra.mxu0 %v5972_v15 }
 0xf3d   :  { %6006 = vmatprep.subr.bf16.mxu0 %v6312_v44 }
 0xf3f   :  { %3929 = vmatmul.mubr.msk.f32.vlgmr.msra.gmra.mrb[36].mxu0 %vm6598_vm2, %v6596_v24  ;;  %v7533_v24 = vld [vmem:[%s7827_s1 + $0x18] sm:$0xff]  ;;  %s3884_s1 = sld [smem:[#allocation2]] }
 0xf40   :  { %2603 = vmatprep.mubr.f32.mxu0 %v7513_v30  ;;  %6008 = vmatpush3.bf16.msra.mxu0 %v6650_v43 }
 0xf41   :  { %6009 = vmatprep.subr.bf16.mxu0 %v6312_v44 }
 0xf43   :  { %2604 = vmatmul.mubr.f32.gmra.mrb[38].mxu0 %v6622_v32  ;;  %v2685_v32 = vpop.f32.mrb[29].mxu1 }
 0xf44   :  { %2608 = vmatprep.mubr.f32.mxu0 %v7522_v41  ;;  %6011 = vmatpush3.bf16.msra.mxu0 %v6658_v47 }
 0xf45   :  { %6012 = vmatprep.subr.bf16.mxu0 %v6312_v44 }
 0xf47   :  { %3930 = vmatmul.mubr.msk.f32.gmra.mrb[40].mxu0 %vm6636_vm5, %v6634_v37  ;;  %v5167_v37 = vpop.f32.mrb[30].mxu1 }
 0xf48   :  { %2613 = vmatprep.mubr.f32.mxu0 %v7533_v24  ;;  %6014 = vmatpush3.bf16.msra.mxu0 %v6664_v50  ;;  %v2695_v38 = vpop.f32.mrb[31].mxu1 }
 0xf49   :  { %6015 = vmatprep.subr.bf16.mxu0 %v6312_v44 }
 0xf4b   :  { %2614 = vmatmul.mubr.f32.gmra.mrb[42].mxu0 %v6647_v40  ;;  %v2139_v40 = vrot.slane %v7318_v58, %v6707_v48 }
 0xf4c   :  { %6017 = vmatpush3.bf16.msra.mxu0 %v6670_v53  ;;  %5200 = vmatprep.mubr.msk.f32.mxu0 %vm6313_vm6, %v6314_v4 }
 0xf4d   :  { %6018 = vmatprep.subr.bf16.mxu0 %v6312_v44  ;;  %v2140_v43 = vmul.f32 %v2139_v40, %v7258_v10  ;;  %v2141_v47 = vmul.f32 %v2139_v40, %v7261_v5 }
 0xf4f   :  { %v2451_v50 = vadd.f32 %v7437_v39, %v2140_v43  ;;  %v2452_v53 = vadd.f32 %v7513_v30, %v2141_v47 }
 0xf50   :  { %6020 = vmatpush3.bf16.msra.mxu0 %v6676_v56 }
 0xf51   :  { %6021 = vmatprep.subr.bf16.mxu0 %v6312_v44  ;;  %v7557_v56 = vmax.f32 %v2451_v50, 0.0 }
 0xf53   :  { %vm2459_vm9 = vcmp.ne.f32.partialorder %v7557_v56, %v7557_v56 }
 0xf54   :  { %6023 = vmatpush3.bf16.msra.mxu0 %v6682_v59  ;;  %v7559_v59 = vmax.f32 %v2452_v53, 0.0  ;;  %v2463_v12 = vsel %vm2459_vm9, 1.0, %v6314_v4 }
 0xf55   :  { %6024 = vmatprep.subr.bf16.mxu0 %v6312_v44 }
 0xf56   :  { %vm2460_vm10 = vcmp.ne.f32.partialorder %v7559_v59, %v7559_v59 }
 0xf57   :  { %v2464_v57 = vsel %vm2460_vm10, 1.0, %v6314_v4 }
 0xf58   :  { %6026 = vmatpush3.bf16.msra.mxu0 %v6688_v63  ;;  %v2467_v23 = vadd.f32 %v2464_v57, %v2463_v12 }
 0xf59   :  { %6027 = vmatprep.subr.bf16.mxu0 %v6312_v44 }
 0xf5c   :  { %6029 = vmatpush3.bf16.msra.mxu0 %v6694_v2 }
 0xf5d   :  { %6054 = vmatprep.subr.bf16.mxu0 %v6312_v44 }
 0xff2   :  { %v2441_v63 = vpop.f32.mrb[34].mxu0 }
 0xff3   :  { %v2448_v2 = vrot.slane %v2441_v63, %v6707_v48  ;;  %v5129_v52 = vpop.f32.mrb[35].mxu0 }
 0xff5   :  { %v2449_v10 = vmul.f32 %v2448_v2, %v7297_v21  ;;  %v2450_v5 = vmul.f32 %v2448_v2, %v7300_v33 }
 0xff7   :  { %v2453_v58 = vadd.f32 %v7522_v41, %v2449_v10  ;;  %v2454_v62 = vadd.f32 %v7533_v24, %v2450_v5 }
 0xff9   :  { %v7572_v8 = vmax.f32 %v2453_v58, 0.0  ;;  %v7574_v54 = vmax.f32 %v2454_v62, 0.0 }
 0xffb   :  { %vm2461_vm11 = vcmp.ne.f32.partialorder %v7572_v8, %v7572_v8  ;;  %vm2462_vm12 = vcmp.ne.f32.partialorder %v7574_v54, %v7574_v54 }
 0xffc   :  { %v2465_v21 = vsel %vm2461_vm11, 1.0, %v6314_v4  ;;  %v2466_v45 = vsel %vm2462_vm12, 1.0, %v6314_v4 }
 0xffd   :  { %v2468_v33 = vadd.f32 %v2467_v23, %v2465_v21 }
 0xfff   :  { %v2469_v61 = vadd.f32 %v2468_v33, %v2466_v45 }
0x1001   :  { %v2470_v7 = vrot.slane %v2469_v61, 4 }
0x1003   :  { %v2471_v28 = vadd.f32 %v2470_v7, %v2469_v61 }
0x1005   :  { %v2472_v29 = vrot.slane %v2471_v28, 2 }
0x1007   :  { %v2473_v31 = vadd.f32 %v2472_v29, %v2471_v28 }
0x1009   :  { %v2474_v35 = vrot.slane %v2473_v31, 1 }
0x100b   :  { %v2475_v36 = vadd.f32 %v2474_v35, %v2473_v31 }
0x100d   :  { %2476 = vadd.xlane.f32.xlu0 %v2475_v36 }
0x1012   :  { %v4354_v0 = vpop.f32.mrb[36].mxu0 }
0x1013   :  { %v4355_v46 = vpop.f32.mrb[37].mxu0 }
0x1014   :  { %v4356_v13 = vadd.f32 %v4355_v46, %v4354_v0 }
0x1016   :  { %v2686_v15 = vadd.f32 %v4356_v13, %v2685_v32  ;;  %v4357_v40 = vpop.f32.mrb[38].mxu0 }
0x1017   :  { %v4358_v43 = vpop.f32.mrb[39].mxu0 }
0x1018   :  { %v4359_v47 = vadd.f32 %v4358_v43, %v4357_v40 }
0x101a   :  { %v2691_v50 = vadd.f32 %v5164_v25, %v4359_v47  ;;  %v4360_v53 = vpop.f32.mrb[40].mxu0 }
0x101b   :  { %v4361_v63 = vpop.f32.mrb[41].mxu0 }
0x101c   :  { %v4362_v2 = vadd.f32 %v4361_v63, %v4360_v53  ;;  %v2704_v58 = vadd.f32 %v2691_v50, %v2686_v15 }
0x101e   :  { %v2696_v52 = vadd.f32 %v4362_v2, %v2695_v38  ;;  %v4363_v10 = vpop.f32.mrb[42].mxu0 }
0x101f   :  { %v4364_v5 = vpop.f32.mrb[43].mxu0 }
0x1020   :  { %v4365_v62 = vadd.f32 %v4364_v5, %v4363_v10  ;;  %v2705_v12 = vadd.f32 %v2704_v58, %v2696_v52 }
0x1022   :  { %v2701_v57 = vadd.f32 %v5167_v37, %v4365_v62  ;;  %v7602_v37 = vstv %s3884_s1 }
0x1024   :  { %v2706_v23 = vadd.f32 %v2705_v12, %v2701_v57 }
0x1026   :  { %v2707_v21 = vrot.slane %v2706_v23, 4 }
0x1028   :  { %v2708_v33 = vadd.f32 %v2707_v21, %v2706_v23 }
0x102a   :  { %v2709_v45 = vrot.slane %v2708_v33, 2 }
0x102c   :  { %v2710_v61 = vadd.f32 %v2709_v45, %v2708_v33 }
0x102e   :  { %v2711_v32 = vrot.slane %v2710_v61, 1 }
0x1030   :  { %v2712_v7 = vadd.f32 %v2711_v32, %v2710_v61 }
0x1032   :  { %5201 = vmatmul.mubr.f32.vlgmr.msra.gmra.mrb[44].mxu0 %v2712_v7 }
0x1033   :  { %6056 = vmatpush3.bf16.msra.mxu0 %v6728_v16  ;;  %5270 = vmatprep.mubr.msk.f32.mxu0 %vm6313_vm6, %v6314_v4 }
0x1034   :  { %6057 = vmatprep.subr.bf16.mxu0 %v6312_v44 }
0x1037   :  { %6059 = vmatpush3.bf16.msra.mxu0 %v6734_v19 }
0x1038   :  { %6060 = vmatprep.subr.bf16.mxu0 %v6312_v44 }
0x103b   :  { %6062 = vmatpush3.bf16.msra.mxu0 %v6740_v22 }
0x103c   :  { %6063 = vmatprep.subr.bf16.mxu0 %v6312_v44 }
0x103f   :  { %6065 = vmatpush3.bf16.msra.mxu0 %v6746_v27 }
0x1040   :  { %6066 = vmatprep.subr.bf16.mxu0 %v6312_v44 }
0x1043   :  { %6068 = vmatpush3.bf16.msra.mxu0 %v6749_v34 }
0x1044   :  { %6069 = vmatprep.subr.bf16.mxu0 %v6312_v44 }
0x1047   :  { %6071 = vmatpush3.bf16.msra.mxu0 %v6755_v42 }
0x1048   :  { %6072 = vmatprep.subr.bf16.mxu0 %v6312_v44 }
0x104b   :  { %6074 = vmatpush3.bf16.msra.mxu0 %v6761_v49 }
0x104c   :  { %6075 = vmatprep.subr.bf16.mxu0 %v6312_v44 }
0x104f   :  { %6077 = vmatpush3.bf16.msra.mxu0 %v6767_v60 }
0x1050   :  { %6102 = vmatprep.subr.bf16.mxu0 %v6312_v44 }
0x109a   :  { %v7600_v25 = vpop.xlane.xlu0 %2476 }
0x109b   :  { %vm2478_vm13 = vcmp.gt.f32.partialorder %v7600_v25, 0.0 }
0x109c   :  { %v2483_v38 = vsel %vm2478_vm13, %v7522_v41, %v7572_v8  ;;  %v2484_v28 = vsel %vm2478_vm13, %v7533_v24, %v7574_v54 }
0x109d   :  { %v7614_v29 = vmul.f32 %v7602_v37, %v2483_v38  ;;  %v7617_v31 = vmul.f32 %v7602_v37, %v2484_v28 }
0x1105   :  { %v2779_v35 = vpop.f32.mrb[44].mxu0 }
0x1106   :  { %v2786_v36 = vrot.slane %v2779_v35, %v6707_v48  ;;  %v5202_v0 = vpop.f32.mrb[45].mxu0 }
0x1108   :  { %v2787_v46 = vsub.f32 %v2686_v15, %v2786_v36  ;;  %v2788_v13 = vsub.f32 %v2691_v50, %v2786_v36  ;;  %v2789_v40 = vsub.f32 %v2696_v52, %v2786_v36  ;;  %v2790_v43 = vsub.f32 %v2701_v57, %v2786_v36  ;;  %v7641_v57 = vld [vmem:[%s7832_s6] sm:$0xf] }
0x1109   :  { %v2886_v61 = vrot.slane %v7641_v57, %v6707_v48  ;;  %v2894_v38 = vrot.slane %v7641_v57, %v634_v6 }
0x110a   :  { %v2791_v8 = vmul.f32 %v2787_v46, %v2787_v46  ;;  %v2792_v47 = vmul.f32 %v2788_v13, %v2788_v13  ;;  %v2793_v53 = vmul.f32 %v2789_v40, %v2789_v40  ;;  %v2794_v2 = vmul.f32 %v2790_v43, %v2790_v43 }
0x110c   :  { %v2795_v63 = vadd.f32 %v2792_v47, %v2791_v8 }
0x110e   :  { %v2796_v54 = vadd.f32 %v2795_v63, %v2793_v53 }
0x1110   :  { %v2797_v10 = vadd.f32 %v2796_v54, %v2794_v2 }
0x1112   :  { %v2798_v5 = vrot.slane %v2797_v10, 4 }
0x1114   :  { %v2799_v58 = vadd.f32 %v2798_v5, %v2797_v10 }
0x1116   :  { %v2800_v62 = vrot.slane %v2799_v58, 2 }
0x1118   :  { %v2801_v12 = vadd.f32 %v2800_v62, %v2799_v58 }
0x111a   :  { %v2802_v23 = vrot.slane %v2801_v12, 1 }
0x111c   :  { %v2803_v21 = vadd.f32 %v2802_v23, %v2801_v12 }
0x111e   :  { %5236 = vmatmul.mubr.f32.vlgmr.msra.gmra.mrb[32].mxu1 %v2803_v21 }
0x111f   :  { %6080 = vmatpush3.bf16.msra.mxu1 %v6728_v16  ;;  %5305 = vmatprep.mubr.msk.f32.mxu1 %vm6313_vm6, %v6314_v4 }
0x1120   :  { %6081 = vmatprep.subr.bf16.mxu1 %v6312_v44 }
0x1123   :  { %6083 = vmatpush3.bf16.msra.mxu1 %v6734_v19 }
0x1124   :  { %6084 = vmatprep.subr.bf16.mxu1 %v6312_v44 }
0x1127   :  { %6086 = vmatpush3.bf16.msra.mxu1 %v6740_v22 }
0x1128   :  { %6087 = vmatprep.subr.bf16.mxu1 %v6312_v44 }
0x112b   :  { %6089 = vmatpush3.bf16.msra.mxu1 %v6746_v27 }
0x112c   :  { %6090 = vmatprep.subr.bf16.mxu1 %v6312_v44 }
0x112f   :  { %6092 = vmatpush3.bf16.msra.mxu1 %v6749_v34 }
0x1130   :  { %6093 = vmatprep.subr.bf16.mxu1 %v6312_v44 }
0x1133   :  { %6095 = vmatpush3.bf16.msra.mxu1 %v6755_v42 }
0x1134   :  { %6096 = vmatprep.subr.bf16.mxu1 %v6312_v44 }
0x1137   :  { %6098 = vmatpush3.bf16.msra.mxu1 %v6761_v49 }
0x1138   :  { %6099 = vmatprep.subr.bf16.mxu1 %v6312_v44 }
0x113b   :  { %6101 = vmatpush3.bf16.msra.mxu1 %v6767_v60 }
0x113c   :  { %6126 = vmatprep.subr.bf16.mxu1 %v6312_v44 }
0x11f1   :  { %v2870_v15 = vpop.f32.mrb[32].mxu1 }
0x11f2   :  { %v2871_v50 = vadd.f32 1e-05, %v2870_v15  ;;  %v5237_v52 = vpop.f32.mrb[33].mxu1 }
0x11f4   :  { %6226 = vrsqrt.f32 %v2871_v50 }
0x11fe   :  { %v6227_v33 = vpop.eup %6226 }
0x11ff   :  { %v2878_v45 = vrot.slane %v6227_v33, %v6707_v48 }
0x1201   :  { %v2879_v32 = vmul.f32 %v2878_v45, %v2787_v46  ;;  %v2880_v7 = vmul.f32 %v2878_v45, %v2788_v13  ;;  %v2881_v54 = vmul.f32 %v2878_v45, %v2789_v40  ;;  %v2882_v10 = vmul.f32 %v2878_v45, %v2790_v43 }
0x1203   :  { %v2887_v28 = vmul.f32 %v2886_v61, %v2879_v32  ;;  %v2888_v35 = vmul.f32 %v2886_v61, %v2880_v7  ;;  %v2889_v62 = vmul.f32 %v2886_v61, %v2881_v54  ;;  %v2890_v46 = vmul.f32 %v2886_v61, %v2882_v10 }
0x1205   :  { %v2895_v36 = vadd.f32 %v2894_v38, %v2887_v28  ;;  %v2896_v0 = vadd.f32 %v2894_v38, %v2888_v35  ;;  %v7653_v6 = vadd.f32 %v2894_v38, %v2889_v62  ;;  %v7655_v13 = vadd.f32 %v2894_v38, %v2890_v46 }
0x1207   :  { %v2899_v8 = vadd.f32 %v2896_v0, %v2895_v36  ;;  %v3068_v40 = vadd.f32 %v7655_v13, %v7653_v6 }
0x1209   :  { %v2900_v47 = vrot.slane %v2899_v8, 4  ;;  %v3069_v43 = vrot.slane %v3068_v40, 4 }
0x120b   :  { %v2901_v53 = vadd.f32 %v2900_v47, %v2899_v8  ;;  %v3070_v12 = vadd.f32 %v3069_v43, %v3068_v40 }
0x120d   :  { %v2902_v63 = vrot.slane %v2901_v53, 2  ;;  %v3071_v23 = vrot.slane %v3070_v12, 2 }
0x120f   :  { %v2903_v2 = vadd.f32 %v2902_v63, %v2901_v53  ;;  %v3072_v21 = vadd.f32 %v3071_v23, %v3070_v12  ;;  %v3240_v12 = vrot.slane %v7641_v57, %v1449_v1 }
0x1211   :  { %v2904_v5 = vrot.slane %v2903_v2, 1  ;;  %v3073_v15 = vrot.slane %v3072_v21, 1 }
0x1213   :  { %v2905_v58 = vadd.f32 %v2904_v5, %v2903_v2  ;;  %v3074_v50 = vadd.f32 %v3073_v15, %v3072_v21  ;;  %v3248_v15 = vrot.slane %v7641_v57, %v1457_v14 }
0x1215   :  { %5271 = vmatmul.mubr.f32.vlgmr.msra.gmra.mrb[46].mxu0 %v2905_v58 }
0x1216   :  { %6104 = vmatpush3.bf16.msra.mxu0 %v6728_v16  ;;  %5340 = vmatprep.mubr.msk.f32.mxu0 %vm6313_vm6, %v6314_v4 }
0x1217   :  { %6105 = vmatprep.subr.bf16.mxu0 %v6312_v44 }
0x121a   :  { %6107 = vmatpush3.bf16.msra.mxu0 %v6734_v19 }
0x121b   :  { %6108 = vmatprep.subr.bf16.mxu0 %v6312_v44 }
0x121e   :  { %6110 = vmatpush3.bf16.msra.mxu0 %v6740_v22 }
0x121f   :  { %6111 = vmatprep.subr.bf16.mxu0 %v6312_v44 }
0x1222   :  { %6113 = vmatpush3.bf16.msra.mxu0 %v6746_v27 }
0x1223   :  { %6114 = vmatprep.subr.bf16.mxu0 %v6312_v44 }
0x1226   :  { %6116 = vmatpush3.bf16.msra.mxu0 %v6749_v34 }
0x1227   :  { %6117 = vmatprep.subr.bf16.mxu0 %v6312_v44 }
0x122a   :  { %6119 = vmatpush3.bf16.msra.mxu0 %v6755_v42 }
0x122b   :  { %6120 = vmatprep.subr.bf16.mxu0 %v6312_v44 }
0x122e   :  { %6122 = vmatpush3.bf16.msra.mxu0 %v6761_v49 }
0x122f   :  { %6123 = vmatprep.subr.bf16.mxu0 %v6312_v44 }
0x1232   :  { %6125 = vmatpush3.bf16.msra.mxu0 %v6767_v60 }
0x1233   :  { %6150 = vmatprep.subr.bf16.mxu0 %v6312_v44 }
0x1235   :  { %5341 = vmatmul.mubr.f32.vlgmr.msra.gmra.mrb[48].mxu0 %v3074_v50 }
0x1236   :  { %6152 = vmatpush3.bf16.msra.mxu0 %v7174_v17  ;;  %5410 = vmatprep.mubr.msk.f32.mxu0 %vm6313_vm6, %v6314_v4 }
0x1237   :  { %6153 = vmatprep.subr.bf16.mxu0 %v6312_v44 }
0x123a   :  { %6155 = vmatpush3.bf16.msra.mxu0 %v7184_v9 }
0x123b   :  { %6156 = vmatprep.subr.bf16.mxu0 %v6312_v44 }
0x123e   :  { %6158 = vmatpush3.bf16.msra.mxu0 %v7194_v11 }
0x123f   :  { %6159 = vmatprep.subr.bf16.mxu0 %v6312_v44 }
0x1242   :  { %6161 = vmatpush3.bf16.msra.mxu0 %v7204_v51 }
0x1243   :  { %6162 = vmatprep.subr.bf16.mxu0 %v6312_v44 }
0x1246   :  { %6164 = vmatpush3.bf16.msra.mxu0 %v7214_v55 }
0x1247   :  { %6165 = vmatprep.subr.bf16.mxu0 %v6312_v44 }
0x124a   :  { %6167 = vmatpush3.bf16.msra.mxu0 %v7223_v18 }
0x124b   :  { %6168 = vmatprep.subr.bf16.mxu0 %v6312_v44 }
0x124e   :  { %6170 = vmatpush3.bf16.msra.mxu0 %v7233_v20 }
0x124f   :  { %6171 = vmatprep.subr.bf16.mxu0 %v6312_v44 }
0x1252   :  { %6173 = vmatpush3.bf16.msra.mxu0 %v7244_v26 }
0x1253   :  { %5463 = vmatprep.subr.mxu0 %v6314_v4 }
0x12e8   :  { %v2972_v52 = vpop.f32.mrb[46].mxu0 }
0x12e9   :  { %v2979_v33 = vrot.slane %v2972_v52, %v6707_v48  ;;  %v5272_v45 = vpop.f32.mrb[47].mxu0 }
0x12eb   :  { %v2980_v61 = vsub.f32 %v2895_v36, %v2979_v33  ;;  %v2981_v32 = vsub.f32 %v2896_v0, %v2979_v33 }
0x12ed   :  { %v2982_v7 = vmul.f32 %v2980_v61, %v2980_v61  ;;  %v2983_v38 = vmul.f32 %v2981_v32, %v2981_v32 }
0x12ef   :  { %v2984_v28 = vadd.f32 %v2983_v38, %v2982_v7 }
0x12f1   :  { %v2985_v35 = vrot.slane %v2984_v28, 4 }
0x12f3   :  { %v2986_v8 = vadd.f32 %v2985_v35, %v2984_v28 }
0x12f5   :  { %v2987_v47 = vrot.slane %v2986_v8, 2 }
0x12f7   :  { %v2988_v53 = vadd.f32 %v2987_v47, %v2986_v8 }
0x12f9   :  { %v2989_v63 = vrot.slane %v2988_v53, 1 }
0x12fb   :  { %v2990_v2 = vadd.f32 %v2989_v63, %v2988_v53 }
0x12fd   :  { %5306 = vmatmul.mubr.f32.vlgmr.msra.gmra.mrb[34].mxu1 %v2990_v2 }
0x12fe   :  { %6128 = vmatpush3.bf16.msra.mxu1 %v6728_v16  ;;  %5375 = vmatprep.mubr.msk.f32.mxu1 %vm6313_vm6, %v6314_v4 }
0x12ff   :  { %6129 = vmatprep.subr.bf16.mxu1 %v6312_v44 }
0x1302   :  { %6131 = vmatpush3.bf16.msra.mxu1 %v6734_v19 }
0x1303   :  { %6132 = vmatprep.subr.bf16.mxu1 %v6312_v44 }
0x1306   :  { %6134 = vmatpush3.bf16.msra.mxu1 %v6740_v22 }
0x1307   :  { %6135 = vmatprep.subr.bf16.mxu1 %v6312_v44 }
0x1308   :  { %v3141_v36 = vpop.f32.mrb[48].mxu0 }
0x1309   :  { %v3148_v0 = vrot.slane %v3141_v36, %v6707_v48  ;;  %v5342_v54 = vpop.f32.mrb[49].mxu0 }
0x130a   :  { %6137 = vmatpush3.bf16.msra.mxu1 %v6746_v27 }
0x130b   :  { %v3149_v16 = vsub.f32 %v7653_v6, %v3148_v0  ;;  %v3150_v10 = vsub.f32 %v7655_v13, %v3148_v0  ;;  %6138 = vmatprep.subr.bf16.mxu1 %v6312_v44 }
0x130d   :  { %v3151_v5 = vmul.f32 %v3149_v16, %v3149_v16  ;;  %v3152_v19 = vmul.f32 %v3150_v10, %v3150_v10 }
0x130e   :  { %6140 = vmatpush3.bf16.msra.mxu1 %v6749_v34  ;;  %v3253_v34 = vld [vmem:[%s7835_s9] sm:$0xff] }
0x130f   :  { %v3153_v58 = vadd.f32 %v3152_v19, %v3151_v5  ;;  %6141 = vmatprep.subr.bf16.mxu1 %v6312_v44  ;;  %v7743_v5 = vld [vmem:[%s7836_s10] sm:$0x1] }
0x1311   :  { %v3154_v22 = vrot.slane %v3153_v58, 4 }
0x1312   :  { %6143 = vmatpush3.bf16.msra.mxu1 %v6755_v42 }
0x1313   :  { %v3155_v62 = vadd.f32 %v3154_v22, %v3153_v58  ;;  %6144 = vmatprep.subr.bf16.mxu1 %v6312_v44 }
0x1315   :  { %v3156_v27 = vrot.slane %v3155_v62, 2 }
0x1316   :  { %6146 = vmatpush3.bf16.msra.mxu1 %v6761_v49 }
0x1317   :  { %6147 = vmatprep.subr.bf16.mxu1 %v6312_v44  ;;  %v3157_v46 = vadd.f32 %v3156_v27, %v3155_v62  ;;  %v7755_v62 = vld [vmem:[%s7840_s14] sm:$0xff]  ;;  %s3943_s14 = sld [smem:[#allocation2 + $0x1]] }
0x1319   :  { %v3158_v6 = vrot.slane %v3157_v46, 1 }
0x131a   :  { %6149 = vmatpush3.bf16.msra.mxu1 %v6767_v60 }
0x131b   :  { %v3159_v13 = vadd.f32 %v3158_v6, %v3157_v46  ;;  %5413 = vmatprep.subr.mxu1 %v6314_v4 }
0x131d   :  { %5376 = vmatmul.mubr.f32.vlgmr.msra.gmra.mrb[36].mxu1 %v3159_v13 }
0x131e   :  { %5415 = vmatprep.mubr.msk.f32.mxu1 %vm6313_vm6, %v6314_v4  ;;  %5414 = vmatpush3.msra.mxu1 %v3253_v34 }
0x131f   :  { %5418 = vmatprep.subr.mxu1 %v6314_v4 }
0x13d0   :  { %v3057_v42 = vpop.f32.mrb[34].mxu1 }
0x13d1   :  { %v3058_v49 = vadd.f32 1e-05, %v3057_v42  ;;  %v5307_v40 = vpop.f32.mrb[35].mxu1 }
0x13d3   :  { %6228 = vrsqrt.f32 %v3058_v49 }
0x13dd   :  { %v6229_v43 = vpop.eup %6228 }
0x13de   :  { %v3065_v60 = vrot.slane %v6229_v43, %v6707_v48 }
0x13e0   :  { %v3066_v23 = vmul.f32 %v3065_v60, %v2980_v61  ;;  %v3067_v21 = vmul.f32 %v3065_v60, %v2981_v32 }
0x13e2   :  { %v3241_v50 = vmul.f32 %v3240_v12, %v3066_v23  ;;  %v3242_v52 = vmul.f32 %v3240_v12, %v3067_v21 }
0x13e4   :  { %v7726_v33 = vadd.f32 %v3248_v15, %v3241_v50  ;;  %v7728_v45 = vadd.f32 %v3248_v15, %v3242_v52 }
0x13e6   :  { %v3255_v7 = vadd.f32 %v7728_v45, %v7726_v33 }
0x13e8   :  { %v3256_v38 = vrot.slane %v3255_v7, 4 }
0x13ea   :  { %v3257_v28 = vadd.f32 %v3256_v38, %v3255_v7 }
0x13ec   :  { %v3258_v35 = vrot.slane %v3257_v28, 2 }
0x13ee   :  { %v3259_v8 = vadd.f32 %v3258_v35, %v3257_v28 }
0x13f0   :  { %v3226_v1 = vpop.f32.mrb[36].mxu1  ;;  %v3260_v61 = vrot.slane %v3259_v8, 1 }
0x13f1   :  { %v3227_v32 = vadd.f32 1e-05, %v3226_v1  ;;  %v5377_v47 = vpop.f32.mrb[37].mxu1 }
0x13f2   :  { %v3261_v3 = vadd.f32 %v3260_v61, %v3259_v8 }
0x13f3   :  { %6230 = vrsqrt.f32 %v3227_v32 }
0x13f4   :  { %5411 = vmatmul.mubr.f32.vlgmr.msra.gmra.mrb[50].mxu0 %v3261_v3 }
0x13f5   :  { %5464 = vmatpush3.msra.mxu0 %v3253_v34  ;;  %5465 = vmatprep.mubr.msk.f32.mxu0 %vm6313_vm6, %v6314_v4 }
0x13f6   :  { %5468 = vmatprep.subr.mxu0 %v6314_v4 }
0x13fd   :  { %v6231_v14 = vpop.eup %6230 }
0x13fe   :  { %v3234_v57 = vrot.slane %v6231_v14, %v6707_v48 }
0x1400   :  { %v3235_v53 = vmul.f32 %v3234_v57, %v3149_v16  ;;  %v3236_v63 = vmul.f32 %v3234_v57, %v3150_v10 }
0x1402   :  { %v3243_v2 = vmul.f32 %v3240_v12, %v3235_v53  ;;  %v3244_v36 = vmul.f32 %v3240_v12, %v3236_v63 }
0x1404   :  { %v7736_v0 = vadd.f32 %v3248_v15, %v3243_v2  ;;  %v7738_v54 = vadd.f32 %v3248_v15, %v3244_v36  ;;  %v3891_v15 = vstv %s3943_s14 }
0x1406   :  { %v3567_v49 = vadd.f32 %v7738_v54, %v7736_v0 }
0x1408   :  { %v3568_v40 = vrot.slane %v3567_v49, 4 }
0x14c7   :  { %v3328_v19 = vpop.f32.mrb[50].mxu0 }
0x14c8   :  { %v5412_v58 = vpop.f32.mrb[51].mxu0  ;;  %5416 = vmatmul.mubr.msk.f32.vlgmr.msra.gmra.mrb[38].mxu1 %vm1905_vm7, %v3328_v19 }
0x14c9   :  { %5419 = vmatpush3.msk.msra.mxu1 %vm153_vm1, %v7743_v5  ;;  %5420 = vmatprep.mubr.msk.f32.mxu1 %vm6313_vm6, %v6314_v4 }
0x14ca   :  { %5423 = vmatprep.subr.mxu1 %v6314_v4 }
0x159b   :  { %v3401_v16 = vpop.f32.mrb[38].mxu1 }
0x159c   :  { %v3405_v10 = vmax.f32 %v3401_v16, 0.0  ;;  %v5417_v22 = vpop.f32.mrb[39].mxu1 }
0x159e   :  { %5421 = vmatmul.mubr.msk.f32.vlgmr.msra.gmra.mrb[40].mxu1 %vm1980_vm8, %v3405_v10 }
0x159f   :  { %5424 = vmatpush3.msra.mxu1 %v7755_v62  ;;  %5425 = vmatprep.mubr.msk.f32.mxu1 %vm6313_vm6, %v6314_v4 }
0x15a0   :  { %6174 = vmatprep.subr.bf16.mxu1 %v6312_v44 }
0x1671   :  { %v3478_v27 = vpop.f32.mrb[40].mxu1 }
0x1672   :  { %v3936_v46 = vmul.f32 -1.442695, %v3478_v27  ;;  %v5422_v6 = vpop.f32.mrb[41].mxu1 }
0x1674   :  { %6232 = vpow2.f32 %v3936_v46 }
0x167e   :  { %v6233_v13 = vpop.eup %6232 }
0x167f   :  { %v3485_v34 = vadd.f32 1.0, %v6233_v13 }
0x1681   :  { %6234 = vrcp.f32 %v3485_v34 }
0x168b   :  { %v6235_v42 = vpop.eup %6234 }
0x168c   :  { %5426 = vmatmul.mubr.msk.f32.vlgmr.msra.gmra.mrb[42].mxu1 %vm1905_vm7, %v6235_v42 }
0x168d   :  { %6176 = vmatpush3.bf16.msra.mxu1 %v7174_v17  ;;  %5460 = vmatprep.mubr.msk.f32.mxu1 %vm6313_vm6, %v6314_v4  ;;  %v3569_v17 = vadd.f32 %v3568_v40, %v3567_v49 }
0x168e   :  { %6177 = vmatprep.subr.bf16.mxu1 %v6312_v44 }
0x1691   :  { %6179 = vmatpush3.bf16.msra.mxu1 %v7184_v9  ;;  %v3570_v9 = vrot.slane %v3569_v17, 2 }
0x1692   :  { %6180 = vmatprep.subr.bf16.mxu1 %v6312_v44 }
0x1693   :  { %v3571_v43 = vadd.f32 %v3570_v9, %v3569_v17 }
0x1695   :  { %6182 = vmatpush3.bf16.msra.mxu1 %v7194_v11  ;;  %v3572_v11 = vrot.slane %v3571_v43, 1 }
0x1696   :  { %6183 = vmatprep.subr.bf16.mxu1 %v6312_v44 }
0x1699   :  { %6185 = vmatpush3.bf16.msra.mxu1 %v7204_v51  ;;  %v3573_v51 = vadd.f32 %v3572_v11, %v3571_v43 }
0x169a   :  { %6186 = vmatprep.subr.bf16.mxu1 %v6312_v44 }
0x169d   :  { %6188 = vmatpush3.bf16.msra.mxu1 %v7214_v55 }
0x169e   :  { %6189 = vmatprep.subr.bf16.mxu1 %v6312_v44 }
0x16a1   :  { %6191 = vmatpush3.bf16.msra.mxu1 %v7223_v18 }
0x16a2   :  { %6192 = vmatprep.subr.bf16.mxu1 %v6312_v44 }
0x16a5   :  { %6194 = vmatpush3.bf16.msra.mxu1 %v7233_v20 }
0x16a6   :  { %6195 = vmatprep.subr.bf16.mxu1 %v6312_v44  ;;  %v2481_v44 = vsel %vm2478_vm13, %v7437_v39, %v7557_v56 }
0x16a9   :  { %6197 = vmatpush3.bf16.msra.mxu1 %v7244_v26  ;;  %v2482_v26 = vsel %vm2478_vm13, %v7513_v30, %v7559_v59 }
0x16ac   :  { %5461 = vmatmul.mubr.f32.vlgmr.msra.gmra.mrb[44].mxu1 %v3573_v51 }
0x175f   :  { %v3557_v60 = vpop.f32.mrb[42].mxu1 }
0x1760   :  { %v3564_v55 = vrot.slane %v3557_v60, %v6707_v48  ;;  %v5427_v12 = vpop.f32.mrb[43].mxu1 }
0x1762   :  { %v3565_v23 = vmul.f32 %v3564_v55, %v7726_v33  ;;  %v3566_v18 = vmul.f32 %v3564_v55, %v7728_v45  ;;  %v3887_v33 = vmul.f32 %v7602_v37, %v2481_v44  ;;  %v3888_v45 = vmul.f32 %v7602_v37, %v2482_v26 }
0x1764   :  { %v3876_v21 = vadd.f32 %v7437_v39, %v3565_v23  ;;  %v3877_v20 = vadd.f32 %v7513_v30, %v3566_v18 }
0x1766   :  { %v3880_v50 = vmax.f32 %v3876_v21, 0.0  ;;  %v3881_v52 = vmax.f32 %v3877_v20, 0.0 }
0x1768   :  { %v3892_v7 = vmul.f32 %v3891_v15, %v3880_v50  ;;  %v3893_v38 = vmul.f32 %v3891_v15, %v3881_v52 }
0x176a   :  { %v3896_v28 = vadd.f32 %v3892_v7, %v3887_v33  ;;  %v3897_v35 = vadd.f32 %v3893_v38, %v3888_v45 }
0x176c   :  { %3900 = vst [vmem:[%s7841_s15] sm:$0xff] %v3896_v28  ;;  %3901 = vst [vmem:[%s7841_s15 + $0x8] sm:$0xff] %v3897_v35 }
0x177f   :  { %v3640_v39 = vpop.f32.mrb[44].mxu1 }
0x1780   :  { %v5462_v30 = vpop.f32.mrb[45].mxu1  ;;  %5466 = vmatmul.mubr.msk.f32.vlgmr.msra.gmra.mrb[52].mxu0 %vm1905_vm7, %v3640_v39 }
0x1781   :  { %5469 = vmatpush3.msk.msra.mxu0 %vm153_vm1, %v7743_v5  ;;  %5470 = vmatprep.mubr.msk.f32.mxu0 %vm6313_vm6, %v6314_v4 }
0x1782   :  { %5473 = vmatprep.subr.mxu0 %v6314_v4 }
0x1853   :  { %v3713_v56 = vpop.f32.mrb[52].mxu0 }
0x1854   :  { %v3717_v59 = vmax.f32 %v3713_v56, 0.0  ;;  %v5467_v25 = vpop.f32.mrb[53].mxu0 }
0x1856   :  { %5471 = vmatmul.mubr.msk.f32.vlgmr.msra.gmra.mrb[54].mxu0 %vm1980_vm8, %v3717_v59 }
0x1857   :  { %5474 = vmatpush3.msra.mxu0 %v7755_v62  ;;  %5475 = vmatprep.mubr.msk.f32.mxu0 %vm6313_vm6, %v6314_v4 }
0x1929   :  { %v3787_v37 = vpop.f32.mrb[54].mxu0 }
0x192a   :  { %v3941_v8 = vmul.f32 -1.442695, %v3787_v37  ;;  %v5472_v1 = vpop.f32.mrb[55].mxu0 }
0x192c   :  { %6236 = vpow2.f32 %v3941_v8 }
0x1936   :  { %v6237_v61 = vpop.eup %6236 }
0x1937   :  { %v3794_v32 = vadd.f32 1.0, %v6237_v61 }
0x1939   :  { %6238 = vrcp.f32 %v3794_v32 }
0x1943   :  { %v6239_v47 = vpop.eup %6238 }
0x1944   :  { %5476 = vmatmul.mubr.msk.f32.vlgmr.msra.gmra.mrb[56].mxu0 %vm1905_vm7, %v6239_v47 }
0x1a17   :  { %v3866_v3 = vpop.f32.mrb[56].mxu0 }
0x1a18   :  { %v3873_v14 = vrot.slane %v3866_v3, %v6707_v48  ;;  %v5477_v57 = vpop.f32.mrb[57].mxu0 }
0x1a1a   :  { %v3874_v53 = vmul.f32 %v3873_v14, %v7736_v0  ;;  %v3875_v63 = vmul.f32 %v3873_v14, %v7738_v54 }
0x1a1c   :  { %v3878_v4 = vadd.f32 %v7522_v41, %v3874_v53  ;;  %v3879_v2 = vadd.f32 %v7533_v24, %v3875_v63 }
0x1a1e   :  { %v3882_v36 = vmax.f32 %v3878_v4, 0.0  ;;  %v3883_v5 = vmax.f32 %v3879_v2, 0.0 }
0x1a20   :  { %v3894_v19 = vmul.f32 %v3891_v15, %v3882_v36  ;;  %v3895_v58 = vmul.f32 %v3891_v15, %v3883_v5 }
0x1a22   :  { %v3898_v16 = vadd.f32 %v3894_v19, %v7614_v29  ;;  %v3899_v10 = vadd.f32 %v3895_v58, %v7617_v31 }
0x1a24   :  { %3902 = vst [vmem:[%s7841_s15 + $0x10] sm:$0xff] %v3898_v16  ;;  %3903 = vst [vmem:[%s7841_s15 + $0x18] sm:$0xff] %v3899_v10 }
0x1a25   :  { %3908 = vsyncpa [#allocation3], 1 }
0x1a26   :  { %3909 = vsyncpa [#allocation7], 1 }
0x1a27   :  { %3910 = vsyncpa [#allocation4], 1 }

</bundles_post_ra>
